<compile_context>
chip_gen: v5e
topology: v5e:2x2
jax: 0.10.0
libtpu: 0.0.40
codegen_flags: <defaults>
</compile_context>

<pallas_src>
import jax
import jax.numpy as jnp
from jax import lax
from jax.experimental import pallas as pl
from jax.experimental.pallas import tpu as pltpu

SPRING_K = 1.0  # experiment stiffness constant


def _pick_batch_tile(B):
    if B % 128 != 0:
        # TODO(synk): non-lane-aligned batch falls back to masked partial stores (correct, slow).
        return B
    # Prefer lane-aligned tiles with >= 2 batch tiles (v7x megacore sharding of the
    # "parallel" axis); 256-wide tiles also fill a full MXU pass on v6e/v7x.
    for bt in (2048, 1024, 512, 256, 128):
        if B % bt == 0 and B // bt >= 2:
            return bt
    return min(B, 2048)


def _pick_time_chunk(T, desired):
    tc = max(1, min(desired, T))
    while T % tc != 0:
        tc -= 1
    return tc


def hyper_euler_trajectory(q0, p0, m, ts, dts, params, *, batch_tile=None, time_chunk=8):
    """Run T fused HyperEuler steps in a single pallas_call.

    q0, p0, m: [B, D] float32; ts, dts: [T] float32.
    Returns (q_traj, p_traj) of shape [T, B, D] (state after each step).
    """
    B, D = q0.shape
    T = int(dts.shape[0])
    H = params["w2"].shape[0]

    BT = _pick_batch_tile(B) if batch_tile is None else batch_tile
    assert B % BT == 0, "batch tile must divide batch"
    TC = _pick_time_chunk(T, time_chunk)
    K = 5 * D + 4  # contraction rows: dq1 | dp1 | dq2 | dp2 | m | ones | dt | pad(2)

    # ---- host-side layout plumbing (once per trajectory) ----
    qp0 = jnp.concatenate([q0.T, p0.T], axis=0).astype(jnp.float32)          # [2D, B]
    m_t = m.T.astype(jnp.float32)                                            # [D,  B]
    # Fused first layer with the bias folded in; row order matches the in-kernel x slab.
    w1 = jnp.concatenate(
        [params["wq1"], params["wp1"], params["wq2"], params["wp2"], params["wm"],
         params["b1"], params["wdt"], jnp.zeros((2, H), jnp.float32)], axis=0)  # [K, H]
    w1t = w1.T                                                               # [H, K]
    w2t = params["w2"].T                                                     # [2D, H] (rows 0:D=q)
    b2 = params["b2"].T                                                      # [2D, 1]

    ts = jnp.asarray(ts, jnp.float32)
    dts = jnp.asarray(dts, jnp.float32)

    def kernel(ts_ref, dts_ref, qp0_ref, m_ref, w1t_ref, w2t_ref, b2_ref,
               out_ref, qp_s, x_s):
        # Grid is (batch, time) with time innermost; scratch-carried state depends on it.
        chunk = pl.program_id(1)

        @pl.when(chunk == 0)
        def _init():
            qp_s[...] = qp0_ref[...]
            x_s[4 * D:5 * D, :] = m_ref[...]                        # constant m rows
            x_s[5 * D:5 * D + 1, :] = jnp.ones((1, BT), jnp.float32)   # ones row -> b1
            x_s[5 * D + 1:, :] = jnp.zeros((3, BT), jnp.float32)       # dt row + pad

        def step_body(k, carry):
            step = chunk * TC + k
            dt = dts_ref[step]
            # t = ts_ref[step] is unused by this experiment/hypersolver (kept for fidelity).

            qp = qp_s[...]
            q, p = qp[:D], qp[D:]
            m_v = m_ref[...]

            # experiment(q, p, m, t): harmonic oscillator (exact divide, matches reference)
            dq1 = p / m_v
            dp1 = -SPRING_K * q
            x_s[0:D, :] = dq1
            x_s[D:2 * D, :] = dp1

            # base Euler step (shift = identity)
            q_b = q + dq1 * dt
            p_b = p + dp1 * dt

            # experiment at the base-stepped state
            dq2 = p_b / m_v
            dp2 = -SPRING_K * q_b
            x_s[2 * D:3 * D, :] = dq2
            x_s[3 * D:4 * D, :] = dp2
            x_s[5 * D + 1:5 * D + 2, :] = jnp.full((1, BT), dt, jnp.float32)  # dt row

            # hypersolver MLP: bias is folded into the single first-layer matmul
            z = jnp.dot(w1t_ref[...], x_s[...], preferred_element_type=jnp.float32)   # [H, BT]
            h = jnp.tanh(z)
            hqp = jnp.dot(w2t_ref[...], h, preferred_element_type=jnp.float32) + b2_ref[...]

            # q_order = p_order = 1  ->  residual scaled by dt**2
            dt2 = dt * dt
            qp_new = jnp.concatenate([q_b, p_b], axis=0) + hqp * dt2            # [2D, BT]

            qp_s[...] = qp_new
            out_ref[k] = qp_new
            return carry

        lax.fori_loop(0, TC, step_body, 0, unroll=True)

    const = lambda b, c, *_: (0, 0)
    batch = lambda b, c, *_: (0, b)

    grid_spec = pltpu.PrefetchScalarGridSpec(
        num_scalar_prefetch=2,
        grid=(B // BT, T // TC),
        in_specs=[
            pl.BlockSpec((2 * D, BT), batch),     # qp0
            pl.BlockSpec((D, BT), batch),         # m
            pl.BlockSpec((H, K), const),          # fused first layer (bias folded)
            pl.BlockSpec((2 * D, H), const),      # fused second layer
            pl.BlockSpec((2 * D, 1), const),      # fused second-layer bias
        ],
        out_specs=pl.BlockSpec((TC, 2 * D, BT), lambda b, c, *_: (c, 0, b)),
        scratch_shapes=[
            pltpu.VMEM((2 * D, BT), jnp.float32),   # resident q/p state
            pltpu.VMEM((K, BT), jnp.float32),       # MLP input slab
        ],
    )

    flops = T * B * (2 * H * K + 2 * (2 * D) * H + 14 * D)
    bytes_accessed = 4 * (3 * D * B + H * K + 2 * D * H + 2 * D + 2 * T + T * 2 * D * B)
    cost = pl.CostEstimate(flops=flops, transcendentals=T * B * H,
                           bytes_accessed=bytes_accessed)

    qp_traj = pl.pallas_call(
        kernel,
        out_shape=jax.ShapeDtypeStruct((T, 2 * D, B), jnp.float32),
        grid_spec=grid_spec,
        compiler_params=pltpu.CompilerParams(
            dimension_semantics=("parallel", "arbitrary")),
        cost_estimate=cost,
    )(ts, dts, qp0, m_t, w1t, w2t, b2)

    # back to the module's natural [T, B, D] layout
    q_traj = jnp.transpose(qp_traj[:, :D, :], (0, 2, 1))
    p_traj = jnp.transpose(qp_traj[:, D:, :], (0, 2, 1))
    return q_traj, p_traj


def hyper_euler_step(q, p, m, t, dt, params):
    """Single HyperEuler.forward step (a trajectory of length 1)."""
    ts = jnp.asarray([t], jnp.float32)
    dts = jnp.asarray([dt], jnp.float32)
    q_traj, p_traj = hyper_euler_trajectory(q, p, m, ts, dts, params)
    return q_traj[0], p_traj[0]


def init_hypersolver_params(key, D, H):
    """Deterministic init of the hypersolver MLP (synthetic weights, no checkpoint)."""
    ks = jax.random.split(key, 8)
    s = 0.1
    return {
        "wq1": s * jax.random.normal(ks[0], (D, H), jnp.float32),
        "wq2": s * jax.random.normal(ks[1], (D, H), jnp.float32),
        "wp1": s * jax.random.normal(ks[2], (D, H), jnp.float32),
        "wp2": s * jax.random.normal(ks[3], (D, H), jnp.float32),
        "wm":  s * jax.random.normal(ks[4], (D, H), jnp.float32),
        "wdt": s * jax.random.normal(ks[5], (1, H), jnp.float32),
        "b1":  jnp.zeros((1, H), jnp.float32),
        "w2":  s * jax.random.normal(ks[6], (H, 2 * D), jnp.float32),
        "b2":  jnp.zeros((1, 2 * D), jnp.float32),
    }


def _reference_trajectory(q0, p0, m, ts, dts, params):
    """Pure-JAX reference of the same T-step forward, for a sanity check."""
    D = q0.shape[-1]

    def step(carry, t_dt):
        q, p = carry
        t, dt = t_dt
        dq1 = p / m
        dp1 = -SPRING_K * q
        q_b = q + dq1 * dt
        p_b = p + dp1 * dt
        dq2 = p_b / m
        dp2 = -SPRING_K * q_b
        z = (dq1 @ params["wq1"] + dq2 @ params["wq2"] + dp1 @ params["wp1"]
             + dp2 @ params["wp2"] + m @ params["wm"]
             + dt * params["wdt"] + params["b1"])
        out = jnp.tanh(z) @ params["w2"] + params["b2"]
        hq, hp = out[:, :D], out[:, D:]
        q_n = q_b + hq * dt * dt
        p_n = p_b + hp * dt * dt
        return (q_n, p_n), (q_n, p_n)

    _, (q_traj, p_traj) = jax.lax.scan(step, (q0, p0), (ts, dts))
    return q_traj, p_traj


if __name__ == "__main__":
    # particles (lane axis), coord dims, hypersolver hidden width, fused timesteps
    B, D, H, T = 512, 4, 32, 32
    dt = 0.1

    key = jax.random.PRNGKey(0)
    kq, kp, km, kw = jax.random.split(key, 4)
    q0 = jax.random.normal(kq, (B, D), jnp.float32)
    p0 = jax.random.normal(kp, (B, D), jnp.float32)
    m = 1.0 + jax.random.uniform(km, (B, D), jnp.float32)  # positive masses

    params = init_hypersolver_params(kw, D, H)

    ts = jnp.arange(T, dtype=jnp.float32) * dt
    dts = jnp.full((T,), dt, jnp.float32)

    # fused multi-step trajectory (one pallas_call for all T steps)
    q_traj, p_traj = hyper_euler_trajectory(q0, p0, m, ts, dts, params)
    jax.block_until_ready((q_traj, p_traj))

    q_ref, p_ref = _reference_trajectory(q0, p0, m, ts, dts, params)
    assert jnp.allclose(q_traj, q_ref, atol=2e-4, rtol=2e-4), "q trajectory mismatch"
    assert jnp.allclose(p_traj, p_ref, atol=2e-4, rtol=2e-4), "p trajectory mismatch"

    # single forward step (HyperEuler.forward) parity
    q1, p1 = hyper_euler_step(q0, p0, m, 0.0, dt, params)
    jax.block_until_ready((q1, p1))
    assert jnp.allclose(q1, q_ref[0], atol=1e-5, rtol=1e-5), "single-step q mismatch"
    assert jnp.allclose(p1, p_ref[0], atol=1e-5, rtol=1e-5), "single-step p mismatch"

    print("KERNEL_OK")
</pallas_src>

<mosaic_0001>
module attributes {stable_mosaic.version = 11 : i64} {
  func.func @kernel(%arg0: i32, %arg1: i32, %arg2: memref<32xf32, #tpu.memory_space<smem>>, %arg3: memref<32xf32, #tpu.memory_space<smem>>, %arg4: memref<8x256xf32, #tpu.memory_space<vmem>>, %arg5: memref<4x256xf32, #tpu.memory_space<vmem>>, %arg6: memref<32x24xf32, #tpu.memory_space<vmem>>, %arg7: memref<8x32xf32, #tpu.memory_space<vmem>>, %arg8: memref<8x1xf32, #tpu.memory_space<vmem>>, %arg9: memref<8x8x256xf32, #tpu.memory_space<vmem>>, %arg10: memref<8x256xf32, #tpu.memory_space<vmem>>, %arg11: memref<24x256xf32, #tpu.memory_space<vmem>>) attributes {dimension_semantics = [#tpu.dimension_semantics<parallel>, #tpu.dimension_semantics<arbitrary>], iteration_bounds = array<i64: 2, 4>, scalar_prefetch = 2 : i64, scratch_operands = 2 : i64, tpu.core_type = #tpu.core_type<tc>, window_params = [{transform_indices = @transform_0, window_bounds = array<i64: 8, 256>}, {transform_indices = @transform_1, window_bounds = array<i64: 4, 256>}, {pipeline_mode = #tpu.pipeline_mode<synchronous>, transform_indices = @transform_2, window_bounds = array<i64: 32, 24>}, {pipeline_mode = #tpu.pipeline_mode<synchronous>, transform_indices = @transform_3, window_bounds = array<i64: 8, 32>}, {pipeline_mode = #tpu.pipeline_mode<synchronous>, transform_indices = @transform_4, window_bounds = array<i64: 8, 1>}, {transform_indices = @transform_5, window_bounds = array<i64: 8, 8, 256>}]} {
    %c0_i32 = arith.constant 0 : i32
    %0 = arith.cmpi eq, %arg1, %c0_i32 : i32
    %1 = arith.extui %0 : i1 to i32
    %c0_i32_0 = arith.constant 0 : i32
    %2 = arith.cmpi ne, %1, %c0_i32_0 : i32
    scf.if %2 {
      %c0_244 = arith.constant 0 : index
      %c0_245 = arith.constant 0 : index
      %363 = vector.load %arg4[%c0_244, %c0_245] : memref<8x256xf32, #tpu.memory_space<vmem>>, vector<8x256xf32>
      %c0_246 = arith.constant 0 : index
      %c0_247 = arith.constant 0 : index
      %364 = vector.load %arg10[%c0_246, %c0_247] : memref<8x256xf32, #tpu.memory_space<vmem>>, vector<8x256xf32>
      tpu.vector_store %arg10[%c0_246, %c0_247], %363 {strides = array<i32>} : memref<8x256xf32, #tpu.memory_space<vmem>>, vector<8x256xf32>,
      %c0_248 = arith.constant 0 : index
      %c0_249 = arith.constant 0 : index
      %365 = vector.load %arg5[%c0_248, %c0_249] : memref<4x256xf32, #tpu.memory_space<vmem>>, vector<4x256xf32>
      %c16 = arith.constant 16 : index
      %c0_250 = arith.constant 0 : index
      %366 = vector.load %arg11[%c16, %c0_250] : memref<24x256xf32, #tpu.memory_space<vmem>>, vector<4x256xf32>
      tpu.vector_store %arg11[%c16, %c0_250], %365 {strides = array<i32>} : memref<24x256xf32, #tpu.memory_space<vmem>>, vector<4x256xf32>,
      %cst_251 = arith.constant 1.000000e+00 : f32
      %367 = vector.broadcast %cst_251 : f32 to vector<1x256xf32>
      %c20 = arith.constant 20 : index
      %c0_252 = arith.constant 0 : index
      %368 = vector.load %arg11[%c20, %c0_252] : memref<24x256xf32, #tpu.memory_space<vmem>>, vector<1x256xf32>
      tpu.vector_store %arg11[%c20, %c0_252], %367 {strides = array<i32>} : memref<24x256xf32, #tpu.memory_space<vmem>>, vector<1x256xf32>,
      %cst_253 = arith.constant 0.000000e+00 : f32
      %369 = vector.broadcast %cst_253 : f32 to vector<3x256xf32>
      %c21_254 = arith.constant 21 : index
      %c0_255 = arith.constant 0 : index
      %370 = vector.load %arg11[%c21_254, %c0_255] : memref<24x256xf32, #tpu.memory_space<vmem>>, vector<3x256xf32>
      tpu.vector_store %arg11[%c21_254, %c0_255], %369 {strides = array<i32>} : memref<24x256xf32, #tpu.memory_space<vmem>>, vector<3x256xf32>,
    } else {
    }
    %c0_i32_1 = arith.constant 0 : i32
    %c8_i32 = arith.constant 8 : i32
    %3 = arith.muli %arg1, %c8_i32 : i32
    %4 = arith.addi %3, %c0_i32_1 : i32
    %5 = arith.index_cast %4 : i32 to index
    %6 = memref.load %arg3[%5] : memref<32xf32, #tpu.memory_space<smem>>
    %c0 = arith.constant 0 : index
    %c0_2 = arith.constant 0 : index
    %7 = vector.load %arg10[%c0, %c0_2] : memref<8x256xf32, #tpu.memory_space<vmem>>, vector<8x256xf32>
    %8 = vector.extract_strided_slice %7 {offsets = [0, 0], sizes = [4, 256], strides = [1, 1]} : vector<8x256xf32> to vector<4x256xf32>
    %9 = vector.extract_strided_slice %7 {offsets = [4, 0], sizes = [4, 256], strides = [1, 1]} : vector<8x256xf32> to vector<4x256xf32>
    %c0_3 = arith.constant 0 : index
    %c0_4 = arith.constant 0 : index
    %10 = vector.load %arg5[%c0_3, %c0_4] : memref<4x256xf32, #tpu.memory_space<vmem>>, vector<4x256xf32>
    %11 = arith.divf %9, %10 : vector<4x256xf32>
    %cst = arith.constant -1.000000e+00 : f32
    %12 = vector.broadcast %cst : f32 to vector<4x256xf32>
    %13 = arith.mulf %12, %8 : vector<4x256xf32>
    %c0_5 = arith.constant 0 : index
    %c0_6 = arith.constant 0 : index
    %14 = vector.load %arg11[%c0_5, %c0_6] : memref<24x256xf32, #tpu.memory_space<vmem>>, vector<4x256xf32>
    tpu.vector_store %arg11[%c0_5, %c0_6], %11 {strides = array<i32>} : memref<24x256xf32, #tpu.memory_space<vmem>>, vector<4x256xf32>,
    %c4 = arith.constant 4 : index
    %c0_7 = arith.constant 0 : index
    %15 = vector.load %arg11[%c4, %c0_7] : memref<24x256xf32, #tpu.memory_space<vmem>>, vector<4x256xf32>
    tpu.vector_store %arg11[%c4, %c0_7], %13 {strides = array<i32>} : memref<24x256xf32, #tpu.memory_space<vmem>>, vector<4x256xf32>,
    %16 = vector.broadcast %6 : f32 to vector<4x256xf32>
    %17 = arith.mulf %11, %16 : vector<4x256xf32>
    %18 = arith.addf %8, %17 : vector<4x256xf32>
    %19 = vector.broadcast %6 : f32 to vector<4x256xf32>
    %20 = arith.mulf %13, %19 : vector<4x256xf32>
    %21 = arith.addf %9, %20 : vector<4x256xf32>
    %22 = arith.divf %21, %10 : vector<4x256xf32>
    %cst_8 = arith.constant -1.000000e+00 : f32
    %23 = vector.broadcast %cst_8 : f32 to vector<4x256xf32>
    %24 = arith.mulf %23, %18 : vector<4x256xf32>
    %c8 = arith.constant 8 : index
    %c0_9 = arith.constant 0 : index
    %25 = vector.load %arg11[%c8, %c0_9] : memref<24x256xf32, #tpu.memory_space<vmem>>, vector<4x256xf32>
    tpu.vector_store %arg11[%c8, %c0_9], %22 {strides = array<i32>} : memref<24x256xf32, #tpu.memory_space<vmem>>, vector<4x256xf32>,
    %c12 = arith.constant 12 : index
    %c0_10 = arith.constant 0 : index
    %26 = vector.load %arg11[%c12, %c0_10] : memref<24x256xf32, #tpu.memory_space<vmem>>, vector<4x256xf32>
    tpu.vector_store %arg11[%c12, %c0_10], %24 {strides = array<i32>} : memref<24x256xf32, #tpu.memory_space<vmem>>, vector<4x256xf32>,
    %27 = vector.broadcast %6 : f32 to vector<1x256xf32>
    %c21 = arith.constant 21 : index
    %c0_11 = arith.constant 0 : index
    %28 = vector.load %arg11[%c21, %c0_11] : memref<24x256xf32, #tpu.memory_space<vmem>>, vector<1x256xf32>
    tpu.vector_store %arg11[%c21, %c0_11], %27 {strides = array<i32>} : memref<24x256xf32, #tpu.memory_space<vmem>>, vector<1x256xf32>,
    %c0_12 = arith.constant 0 : index
    %c0_13 = arith.constant 0 : index
    %29 = vector.load %arg6[%c0_12, %c0_13] : memref<32x24xf32, #tpu.memory_space<vmem>>, vector<32x24xf32>
    %c0_14 = arith.constant 0 : index
    %c0_15 = arith.constant 0 : index
    %30 = vector.load %arg11[%c0_14, %c0_15] : memref<24x256xf32, #tpu.memory_space<vmem>>, vector<24x256xf32>
    %cst_16 = arith.constant dense<0.000000e+00> : vector<32x256xf32>
    %31 = tpu.matmul %29, %30, %cst_16 {dimension_numbers = #tpu.dot_dimension_numbers<[1], [0], [0], [1], [0, 0, 1, 1], [], []>} : vector<32x24xf32>, vector<24x256xf32>, vector<32x256xf32> -> vector<32x256xf32>
    %32 = math.tanh %31 : vector<32x256xf32>
    %c0_17 = arith.constant 0 : index
    %c0_18 = arith.constant 0 : index
    %33 = vector.load %arg7[%c0_17, %c0_18] : memref<8x32xf32, #tpu.memory_space<vmem>>, vector<8x32xf32>
    %cst_19 = arith.constant dense<0.000000e+00> : vector<8x256xf32>
    %34 = tpu.matmul %33, %32, %cst_19 {dimension_numbers = #tpu.dot_dimension_numbers<[1], [0], [0], [1], [0, 0, 1, 1], [], []>} : vector<8x32xf32>, vector<32x256xf32>, vector<8x256xf32> -> vector<8x256xf32>
    %c0_20 = arith.constant 0 : index
    %c0_21 = arith.constant 0 : index
    %35 = vector.load %arg8[%c0_20, %c0_21] : memref<8x1xf32, #tpu.memory_space<vmem>>, vector<8x1xf32>
    %36 = vector.broadcast %35 : vector<8x1xf32> to vector<8x256xf32>
    %37 = arith.addf %34, %36 : vector<8x256xf32>
    %38 = arith.mulf %6, %6 : f32
    %39 = tpu.concatenate %18, %21 in 0 : vector<4x256xf32>, vector<4x256xf32> -> vector<8x256xf32>
    %40 = vector.broadcast %38 : f32 to vector<8x256xf32>
    %41 = arith.mulf %37, %40 : vector<8x256xf32>
    %42 = arith.addf %39, %41 : vector<8x256xf32>
    %c0_22 = arith.constant 0 : index
    %c0_23 = arith.constant 0 : index
    %43 = vector.load %arg10[%c0_22, %c0_23] : memref<8x256xf32, #tpu.memory_space<vmem>>, vector<8x256xf32>
    tpu.vector_store %arg10[%c0_22, %c0_23], %42 {strides = array<i32>} : memref<8x256xf32, #tpu.memory_space<vmem>>, vector<8x256xf32>,
    %44 = arith.index_cast %c0_i32_1 : i32 to index
    %c0_24 = arith.constant 0 : index
    %c0_25 = arith.constant 0 : index
    %45 = vector.load %arg9[%44, %c0_24, %c0_25] : memref<8x8x256xf32, #tpu.memory_space<vmem>>, vector<1x8x256xf32>
    %46 = vector.shape_cast %45 : vector<1x8x256xf32> to vector<8x256xf32>
    %47 = vector.shape_cast %42 : vector<8x256xf32> to vector<1x8x256xf32>
    tpu.vector_store %arg9[%44, %c0_24, %c0_25], %47 {strides = array<i32>} : memref<8x8x256xf32, #tpu.memory_space<vmem>>, vector<1x8x256xf32>,
    %c1_i32 = arith.constant 1 : i32
    %c8_i32_26 = arith.constant 8 : i32
    %48 = arith.muli %arg1, %c8_i32_26 : i32
    %49 = arith.addi %48, %c1_i32 : i32
    %50 = arith.index_cast %49 : i32 to index
    %51 = memref.load %arg3[%50] : memref<32xf32, #tpu.memory_space<smem>>
    %c0_27 = arith.constant 0 : index
    %c0_28 = arith.constant 0 : index
    %52 = vector.load %arg10[%c0_27, %c0_28] : memref<8x256xf32, #tpu.memory_space<vmem>>, vector<8x256xf32>
    %53 = vector.extract_strided_slice %52 {offsets = [0, 0], sizes = [4, 256], strides = [1, 1]} : vector<8x256xf32> to vector<4x256xf32>
    %54 = vector.extract_strided_slice %52 {offsets = [4, 0], sizes = [4, 256], strides = [1, 1]} : vector<8x256xf32> to vector<4x256xf32>
    %c0_29 = arith.constant 0 : index
    %c0_30 = arith.constant 0 : index
    %55 = vector.load %arg5[%c0_29, %c0_30] : memref<4x256xf32, #tpu.memory_space<vmem>>, vector<4x256xf32>
    %56 = arith.divf %54, %55 : vector<4x256xf32>
    %cst_31 = arith.constant -1.000000e+00 : f32
    %57 = vector.broadcast %cst_31 : f32 to vector<4x256xf32>
    %58 = arith.mulf %57, %53 : vector<4x256xf32>
    %c0_32 = arith.constant 0 : index
    %c0_33 = arith.constant 0 : index
    %59 = vector.load %arg11[%c0_32, %c0_33] : memref<24x256xf32, #tpu.memory_space<vmem>>, vector<4x256xf32>
    tpu.vector_store %arg11[%c0_32, %c0_33], %56 {strides = array<i32>} : memref<24x256xf32, #tpu.memory_space<vmem>>, vector<4x256xf32>,
    %c4_34 = arith.constant 4 : index
    %c0_35 = arith.constant 0 : index
    %60 = vector.load %arg11[%c4_34, %c0_35] : memref<24x256xf32, #tpu.memory_space<vmem>>, vector<4x256xf32>
    tpu.vector_store %arg11[%c4_34, %c0_35], %58 {strides = array<i32>} : memref<24x256xf32, #tpu.memory_space<vmem>>, vector<4x256xf32>,
    %61 = vector.broadcast %51 : f32 to vector<4x256xf32>
    %62 = arith.mulf %56, %61 : vector<4x256xf32>
    %63 = arith.addf %53, %62 : vector<4x256xf32>
    %64 = vector.broadcast %51 : f32 to vector<4x256xf32>
    %65 = arith.mulf %58, %64 : vector<4x256xf32>
    %66 = arith.addf %54, %65 : vector<4x256xf32>
    %67 = arith.divf %66, %55 : vector<4x256xf32>
    %cst_36 = arith.constant -1.000000e+00 : f32
    %68 = vector.broadcast %cst_36 : f32 to vector<4x256xf32>
    %69 = arith.mulf %68, %63 : vector<4x256xf32>
    %c8_37 = arith.constant 8 : index
    %c0_38 = arith.constant 0 : index
    %70 = vector.load %arg11[%c8_37, %c0_38] : memref<24x256xf32, #tpu.memory_space<vmem>>, vector<4x256xf32>
    tpu.vector_store %arg11[%c8_37, %c0_38], %67 {strides = array<i32>} : memref<24x256xf32, #tpu.memory_space<vmem>>, vector<4x256xf32>,
    %c12_39 = arith.constant 12 : index
    %c0_40 = arith.constant 0 : index
    %71 = vector.load %arg11[%c12_39, %c0_40] : memref<24x256xf32, #tpu.memory_space<vmem>>, vector<4x256xf32>
    tpu.vector_store %arg11[%c12_39, %c0_40], %69 {strides = array<i32>} : memref<24x256xf32, #tpu.memory_space<vmem>>, vector<4x256xf32>,
    %72 = vector.broadcast %51 : f32 to vector<1x256xf32>
    %c21_41 = arith.constant 21 : index
    %c0_42 = arith.constant 0 : index
    %73 = vector.load %arg11[%c21_41, %c0_42] : memref<24x256xf32, #tpu.memory_space<vmem>>, vector<1x256xf32>
    tpu.vector_store %arg11[%c21_41, %c0_42], %72 {strides = array<i32>} : memref<24x256xf32, #tpu.memory_space<vmem>>, vector<1x256xf32>,
    %c0_43 = arith.constant 0 : index
    %c0_44 = arith.constant 0 : index
    %74 = vector.load %arg6[%c0_43, %c0_44] : memref<32x24xf32, #tpu.memory_space<vmem>>, vector<32x24xf32>
    %c0_45 = arith.constant 0 : index
    %c0_46 = arith.constant 0 : index
    %75 = vector.load %arg11[%c0_45, %c0_46] : memref<24x256xf32, #tpu.memory_space<vmem>>, vector<24x256xf32>
    %cst_47 = arith.constant dense<0.000000e+00> : vector<32x256xf32>
    %76 = tpu.matmul %74, %75, %cst_47 {dimension_numbers = #tpu.dot_dimension_numbers<[1], [0], [0], [1], [0, 0, 1, 1], [], []>} : vector<32x24xf32>, vector<24x256xf32>, vector<32x256xf32> -> vector<32x256xf32>
    %77 = math.tanh %76 : vector<32x256xf32>
    %c0_48 = arith.constant 0 : index
    %c0_49 = arith.constant 0 : index
    %78 = vector.load %arg7[%c0_48, %c0_49] : memref<8x32xf32, #tpu.memory_space<vmem>>, vector<8x32xf32>
    %cst_50 = arith.constant dense<0.000000e+00> : vector<8x256xf32>
    %79 = tpu.matmul %78, %77, %cst_50 {dimension_numbers = #tpu.dot_dimension_numbers<[1], [0], [0], [1], [0, 0, 1, 1], [], []>} : vector<8x32xf32>, vector<32x256xf32>, vector<8x256xf32> -> vector<8x256xf32>
    %c0_51 = arith.constant 0 : index
    %c0_52 = arith.constant 0 : index
    %80 = vector.load %arg8[%c0_51, %c0_52] : memref<8x1xf32, #tpu.memory_space<vmem>>, vector<8x1xf32>
    %81 = vector.broadcast %80 : vector<8x1xf32> to vector<8x256xf32>
    %82 = arith.addf %79, %81 : vector<8x256xf32>
    %83 = arith.mulf %51, %51 : f32
    %84 = tpu.concatenate %63, %66 in 0 : vector<4x256xf32>, vector<4x256xf32> -> vector<8x256xf32>
    %85 = vector.broadcast %83 : f32 to vector<8x256xf32>
    %86 = arith.mulf %82, %85 : vector<8x256xf32>
    %87 = arith.addf %84, %86 : vector<8x256xf32>
    %c0_53 = arith.constant 0 : index
    %c0_54 = arith.constant 0 : index
    %88 = vector.load %arg10[%c0_53, %c0_54] : memref<8x256xf32, #tpu.memory_space<vmem>>, vector<8x256xf32>
    tpu.vector_store %arg10[%c0_53, %c0_54], %87 {strides = array<i32>} : memref<8x256xf32, #tpu.memory_space<vmem>>, vector<8x256xf32>,
    %89 = arith.index_cast %c1_i32 : i32 to index
    %c0_55 = arith.constant 0 : index
    %c0_56 = arith.constant 0 : index
    %90 = vector.load %arg9[%89, %c0_55, %c0_56] : memref<8x8x256xf32, #tpu.memory_space<vmem>>, vector<1x8x256xf32>
    %91 = vector.shape_cast %90 : vector<1x8x256xf32> to vector<8x256xf32>
    %92 = vector.shape_cast %87 : vector<8x256xf32> to vector<1x8x256xf32>
    tpu.vector_store %arg9[%89, %c0_55, %c0_56], %92 {strides = array<i32>} : memref<8x8x256xf32, #tpu.memory_space<vmem>>, vector<1x8x256xf32>,
    %c2_i32 = arith.constant 2 : i32
    %c8_i32_57 = arith.constant 8 : i32
    %93 = arith.muli %arg1, %c8_i32_57 : i32
    %94 = arith.addi %93, %c2_i32 : i32
    %95 = arith.index_cast %94 : i32 to index
    %96 = memref.load %arg3[%95] : memref<32xf32, #tpu.memory_space<smem>>
    %c0_58 = arith.constant 0 : index
    %c0_59 = arith.constant 0 : index
    %97 = vector.load %arg10[%c0_58, %c0_59] : memref<8x256xf32, #tpu.memory_space<vmem>>, vector<8x256xf32>
    %98 = vector.extract_strided_slice %97 {offsets = [0, 0], sizes = [4, 256], strides = [1, 1]} : vector<8x256xf32> to vector<4x256xf32>
    %99 = vector.extract_strided_slice %97 {offsets = [4, 0], sizes = [4, 256], strides = [1, 1]} : vector<8x256xf32> to vector<4x256xf32>
    %c0_60 = arith.constant 0 : index
    %c0_61 = arith.constant 0 : index
    %100 = vector.load %arg5[%c0_60, %c0_61] : memref<4x256xf32, #tpu.memory_space<vmem>>, vector<4x256xf32>
    %101 = arith.divf %99, %100 : vector<4x256xf32>
    %cst_62 = arith.constant -1.000000e+00 : f32
    %102 = vector.broadcast %cst_62 : f32 to vector<4x256xf32>
    %103 = arith.mulf %102, %98 : vector<4x256xf32>
    %c0_63 = arith.constant 0 : index
    %c0_64 = arith.constant 0 : index
    %104 = vector.load %arg11[%c0_63, %c0_64] : memref<24x256xf32, #tpu.memory_space<vmem>>, vector<4x256xf32>
    tpu.vector_store %arg11[%c0_63, %c0_64], %101 {strides = array<i32>} : memref<24x256xf32, #tpu.memory_space<vmem>>, vector<4x256xf32>,
    %c4_65 = arith.constant 4 : index
    %c0_66 = arith.constant 0 : index
    %105 = vector.load %arg11[%c4_65, %c0_66] : memref<24x256xf32, #tpu.memory_space<vmem>>, vector<4x256xf32>
    tpu.vector_store %arg11[%c4_65, %c0_66], %103 {strides = array<i32>} : memref<24x256xf32, #tpu.memory_space<vmem>>, vector<4x256xf32>,
    %106 = vector.broadcast %96 : f32 to vector<4x256xf32>
    %107 = arith.mulf %101, %106 : vector<4x256xf32>
    %108 = arith.addf %98, %107 : vector<4x256xf32>
    %109 = vector.broadcast %96 : f32 to vector<4x256xf32>
    %110 = arith.mulf %103, %109 : vector<4x256xf32>
    %111 = arith.addf %99, %110 : vector<4x256xf32>
    %112 = arith.divf %111, %100 : vector<4x256xf32>
    %cst_67 = arith.constant -1.000000e+00 : f32
    %113 = vector.broadcast %cst_67 : f32 to vector<4x256xf32>
    %114 = arith.mulf %113, %108 : vector<4x256xf32>
    %c8_68 = arith.constant 8 : index
    %c0_69 = arith.constant 0 : index
    %115 = vector.load %arg11[%c8_68, %c0_69] : memref<24x256xf32, #tpu.memory_space<vmem>>, vector<4x256xf32>
    tpu.vector_store %arg11[%c8_68, %c0_69], %112 {strides = array<i32>} : memref<24x256xf32, #tpu.memory_space<vmem>>, vector<4x256xf32>,
    %c12_70 = arith.constant 12 : index
    %c0_71 = arith.constant 0 : index
    %116 = vector.load %arg11[%c12_70, %c0_71] : memref<24x256xf32, #tpu.memory_space<vmem>>, vector<4x256xf32>
    tpu.vector_store %arg11[%c12_70, %c0_71], %114 {strides = array<i32>} : memref<24x256xf32, #tpu.memory_space<vmem>>, vector<4x256xf32>,
    %117 = vector.broadcast %96 : f32 to vector<1x256xf32>
    %c21_72 = arith.constant 21 : index
    %c0_73 = arith.constant 0 : index
    %118 = vector.load %arg11[%c21_72, %c0_73] : memref<24x256xf32, #tpu.memory_space<vmem>>, vector<1x256xf32>
    tpu.vector_store %arg11[%c21_72, %c0_73], %117 {strides = array<i32>} : memref<24x256xf32, #tpu.memory_space<vmem>>, vector<1x256xf32>,
    %c0_74 = arith.constant 0 : index
    %c0_75 = arith.constant 0 : index
    %119 = vector.load %arg6[%c0_74, %c0_75] : memref<32x24xf32, #tpu.memory_space<vmem>>, vector<32x24xf32>
    %c0_76 = arith.constant 0 : index
    %c0_77 = arith.constant 0 : index
    %120 = vector.load %arg11[%c0_76, %c0_77] : memref<24x256xf32, #tpu.memory_space<vmem>>, vector<24x256xf32>
    %cst_78 = arith.constant dense<0.000000e+00> : vector<32x256xf32>
    %121 = tpu.matmul %119, %120, %cst_78 {dimension_numbers = #tpu.dot_dimension_numbers<[1], [0], [0], [1], [0, 0, 1, 1], [], []>} : vector<32x24xf32>, vector<24x256xf32>, vector<32x256xf32> -> vector<32x256xf32>
    %122 = math.tanh %121 : vector<32x256xf32>
    %c0_79 = arith.constant 0 : index
    %c0_80 = arith.constant 0 : index
    %123 = vector.load %arg7[%c0_79, %c0_80] : memref<8x32xf32, #tpu.memory_space<vmem>>, vector<8x32xf32>
    %cst_81 = arith.constant dense<0.000000e+00> : vector<8x256xf32>
    %124 = tpu.matmul %123, %122, %cst_81 {dimension_numbers = #tpu.dot_dimension_numbers<[1], [0], [0], [1], [0, 0, 1, 1], [], []>} : vector<8x32xf32>, vector<32x256xf32>, vector<8x256xf32> -> vector<8x256xf32>
    %c0_82 = arith.constant 0 : index
    %c0_83 = arith.constant 0 : index
    %125 = vector.load %arg8[%c0_82, %c0_83] : memref<8x1xf32, #tpu.memory_space<vmem>>, vector<8x1xf32>
    %126 = vector.broadcast %125 : vector<8x1xf32> to vector<8x256xf32>
    %127 = arith.addf %124, %126 : vector<8x256xf32>
    %128 = arith.mulf %96, %96 : f32
    %129 = tpu.concatenate %108, %111 in 0 : vector<4x256xf32>, vector<4x256xf32> -> vector<8x256xf32>
    %130 = vector.broadcast %128 : f32 to vector<8x256xf32>
    %131 = arith.mulf %127, %130 : vector<8x256xf32>
    %132 = arith.addf %129, %131 : vector<8x256xf32>
    %c0_84 = arith.constant 0 : index
    %c0_85 = arith.constant 0 : index
    %133 = vector.load %arg10[%c0_84, %c0_85] : memref<8x256xf32, #tpu.memory_space<vmem>>, vector<8x256xf32>
    tpu.vector_store %arg10[%c0_84, %c0_85], %132 {strides = array<i32>} : memref<8x256xf32, #tpu.memory_space<vmem>>, vector<8x256xf32>,
    %134 = arith.index_cast %c2_i32 : i32 to index
    %c0_86 = arith.constant 0 : index
    %c0_87 = arith.constant 0 : index
    %135 = vector.load %arg9[%134, %c0_86, %c0_87] : memref<8x8x256xf32, #tpu.memory_space<vmem>>, vector<1x8x256xf32>
    %136 = vector.shape_cast %135 : vector<1x8x256xf32> to vector<8x256xf32>
    %137 = vector.shape_cast %132 : vector<8x256xf32> to vector<1x8x256xf32>
    tpu.vector_store %arg9[%134, %c0_86, %c0_87], %137 {strides = array<i32>} : memref<8x8x256xf32, #tpu.memory_space<vmem>>, vector<1x8x256xf32>,
    %c3_i32 = arith.constant 3 : i32
    %c8_i32_88 = arith.constant 8 : i32
    %138 = arith.muli %arg1, %c8_i32_88 : i32
    %139 = arith.addi %138, %c3_i32 : i32
    %140 = arith.index_cast %139 : i32 to index
    %141 = memref.load %arg3[%140] : memref<32xf32, #tpu.memory_space<smem>>
    %c0_89 = arith.constant 0 : index
    %c0_90 = arith.constant 0 : index
    %142 = vector.load %arg10[%c0_89, %c0_90] : memref<8x256xf32, #tpu.memory_space<vmem>>, vector<8x256xf32>
    %143 = vector.extract_strided_slice %142 {offsets = [0, 0], sizes = [4, 256], strides = [1, 1]} : vector<8x256xf32> to vector<4x256xf32>
    %144 = vector.extract_strided_slice %142 {offsets = [4, 0], sizes = [4, 256], strides = [1, 1]} : vector<8x256xf32> to vector<4x256xf32>
    %c0_91 = arith.constant 0 : index
    %c0_92 = arith.constant 0 : index
    %145 = vector.load %arg5[%c0_91, %c0_92] : memref<4x256xf32, #tpu.memory_space<vmem>>, vector<4x256xf32>
    %146 = arith.divf %144, %145 : vector<4x256xf32>
    %cst_93 = arith.constant -1.000000e+00 : f32
    %147 = vector.broadcast %cst_93 : f32 to vector<4x256xf32>
    %148 = arith.mulf %147, %143 : vector<4x256xf32>
    %c0_94 = arith.constant 0 : index
    %c0_95 = arith.constant 0 : index
    %149 = vector.load %arg11[%c0_94, %c0_95] : memref<24x256xf32, #tpu.memory_space<vmem>>, vector<4x256xf32>
    tpu.vector_store %arg11[%c0_94, %c0_95], %146 {strides = array<i32>} : memref<24x256xf32, #tpu.memory_space<vmem>>, vector<4x256xf32>,
    %c4_96 = arith.constant 4 : index
    %c0_97 = arith.constant 0 : index
    %150 = vector.load %arg11[%c4_96, %c0_97] : memref<24x256xf32, #tpu.memory_space<vmem>>, vector<4x256xf32>
    tpu.vector_store %arg11[%c4_96, %c0_97], %148 {strides = array<i32>} : memref<24x256xf32, #tpu.memory_space<vmem>>, vector<4x256xf32>,
    %151 = vector.broadcast %141 : f32 to vector<4x256xf32>
    %152 = arith.mulf %146, %151 : vector<4x256xf32>
    %153 = arith.addf %143, %152 : vector<4x256xf32>
    %154 = vector.broadcast %141 : f32 to vector<4x256xf32>
    %155 = arith.mulf %148, %154 : vector<4x256xf32>
    %156 = arith.addf %144, %155 : vector<4x256xf32>
    %157 = arith.divf %156, %145 : vector<4x256xf32>
    %cst_98 = arith.constant -1.000000e+00 : f32
    %158 = vector.broadcast %cst_98 : f32 to vector<4x256xf32>
    %159 = arith.mulf %158, %153 : vector<4x256xf32>
    %c8_99 = arith.constant 8 : index
    %c0_100 = arith.constant 0 : index
    %160 = vector.load %arg11[%c8_99, %c0_100] : memref<24x256xf32, #tpu.memory_space<vmem>>, vector<4x256xf32>
    tpu.vector_store %arg11[%c8_99, %c0_100], %157 {strides = array<i32>} : memref<24x256xf32, #tpu.memory_space<vmem>>, vector<4x256xf32>,
    %c12_101 = arith.constant 12 : index
    %c0_102 = arith.constant 0 : index
    %161 = vector.load %arg11[%c12_101, %c0_102] : memref<24x256xf32, #tpu.memory_space<vmem>>, vector<4x256xf32>
    tpu.vector_store %arg11[%c12_101, %c0_102], %159 {strides = array<i32>} : memref<24x256xf32, #tpu.memory_space<vmem>>, vector<4x256xf32>,
    %162 = vector.broadcast %141 : f32 to vector<1x256xf32>
    %c21_103 = arith.constant 21 : index
    %c0_104 = arith.constant 0 : index
    %163 = vector.load %arg11[%c21_103, %c0_104] : memref<24x256xf32, #tpu.memory_space<vmem>>, vector<1x256xf32>
    tpu.vector_store %arg11[%c21_103, %c0_104], %162 {strides = array<i32>} : memref<24x256xf32, #tpu.memory_space<vmem>>, vector<1x256xf32>,
    %c0_105 = arith.constant 0 : index
    %c0_106 = arith.constant 0 : index
    %164 = vector.load %arg6[%c0_105, %c0_106] : memref<32x24xf32, #tpu.memory_space<vmem>>, vector<32x24xf32>
    %c0_107 = arith.constant 0 : index
    %c0_108 = arith.constant 0 : index
    %165 = vector.load %arg11[%c0_107, %c0_108] : memref<24x256xf32, #tpu.memory_space<vmem>>, vector<24x256xf32>
    %cst_109 = arith.constant dense<0.000000e+00> : vector<32x256xf32>
    %166 = tpu.matmul %164, %165, %cst_109 {dimension_numbers = #tpu.dot_dimension_numbers<[1], [0], [0], [1], [0, 0, 1, 1], [], []>} : vector<32x24xf32>, vector<24x256xf32>, vector<32x256xf32> -> vector<32x256xf32>
    %167 = math.tanh %166 : vector<32x256xf32>
    %c0_110 = arith.constant 0 : index
    %c0_111 = arith.constant 0 : index
    %168 = vector.load %arg7[%c0_110, %c0_111] : memref<8x32xf32, #tpu.memory_space<vmem>>, vector<8x32xf32>
    %cst_112 = arith.constant dense<0.000000e+00> : vector<8x256xf32>
    %169 = tpu.matmul %168, %167, %cst_112 {dimension_numbers = #tpu.dot_dimension_numbers<[1], [0], [0], [1], [0, 0, 1, 1], [], []>} : vector<8x32xf32>, vector<32x256xf32>, vector<8x256xf32> -> vector<8x256xf32>
    %c0_113 = arith.constant 0 : index
    %c0_114 = arith.constant 0 : index
    %170 = vector.load %arg8[%c0_113, %c0_114] : memref<8x1xf32, #tpu.memory_space<vmem>>, vector<8x1xf32>
    %171 = vector.broadcast %170 : vector<8x1xf32> to vector<8x256xf32>
    %172 = arith.addf %169, %171 : vector<8x256xf32>
    %173 = arith.mulf %141, %141 : f32
    %174 = tpu.concatenate %153, %156 in 0 : vector<4x256xf32>, vector<4x256xf32> -> vector<8x256xf32>
    %175 = vector.broadcast %173 : f32 to vector<8x256xf32>
    %176 = arith.mulf %172, %175 : vector<8x256xf32>
    %177 = arith.addf %174, %176 : vector<8x256xf32>
    %c0_115 = arith.constant 0 : index
    %c0_116 = arith.constant 0 : index
    %178 = vector.load %arg10[%c0_115, %c0_116] : memref<8x256xf32, #tpu.memory_space<vmem>>, vector<8x256xf32>
    tpu.vector_store %arg10[%c0_115, %c0_116], %177 {strides = array<i32>} : memref<8x256xf32, #tpu.memory_space<vmem>>, vector<8x256xf32>,
    %179 = arith.index_cast %c3_i32 : i32 to index
    %c0_117 = arith.constant 0 : index
    %c0_118 = arith.constant 0 : index
    %180 = vector.load %arg9[%179, %c0_117, %c0_118] : memref<8x8x256xf32, #tpu.memory_space<vmem>>, vector<1x8x256xf32>
    %181 = vector.shape_cast %180 : vector<1x8x256xf32> to vector<8x256xf32>
    %182 = vector.shape_cast %177 : vector<8x256xf32> to vector<1x8x256xf32>
    tpu.vector_store %arg9[%179, %c0_117, %c0_118], %182 {strides = array<i32>} : memref<8x8x256xf32, #tpu.memory_space<vmem>>, vector<1x8x256xf32>,
    %c4_i32 = arith.constant 4 : i32
    %c8_i32_119 = arith.constant 8 : i32
    %183 = arith.muli %arg1, %c8_i32_119 : i32
    %184 = arith.addi %183, %c4_i32 : i32
    %185 = arith.index_cast %184 : i32 to index
    %186 = memref.load %arg3[%185] : memref<32xf32, #tpu.memory_space<smem>>
    %c0_120 = arith.constant 0 : index
    %c0_121 = arith.constant 0 : index
    %187 = vector.load %arg10[%c0_120, %c0_121] : memref<8x256xf32, #tpu.memory_space<vmem>>, vector<8x256xf32>
    %188 = vector.extract_strided_slice %187 {offsets = [0, 0], sizes = [4, 256], strides = [1, 1]} : vector<8x256xf32> to vector<4x256xf32>
    %189 = vector.extract_strided_slice %187 {offsets = [4, 0], sizes = [4, 256], strides = [1, 1]} : vector<8x256xf32> to vector<4x256xf32>
    %c0_122 = arith.constant 0 : index
    %c0_123 = arith.constant 0 : index
    %190 = vector.load %arg5[%c0_122, %c0_123] : memref<4x256xf32, #tpu.memory_space<vmem>>, vector<4x256xf32>
    %191 = arith.divf %189, %190 : vector<4x256xf32>
    %cst_124 = arith.constant -1.000000e+00 : f32
    %192 = vector.broadcast %cst_124 : f32 to vector<4x256xf32>
    %193 = arith.mulf %192, %188 : vector<4x256xf32>
    %c0_125 = arith.constant 0 : index
    %c0_126 = arith.constant 0 : index
    %194 = vector.load %arg11[%c0_125, %c0_126] : memref<24x256xf32, #tpu.memory_space<vmem>>, vector<4x256xf32>
    tpu.vector_store %arg11[%c0_125, %c0_126], %191 {strides = array<i32>} : memref<24x256xf32, #tpu.memory_space<vmem>>, vector<4x256xf32>,
    %c4_127 = arith.constant 4 : index
    %c0_128 = arith.constant 0 : index
    %195 = vector.load %arg11[%c4_127, %c0_128] : memref<24x256xf32, #tpu.memory_space<vmem>>, vector<4x256xf32>
    tpu.vector_store %arg11[%c4_127, %c0_128], %193 {strides = array<i32>} : memref<24x256xf32, #tpu.memory_space<vmem>>, vector<4x256xf32>,
    %196 = vector.broadcast %186 : f32 to vector<4x256xf32>
    %197 = arith.mulf %191, %196 : vector<4x256xf32>
    %198 = arith.addf %188, %197 : vector<4x256xf32>
    %199 = vector.broadcast %186 : f32 to vector<4x256xf32>
    %200 = arith.mulf %193, %199 : vector<4x256xf32>
    %201 = arith.addf %189, %200 : vector<4x256xf32>
    %202 = arith.divf %201, %190 : vector<4x256xf32>
    %cst_129 = arith.constant -1.000000e+00 : f32
    %203 = vector.broadcast %cst_129 : f32 to vector<4x256xf32>
    %204 = arith.mulf %203, %198 : vector<4x256xf32>
    %c8_130 = arith.constant 8 : index
    %c0_131 = arith.constant 0 : index
    %205 = vector.load %arg11[%c8_130, %c0_131] : memref<24x256xf32, #tpu.memory_space<vmem>>, vector<4x256xf32>
    tpu.vector_store %arg11[%c8_130, %c0_131], %202 {strides = array<i32>} : memref<24x256xf32, #tpu.memory_space<vmem>>, vector<4x256xf32>,
    %c12_132 = arith.constant 12 : index
    %c0_133 = arith.constant 0 : index
    %206 = vector.load %arg11[%c12_132, %c0_133] : memref<24x256xf32, #tpu.memory_space<vmem>>, vector<4x256xf32>
    tpu.vector_store %arg11[%c12_132, %c0_133], %204 {strides = array<i32>} : memref<24x256xf32, #tpu.memory_space<vmem>>, vector<4x256xf32>,
    %207 = vector.broadcast %186 : f32 to vector<1x256xf32>
    %c21_134 = arith.constant 21 : index
    %c0_135 = arith.constant 0 : index
    %208 = vector.load %arg11[%c21_134, %c0_135] : memref<24x256xf32, #tpu.memory_space<vmem>>, vector<1x256xf32>
    tpu.vector_store %arg11[%c21_134, %c0_135], %207 {strides = array<i32>} : memref<24x256xf32, #tpu.memory_space<vmem>>, vector<1x256xf32>,
    %c0_136 = arith.constant 0 : index
    %c0_137 = arith.constant 0 : index
    %209 = vector.load %arg6[%c0_136, %c0_137] : memref<32x24xf32, #tpu.memory_space<vmem>>, vector<32x24xf32>
    %c0_138 = arith.constant 0 : index
    %c0_139 = arith.constant 0 : index
    %210 = vector.load %arg11[%c0_138, %c0_139] : memref<24x256xf32, #tpu.memory_space<vmem>>, vector<24x256xf32>
    %cst_140 = arith.constant dense<0.000000e+00> : vector<32x256xf32>
    %211 = tpu.matmul %209, %210, %cst_140 {dimension_numbers = #tpu.dot_dimension_numbers<[1], [0], [0], [1], [0, 0, 1, 1], [], []>} : vector<32x24xf32>, vector<24x256xf32>, vector<32x256xf32> -> vector<32x256xf32>
    %212 = math.tanh %211 : vector<32x256xf32>
    %c0_141 = arith.constant 0 : index
    %c0_142 = arith.constant 0 : index
    %213 = vector.load %arg7[%c0_141, %c0_142] : memref<8x32xf32, #tpu.memory_space<vmem>>, vector<8x32xf32>
    %cst_143 = arith.constant dense<0.000000e+00> : vector<8x256xf32>
    %214 = tpu.matmul %213, %212, %cst_143 {dimension_numbers = #tpu.dot_dimension_numbers<[1], [0], [0], [1], [0, 0, 1, 1], [], []>} : vector<8x32xf32>, vector<32x256xf32>, vector<8x256xf32> -> vector<8x256xf32>
    %c0_144 = arith.constant 0 : index
    %c0_145 = arith.constant 0 : index
    %215 = vector.load %arg8[%c0_144, %c0_145] : memref<8x1xf32, #tpu.memory_space<vmem>>, vector<8x1xf32>
    %216 = vector.broadcast %215 : vector<8x1xf32> to vector<8x256xf32>
    %217 = arith.addf %214, %216 : vector<8x256xf32>
    %218 = arith.mulf %186, %186 : f32
    %219 = tpu.concatenate %198, %201 in 0 : vector<4x256xf32>, vector<4x256xf32> -> vector<8x256xf32>
    %220 = vector.broadcast %218 : f32 to vector<8x256xf32>
    %221 = arith.mulf %217, %220 : vector<8x256xf32>
    %222 = arith.addf %219, %221 : vector<8x256xf32>
    %c0_146 = arith.constant 0 : index
    %c0_147 = arith.constant 0 : index
    %223 = vector.load %arg10[%c0_146, %c0_147] : memref<8x256xf32, #tpu.memory_space<vmem>>, vector<8x256xf32>
    tpu.vector_store %arg10[%c0_146, %c0_147], %222 {strides = array<i32>} : memref<8x256xf32, #tpu.memory_space<vmem>>, vector<8x256xf32>,
    %224 = arith.index_cast %c4_i32 : i32 to index
    %c0_148 = arith.constant 0 : index
    %c0_149 = arith.constant 0 : index
    %225 = vector.load %arg9[%224, %c0_148, %c0_149] : memref<8x8x256xf32, #tpu.memory_space<vmem>>, vector<1x8x256xf32>
    %226 = vector.shape_cast %225 : vector<1x8x256xf32> to vector<8x256xf32>
    %227 = vector.shape_cast %222 : vector<8x256xf32> to vector<1x8x256xf32>
    tpu.vector_store %arg9[%224, %c0_148, %c0_149], %227 {strides = array<i32>} : memref<8x8x256xf32, #tpu.memory_space<vmem>>, vector<1x8x256xf32>,
    %c5_i32 = arith.constant 5 : i32
    %c8_i32_150 = arith.constant 8 : i32
    %228 = arith.muli %arg1, %c8_i32_150 : i32
    %229 = arith.addi %228, %c5_i32 : i32
    %230 = arith.index_cast %229 : i32 to index
    %231 = memref.load %arg3[%230] : memref<32xf32, #tpu.memory_space<smem>>
    %c0_151 = arith.constant 0 : index
    %c0_152 = arith.constant 0 : index
    %232 = vector.load %arg10[%c0_151, %c0_152] : memref<8x256xf32, #tpu.memory_space<vmem>>, vector<8x256xf32>
    %233 = vector.extract_strided_slice %232 {offsets = [0, 0], sizes = [4, 256], strides = [1, 1]} : vector<8x256xf32> to vector<4x256xf32>
    %234 = vector.extract_strided_slice %232 {offsets = [4, 0], sizes = [4, 256], strides = [1, 1]} : vector<8x256xf32> to vector<4x256xf32>
    %c0_153 = arith.constant 0 : index
    %c0_154 = arith.constant 0 : index
    %235 = vector.load %arg5[%c0_153, %c0_154] : memref<4x256xf32, #tpu.memory_space<vmem>>, vector<4x256xf32>
    %236 = arith.divf %234, %235 : vector<4x256xf32>
    %cst_155 = arith.constant -1.000000e+00 : f32
    %237 = vector.broadcast %cst_155 : f32 to vector<4x256xf32>
    %238 = arith.mulf %237, %233 : vector<4x256xf32>
    %c0_156 = arith.constant 0 : index
    %c0_157 = arith.constant 0 : index
    %239 = vector.load %arg11[%c0_156, %c0_157] : memref<24x256xf32, #tpu.memory_space<vmem>>, vector<4x256xf32>
    tpu.vector_store %arg11[%c0_156, %c0_157], %236 {strides = array<i32>} : memref<24x256xf32, #tpu.memory_space<vmem>>, vector<4x256xf32>,
    %c4_158 = arith.constant 4 : index
    %c0_159 = arith.constant 0 : index
    %240 = vector.load %arg11[%c4_158, %c0_159] : memref<24x256xf32, #tpu.memory_space<vmem>>, vector<4x256xf32>
    tpu.vector_store %arg11[%c4_158, %c0_159], %238 {strides = array<i32>} : memref<24x256xf32, #tpu.memory_space<vmem>>, vector<4x256xf32>,
    %241 = vector.broadcast %231 : f32 to vector<4x256xf32>
    %242 = arith.mulf %236, %241 : vector<4x256xf32>
    %243 = arith.addf %233, %242 : vector<4x256xf32>
    %244 = vector.broadcast %231 : f32 to vector<4x256xf32>
    %245 = arith.mulf %238, %244 : vector<4x256xf32>
    %246 = arith.addf %234, %245 : vector<4x256xf32>
    %247 = arith.divf %246, %235 : vector<4x256xf32>
    %cst_160 = arith.constant -1.000000e+00 : f32
    %248 = vector.broadcast %cst_160 : f32 to vector<4x256xf32>
    %249 = arith.mulf %248, %243 : vector<4x256xf32>
    %c8_161 = arith.constant 8 : index
    %c0_162 = arith.constant 0 : index
    %250 = vector.load %arg11[%c8_161, %c0_162] : memref<24x256xf32, #tpu.memory_space<vmem>>, vector<4x256xf32>
    tpu.vector_store %arg11[%c8_161, %c0_162], %247 {strides = array<i32>} : memref<24x256xf32, #tpu.memory_space<vmem>>, vector<4x256xf32>,
    %c12_163 = arith.constant 12 : index
    %c0_164 = arith.constant 0 : index
    %251 = vector.load %arg11[%c12_163, %c0_164] : memref<24x256xf32, #tpu.memory_space<vmem>>, vector<4x256xf32>
    tpu.vector_store %arg11[%c12_163, %c0_164], %249 {strides = array<i32>} : memref<24x256xf32, #tpu.memory_space<vmem>>, vector<4x256xf32>,
    %252 = vector.broadcast %231 : f32 to vector<1x256xf32>
    %c21_165 = arith.constant 21 : index
    %c0_166 = arith.constant 0 : index
    %253 = vector.load %arg11[%c21_165, %c0_166] : memref<24x256xf32, #tpu.memory_space<vmem>>, vector<1x256xf32>
    tpu.vector_store %arg11[%c21_165, %c0_166], %252 {strides = array<i32>} : memref<24x256xf32, #tpu.memory_space<vmem>>, vector<1x256xf32>,
    %c0_167 = arith.constant 0 : index
    %c0_168 = arith.constant 0 : index
    %254 = vector.load %arg6[%c0_167, %c0_168] : memref<32x24xf32, #tpu.memory_space<vmem>>, vector<32x24xf32>
    %c0_169 = arith.constant 0 : index
    %c0_170 = arith.constant 0 : index
    %255 = vector.load %arg11[%c0_169, %c0_170] : memref<24x256xf32, #tpu.memory_space<vmem>>, vector<24x256xf32>
    %cst_171 = arith.constant dense<0.000000e+00> : vector<32x256xf32>
    %256 = tpu.matmul %254, %255, %cst_171 {dimension_numbers = #tpu.dot_dimension_numbers<[1], [0], [0], [1], [0, 0, 1, 1], [], []>} : vector<32x24xf32>, vector<24x256xf32>, vector<32x256xf32> -> vector<32x256xf32>
    %257 = math.tanh %256 : vector<32x256xf32>
    %c0_172 = arith.constant 0 : index
    %c0_173 = arith.constant 0 : index
    %258 = vector.load %arg7[%c0_172, %c0_173] : memref<8x32xf32, #tpu.memory_space<vmem>>, vector<8x32xf32>
    %cst_174 = arith.constant dense<0.000000e+00> : vector<8x256xf32>
    %259 = tpu.matmul %258, %257, %cst_174 {dimension_numbers = #tpu.dot_dimension_numbers<[1], [0], [0], [1], [0, 0, 1, 1], [], []>} : vector<8x32xf32>, vector<32x256xf32>, vector<8x256xf32> -> vector<8x256xf32>
    %c0_175 = arith.constant 0 : index
    %c0_176 = arith.constant 0 : index
    %260 = vector.load %arg8[%c0_175, %c0_176] : memref<8x1xf32, #tpu.memory_space<vmem>>, vector<8x1xf32>
    %261 = vector.broadcast %260 : vector<8x1xf32> to vector<8x256xf32>
    %262 = arith.addf %259, %261 : vector<8x256xf32>
    %263 = arith.mulf %231, %231 : f32
    %264 = tpu.concatenate %243, %246 in 0 : vector<4x256xf32>, vector<4x256xf32> -> vector<8x256xf32>
    %265 = vector.broadcast %263 : f32 to vector<8x256xf32>
    %266 = arith.mulf %262, %265 : vector<8x256xf32>
    %267 = arith.addf %264, %266 : vector<8x256xf32>
    %c0_177 = arith.constant 0 : index
    %c0_178 = arith.constant 0 : index
    %268 = vector.load %arg10[%c0_177, %c0_178] : memref<8x256xf32, #tpu.memory_space<vmem>>, vector<8x256xf32>
    tpu.vector_store %arg10[%c0_177, %c0_178], %267 {strides = array<i32>} : memref<8x256xf32, #tpu.memory_space<vmem>>, vector<8x256xf32>,
    %269 = arith.index_cast %c5_i32 : i32 to index
    %c0_179 = arith.constant 0 : index
    %c0_180 = arith.constant 0 : index
    %270 = vector.load %arg9[%269, %c0_179, %c0_180] : memref<8x8x256xf32, #tpu.memory_space<vmem>>, vector<1x8x256xf32>
    %271 = vector.shape_cast %270 : vector<1x8x256xf32> to vector<8x256xf32>
    %272 = vector.shape_cast %267 : vector<8x256xf32> to vector<1x8x256xf32>
    tpu.vector_store %arg9[%269, %c0_179, %c0_180], %272 {strides = array<i32>} : memref<8x8x256xf32, #tpu.memory_space<vmem>>, vector<1x8x256xf32>,
    %c6_i32 = arith.constant 6 : i32
    %c8_i32_181 = arith.constant 8 : i32
    %273 = arith.muli %arg1, %c8_i32_181 : i32
    %274 = arith.addi %273, %c6_i32 : i32
    %275 = arith.index_cast %274 : i32 to index
    %276 = memref.load %arg3[%275] : memref<32xf32, #tpu.memory_space<smem>>
    %c0_182 = arith.constant 0 : index
    %c0_183 = arith.constant 0 : index
    %277 = vector.load %arg10[%c0_182, %c0_183] : memref<8x256xf32, #tpu.memory_space<vmem>>, vector<8x256xf32>
    %278 = vector.extract_strided_slice %277 {offsets = [0, 0], sizes = [4, 256], strides = [1, 1]} : vector<8x256xf32> to vector<4x256xf32>
    %279 = vector.extract_strided_slice %277 {offsets = [4, 0], sizes = [4, 256], strides = [1, 1]} : vector<8x256xf32> to vector<4x256xf32>
    %c0_184 = arith.constant 0 : index
    %c0_185 = arith.constant 0 : index
    %280 = vector.load %arg5[%c0_184, %c0_185] : memref<4x256xf32, #tpu.memory_space<vmem>>, vector<4x256xf32>
    %281 = arith.divf %279, %280 : vector<4x256xf32>
    %cst_186 = arith.constant -1.000000e+00 : f32
    %282 = vector.broadcast %cst_186 : f32 to vector<4x256xf32>
    %283 = arith.mulf %282, %278 : vector<4x256xf32>
    %c0_187 = arith.constant 0 : index
    %c0_188 = arith.constant 0 : index
    %284 = vector.load %arg11[%c0_187, %c0_188] : memref<24x256xf32, #tpu.memory_space<vmem>>, vector<4x256xf32>
    tpu.vector_store %arg11[%c0_187, %c0_188], %281 {strides = array<i32>} : memref<24x256xf32, #tpu.memory_space<vmem>>, vector<4x256xf32>,
    %c4_189 = arith.constant 4 : index
    %c0_190 = arith.constant 0 : index
    %285 = vector.load %arg11[%c4_189, %c0_190] : memref<24x256xf32, #tpu.memory_space<vmem>>, vector<4x256xf32>
    tpu.vector_store %arg11[%c4_189, %c0_190], %283 {strides = array<i32>} : memref<24x256xf32, #tpu.memory_space<vmem>>, vector<4x256xf32>,
    %286 = vector.broadcast %276 : f32 to vector<4x256xf32>
    %287 = arith.mulf %281, %286 : vector<4x256xf32>
    %288 = arith.addf %278, %287 : vector<4x256xf32>
    %289 = vector.broadcast %276 : f32 to vector<4x256xf32>
    %290 = arith.mulf %283, %289 : vector<4x256xf32>
    %291 = arith.addf %279, %290 : vector<4x256xf32>
    %292 = arith.divf %291, %280 : vector<4x256xf32>
    %cst_191 = arith.constant -1.000000e+00 : f32
    %293 = vector.broadcast %cst_191 : f32 to vector<4x256xf32>
    %294 = arith.mulf %293, %288 : vector<4x256xf32>
    %c8_192 = arith.constant 8 : index
    %c0_193 = arith.constant 0 : index
    %295 = vector.load %arg11[%c8_192, %c0_193] : memref<24x256xf32, #tpu.memory_space<vmem>>, vector<4x256xf32>
    tpu.vector_store %arg11[%c8_192, %c0_193], %292 {strides = array<i32>} : memref<24x256xf32, #tpu.memory_space<vmem>>, vector<4x256xf32>,
    %c12_194 = arith.constant 12 : index
    %c0_195 = arith.constant 0 : index
    %296 = vector.load %arg11[%c12_194, %c0_195] : memref<24x256xf32, #tpu.memory_space<vmem>>, vector<4x256xf32>
    tpu.vector_store %arg11[%c12_194, %c0_195], %294 {strides = array<i32>} : memref<24x256xf32, #tpu.memory_space<vmem>>, vector<4x256xf32>,
    %297 = vector.broadcast %276 : f32 to vector<1x256xf32>
    %c21_196 = arith.constant 21 : index
    %c0_197 = arith.constant 0 : index
    %298 = vector.load %arg11[%c21_196, %c0_197] : memref<24x256xf32, #tpu.memory_space<vmem>>, vector<1x256xf32>
    tpu.vector_store %arg11[%c21_196, %c0_197], %297 {strides = array<i32>} : memref<24x256xf32, #tpu.memory_space<vmem>>, vector<1x256xf32>,
    %c0_198 = arith.constant 0 : index
    %c0_199 = arith.constant 0 : index
    %299 = vector.load %arg6[%c0_198, %c0_199] : memref<32x24xf32, #tpu.memory_space<vmem>>, vector<32x24xf32>
    %c0_200 = arith.constant 0 : index
    %c0_201 = arith.constant 0 : index
    %300 = vector.load %arg11[%c0_200, %c0_201] : memref<24x256xf32, #tpu.memory_space<vmem>>, vector<24x256xf32>
    %cst_202 = arith.constant dense<0.000000e+00> : vector<32x256xf32>
    %301 = tpu.matmul %299, %300, %cst_202 {dimension_numbers = #tpu.dot_dimension_numbers<[1], [0], [0], [1], [0, 0, 1, 1], [], []>} : vector<32x24xf32>, vector<24x256xf32>, vector<32x256xf32> -> vector<32x256xf32>
    %302 = math.tanh %301 : vector<32x256xf32>
    %c0_203 = arith.constant 0 : index
    %c0_204 = arith.constant 0 : index
    %303 = vector.load %arg7[%c0_203, %c0_204] : memref<8x32xf32, #tpu.memory_space<vmem>>, vector<8x32xf32>
    %cst_205 = arith.constant dense<0.000000e+00> : vector<8x256xf32>
    %304 = tpu.matmul %303, %302, %cst_205 {dimension_numbers = #tpu.dot_dimension_numbers<[1], [0], [0], [1], [0, 0, 1, 1], [], []>} : vector<8x32xf32>, vector<32x256xf32>, vector<8x256xf32> -> vector<8x256xf32>
    %c0_206 = arith.constant 0 : index
    %c0_207 = arith.constant 0 : index
    %305 = vector.load %arg8[%c0_206, %c0_207] : memref<8x1xf32, #tpu.memory_space<vmem>>, vector<8x1xf32>
    %306 = vector.broadcast %305 : vector<8x1xf32> to vector<8x256xf32>
    %307 = arith.addf %304, %306 : vector<8x256xf32>
    %308 = arith.mulf %276, %276 : f32
    %309 = tpu.concatenate %288, %291 in 0 : vector<4x256xf32>, vector<4x256xf32> -> vector<8x256xf32>
    %310 = vector.broadcast %308 : f32 to vector<8x256xf32>
    %311 = arith.mulf %307, %310 : vector<8x256xf32>
    %312 = arith.addf %309, %311 : vector<8x256xf32>
    %c0_208 = arith.constant 0 : index
    %c0_209 = arith.constant 0 : index
    %313 = vector.load %arg10[%c0_208, %c0_209] : memref<8x256xf32, #tpu.memory_space<vmem>>, vector<8x256xf32>
    tpu.vector_store %arg10[%c0_208, %c0_209], %312 {strides = array<i32>} : memref<8x256xf32, #tpu.memory_space<vmem>>, vector<8x256xf32>,
    %314 = arith.index_cast %c6_i32 : i32 to index
    %c0_210 = arith.constant 0 : index
    %c0_211 = arith.constant 0 : index
    %315 = vector.load %arg9[%314, %c0_210, %c0_211] : memref<8x8x256xf32, #tpu.memory_space<vmem>>, vector<1x8x256xf32>
    %316 = vector.shape_cast %315 : vector<1x8x256xf32> to vector<8x256xf32>
    %317 = vector.shape_cast %312 : vector<8x256xf32> to vector<1x8x256xf32>
    tpu.vector_store %arg9[%314, %c0_210, %c0_211], %317 {strides = array<i32>} : memref<8x8x256xf32, #tpu.memory_space<vmem>>, vector<1x8x256xf32>,
    %c7_i32 = arith.constant 7 : i32
    %c8_i32_212 = arith.constant 8 : i32
    %318 = arith.muli %arg1, %c8_i32_212 : i32
    %319 = arith.addi %318, %c7_i32 : i32
    %320 = arith.index_cast %319 : i32 to index
    %321 = memref.load %arg3[%320] : memref<32xf32, #tpu.memory_space<smem>>
    %c0_213 = arith.constant 0 : index
    %c0_214 = arith.constant 0 : index
    %322 = vector.load %arg10[%c0_213, %c0_214] : memref<8x256xf32, #tpu.memory_space<vmem>>, vector<8x256xf32>
    %323 = vector.extract_strided_slice %322 {offsets = [0, 0], sizes = [4, 256], strides = [1, 1]} : vector<8x256xf32> to vector<4x256xf32>
    %324 = vector.extract_strided_slice %322 {offsets = [4, 0], sizes = [4, 256], strides = [1, 1]} : vector<8x256xf32> to vector<4x256xf32>
    %c0_215 = arith.constant 0 : index
    %c0_216 = arith.constant 0 : index
    %325 = vector.load %arg5[%c0_215, %c0_216] : memref<4x256xf32, #tpu.memory_space<vmem>>, vector<4x256xf32>
    %326 = arith.divf %324, %325 : vector<4x256xf32>
    %cst_217 = arith.constant -1.000000e+00 : f32
    %327 = vector.broadcast %cst_217 : f32 to vector<4x256xf32>
    %328 = arith.mulf %327, %323 : vector<4x256xf32>
    %c0_218 = arith.constant 0 : index
    %c0_219 = arith.constant 0 : index
    %329 = vector.load %arg11[%c0_218, %c0_219] : memref<24x256xf32, #tpu.memory_space<vmem>>, vector<4x256xf32>
    tpu.vector_store %arg11[%c0_218, %c0_219], %326 {strides = array<i32>} : memref<24x256xf32, #tpu.memory_space<vmem>>, vector<4x256xf32>,
    %c4_220 = arith.constant 4 : index
    %c0_221 = arith.constant 0 : index
    %330 = vector.load %arg11[%c4_220, %c0_221] : memref<24x256xf32, #tpu.memory_space<vmem>>, vector<4x256xf32>
    tpu.vector_store %arg11[%c4_220, %c0_221], %328 {strides = array<i32>} : memref<24x256xf32, #tpu.memory_space<vmem>>, vector<4x256xf32>,
    %331 = vector.broadcast %321 : f32 to vector<4x256xf32>
    %332 = arith.mulf %326, %331 : vector<4x256xf32>
    %333 = arith.addf %323, %332 : vector<4x256xf32>
    %334 = vector.broadcast %321 : f32 to vector<4x256xf32>
    %335 = arith.mulf %328, %334 : vector<4x256xf32>
    %336 = arith.addf %324, %335 : vector<4x256xf32>
    %337 = arith.divf %336, %325 : vector<4x256xf32>
    %cst_222 = arith.constant -1.000000e+00 : f32
    %338 = vector.broadcast %cst_222 : f32 to vector<4x256xf32>
    %339 = arith.mulf %338, %333 : vector<4x256xf32>
    %c8_223 = arith.constant 8 : index
    %c0_224 = arith.constant 0 : index
    %340 = vector.load %arg11[%c8_223, %c0_224] : memref<24x256xf32, #tpu.memory_space<vmem>>, vector<4x256xf32>
    tpu.vector_store %arg11[%c8_223, %c0_224], %337 {strides = array<i32>} : memref<24x256xf32, #tpu.memory_space<vmem>>, vector<4x256xf32>,
    %c12_225 = arith.constant 12 : index
    %c0_226 = arith.constant 0 : index
    %341 = vector.load %arg11[%c12_225, %c0_226] : memref<24x256xf32, #tpu.memory_space<vmem>>, vector<4x256xf32>
    tpu.vector_store %arg11[%c12_225, %c0_226], %339 {strides = array<i32>} : memref<24x256xf32, #tpu.memory_space<vmem>>, vector<4x256xf32>,
    %342 = vector.broadcast %321 : f32 to vector<1x256xf32>
    %c21_227 = arith.constant 21 : index
    %c0_228 = arith.constant 0 : index
    %343 = vector.load %arg11[%c21_227, %c0_228] : memref<24x256xf32, #tpu.memory_space<vmem>>, vector<1x256xf32>
    tpu.vector_store %arg11[%c21_227, %c0_228], %342 {strides = array<i32>} : memref<24x256xf32, #tpu.memory_space<vmem>>, vector<1x256xf32>,
    %c0_229 = arith.constant 0 : index
    %c0_230 = arith.constant 0 : index
    %344 = vector.load %arg6[%c0_229, %c0_230] : memref<32x24xf32, #tpu.memory_space<vmem>>, vector<32x24xf32>
    %c0_231 = arith.constant 0 : index
    %c0_232 = arith.constant 0 : index
    %345 = vector.load %arg11[%c0_231, %c0_232] : memref<24x256xf32, #tpu.memory_space<vmem>>, vector<24x256xf32>
    %cst_233 = arith.constant dense<0.000000e+00> : vector<32x256xf32>
    %346 = tpu.matmul %344, %345, %cst_233 {dimension_numbers = #tpu.dot_dimension_numbers<[1], [0], [0], [1], [0, 0, 1, 1], [], []>} : vector<32x24xf32>, vector<24x256xf32>, vector<32x256xf32> -> vector<32x256xf32>
    %347 = math.tanh %346 : vector<32x256xf32>
    %c0_234 = arith.constant 0 : index
    %c0_235 = arith.constant 0 : index
    %348 = vector.load %arg7[%c0_234, %c0_235] : memref<8x32xf32, #tpu.memory_space<vmem>>, vector<8x32xf32>
    %cst_236 = arith.constant dense<0.000000e+00> : vector<8x256xf32>
    %349 = tpu.matmul %348, %347, %cst_236 {dimension_numbers = #tpu.dot_dimension_numbers<[1], [0], [0], [1], [0, 0, 1, 1], [], []>} : vector<8x32xf32>, vector<32x256xf32>, vector<8x256xf32> -> vector<8x256xf32>
    %c0_237 = arith.constant 0 : index
    %c0_238 = arith.constant 0 : index
    %350 = vector.load %arg8[%c0_237, %c0_238] : memref<8x1xf32, #tpu.memory_space<vmem>>, vector<8x1xf32>
    %351 = vector.broadcast %350 : vector<8x1xf32> to vector<8x256xf32>
    %352 = arith.addf %349, %351 : vector<8x256xf32>
    %353 = arith.mulf %321, %321 : f32
    %354 = tpu.concatenate %333, %336 in 0 : vector<4x256xf32>, vector<4x256xf32> -> vector<8x256xf32>
    %355 = vector.broadcast %353 : f32 to vector<8x256xf32>
    %356 = arith.mulf %352, %355 : vector<8x256xf32>
    %357 = arith.addf %354, %356 : vector<8x256xf32>
    %c0_239 = arith.constant 0 : index
    %c0_240 = arith.constant 0 : index
    %358 = vector.load %arg10[%c0_239, %c0_240] : memref<8x256xf32, #tpu.memory_space<vmem>>, vector<8x256xf32>
    tpu.vector_store %arg10[%c0_239, %c0_240], %357 {strides = array<i32>} : memref<8x256xf32, #tpu.memory_space<vmem>>, vector<8x256xf32>,
    %359 = arith.index_cast %c7_i32 : i32 to index
    %c0_241 = arith.constant 0 : index
    %c0_242 = arith.constant 0 : index
    %360 = vector.load %arg9[%359, %c0_241, %c0_242] : memref<8x8x256xf32, #tpu.memory_space<vmem>>, vector<1x8x256xf32>
    %361 = vector.shape_cast %360 : vector<1x8x256xf32> to vector<8x256xf32>
    %362 = vector.shape_cast %357 : vector<8x256xf32> to vector<1x8x256xf32>
    tpu.vector_store %arg9[%359, %c0_241, %c0_242], %362 {strides = array<i32>} : memref<8x8x256xf32, #tpu.memory_space<vmem>>, vector<1x8x256xf32>,
    %c8_i32_243 = arith.constant 8 : i32
    return
  }
  func.func @transform_0(%arg0: i32, %arg1: i32, %arg2: memref<32xf32, #tpu.memory_space<smem>>, %arg3: memref<32xf32, #tpu.memory_space<smem>>) -> (i32, i32) {
    %c0_i32 = arith.constant 0 : i32
    %c0_i32_0 = arith.constant 0 : i32
    return %c0_i32, %arg0 : i32, i32
  }
  func.func @transform_1(%arg0: i32, %arg1: i32, %arg2: memref<32xf32, #tpu.memory_space<smem>>, %arg3: memref<32xf32, #tpu.memory_space<smem>>) -> (i32, i32) {
    %c0_i32 = arith.constant 0 : i32
    %c0_i32_0 = arith.constant 0 : i32
    return %c0_i32, %arg0 : i32, i32
  }
  func.func @transform_2(%arg0: i32, %arg1: i32, %arg2: memref<32xf32, #tpu.memory_space<smem>>, %arg3: memref<32xf32, #tpu.memory_space<smem>>) -> (i32, i32) {
    %c0_i32 = arith.constant 0 : i32
    %c0_i32_0 = arith.constant 0 : i32
    %c0_i32_1 = arith.constant 0 : i32
    return %c0_i32, %c0_i32_0 : i32, i32
  }
  func.func @transform_3(%arg0: i32, %arg1: i32, %arg2: memref<32xf32, #tpu.memory_space<smem>>, %arg3: memref<32xf32, #tpu.memory_space<smem>>) -> (i32, i32) {
    %c0_i32 = arith.constant 0 : i32
    %c0_i32_0 = arith.constant 0 : i32
    %c0_i32_1 = arith.constant 0 : i32
    return %c0_i32, %c0_i32_0 : i32, i32
  }
  func.func @transform_4(%arg0: i32, %arg1: i32, %arg2: memref<32xf32, #tpu.memory_space<smem>>, %arg3: memref<32xf32, #tpu.memory_space<smem>>) -> (i32, i32) {
    %c0_i32 = arith.constant 0 : i32
    %c0_i32_0 = arith.constant 0 : i32
    %c0_i32_1 = arith.constant 0 : i32
    return %c0_i32, %c0_i32_0 : i32, i32
  }
  func.func @transform_5(%arg0: i32, %arg1: i32, %arg2: memref<32xf32, #tpu.memory_space<smem>>, %arg3: memref<32xf32, #tpu.memory_space<smem>>) -> (i32, i32, i32) {
    %c0_i32 = arith.constant 0 : i32
    %c0_i32_0 = arith.constant 0 : i32
    return %arg1, %c0_i32, %arg0 : i32, i32, i32
  }
}

</mosaic_0001>

<bundles_post_ra>
// kernel: tpu_custom_call.1
= control target key start
LH: loop header
LB: loop body
LE: loop exit
PB: predicated region body
PF: predicated region fallthrough
CT: control target
= control target key end

     0   :  { %s3232_s30 = smov [#allocation5]   ;;  %s3233_s8 = smov [#allocation6]   ;;  %s4408_s0 = inlined_call_operand.vmem [shape: f32[32], index: 0, kind: input, shape index: {}]   ;;  %s4409_s2 = inlined_call_operand.vmem [shape: f32[8,512], index: 2, kind: input, shape index: {}]   ;;  %s4410_s3 = inlined_call_operand.vmem [shape: f32[4,512], index: 3, kind: input, shape index: {}]   ;;  %s4411_s4 = inlined_call_operand.vmem [shape: f32[32,24], index: 4, kind: input, shape index: {}]   ;;  %s4412_s5 = inlined_call_operand.vmem [shape: f32[8,32], index: 5, kind: input, shape index: {}]   ;;  %s4413_s6 = inlined_call_operand.vmem [shape: f32[8,1], index: 6, kind: input, shape index: {}]   ;;  %s4414_s7 = inlined_call_operand.hbm [shape: f32[32,8,512], index: 7, kind: output, shape index: {}]   ;;  %s4415_s1 = inlined_call_operand.vmem [shape: f32[32], index: 1, kind: input, shape index: {}]  }
   0x1   :  { %s13_s26 = sshll.u32 %s4408_s0, 4  ;;  %s18_s29 = sshll.u32 %s4415_s1, 4  ;;  %s14_s26 = int_to_ptr.vmem [resolvable:$true] %s13_s26  ;;  %s19_s29 = int_to_ptr.vmem [resolvable:$true] %s18_s29 }
   0x2   :  { %16 = dma.vmem_to_smem %s14_s26, 16, %s3232_s30, [#allocation4] }
   0x3   :  { %21 = dma.vmem_to_smem %s19_s29, 16, %s3233_s8, [#allocation4] }
   0x4   :  { %3194 = dma.done.wait [#allocation4], 32 }
   0x5   :  { %3195 = vsyncadd [#allocation4], 4294967264 }
   0x6   :  { %24 = sfence }
   0x7   :  { %25 = vsyncpa [#allocation8], 0 }
   0x8   :  { %27 = vsyncpa [#allocation8 + $0x1], 0  ;;  %s3286_s9 = smov 0   ;;  %s3288_s10 = smov 0  }
   0x9   :  { %s3290_s0 = smov 0   ;;  %s3292_s11 = smov 0  }
   0xa   :  { %s3294_s1 = smov 0   ;;  %s3296_s12 = smov 0  }
   0xb   :  { %s3298_s13 = smov 0   ;;  %s3300_s14 = smov 0  }
   0xc LB: > { %s2722_s15 = sadd.s32 4294967295, %s3230_s14   ;;  %s2723_s16 = sadd.s32 4294967294, %s3230_s14   ;;  %s3230_s14 = sphi %s3300_s14, %s33_s14   ;;  %s3226_s13 = sphi %s3298_s13, %s4519_s13   ;;  %s3222_s12 = sphi %s3296_s12, %s4518_s12   ;;  %s3218_s1 = sphi %s3294_s1, %s4517_s1   ;;  %s3214_s11 = sphi %s3292_s11, %s4516_s11   ;;  %s3210_s0 = sphi %s3290_s0, %s4515_s0   ;;  %s3206_s10 = sphi %s3288_s10, %s4514_s10   ;;  %s3202_s9 = sphi %s3286_s9, %s4513_s9  }
   0xd   : > { %s42_s17 = sadd.s32 1, %s3222_s12  ;;  %s45_s18 = sadd.s32 1, %s3226_s13 }
   0xe   : > { %p43_p0 = scmp.ge.s32.totalorder %s42_s17, 4  ;;  %p179_p1 = scmp.ne.s32.totalorder %s3210_s0, %s3206_s10 }
   0xf   : > { %p180_p2 = scmp.eq.s32.totalorder %s2722_s15, 7  ;;  %p185_p5 = scmp.ne.s32.totalorder %s3206_s10, %s3202_s9 }
  0x10   : > { %s4521_s17 = smov (%p43_p0, %s42_s17), 0  ;;  %s4523_s18 = smov (!%p43_p0, %s45_s18), %s3226_s13 }
  0x11   : > { %s164_s19 = ssub.s32 %s3222_s12, %s4521_s17  ;;  %p3337_p3 = por %p180_p2, %p179_p1 }
  0x12   : > { %p47_p4 = scmp.ge.s32.totalorder %s4523_s18, 2  ;;  %p186_p6 = scmp.eq.s32.totalorder %s2723_s16, 7 }
  0x13   : > { %p2726_p7 = scmp.ge.s32.totalorder %s3230_s14, 1  ;;  %p231_p9 = scmp.lt.s32.totalorder %s3230_s14, 9 }
  0x14   : > { %s4525_s18 = smov (%p47_p4, %s4523_s18), 0  ;;  %p3346_p8 = por %p186_p6, %p185_p5 }
  0x15   : > { %4418 = sst [smem:[#allocation11_spill]] %s4525_s18  ;;  %s165_s22 = ssub.s32 %s3226_s13, %s4525_s18 }
  0x16   : > { %s169_s23 = sadd.s32 1, %s3210_s0  ;;  %s166_s24 = sor.u32 %s165_s22, %s164_s19 }
  0x17   : > { %p232_p10 = pnand %p2726_p7, %p231_p9  ;;  %p167_p11 = scmp.eq.s32.totalorder %s166_s24, 0 }
  0x18   : > { %s261_s26 = sand.u32 (!%p232_p10), 1, %s3206_s10   ;;  %s3359_s27 = sshll.u32 (!%p232_p10), %s3218_s1, 1 }
  0x19   : > { %s3355_s25 = scalar_select %p167_p11, %s3210_s0, %s169_s23  }
  0x1a   : > { %235 = sbr.rel (%p232_p10) target bundleno = 2692 (0xa84), region = 40  ;;  %s2727_s28 = sshll.u32 (!%p232_p10), %s261_s26, 7 }
  0x1b   : > { %p265_p12 = scmp.lt.s32.totalorder (!%p232_p10), %s3359_s27, 3  ;;  %s3373_s18 = scalar_lea.vmem (!%p232_p10), [#allocation7], %s2727_s28 }
  0x1c   : > { %p2732_p13 = scmp.ne.s32.totalorder (!%p232_p10), %s3214_s11, 0 }
  0x1f   : > { %s266_s29 = scalar_select %p265_p12, %s3359_s27, 3 }
  0x20   : > { %281 = sbr.rel (%p2732_p13) target bundleno = 48 (0x30), region = 44 }
  0x21   : > { %s2729_s30 = sshll.u32 %s266_s29, 3  ;;  %s2731_s8 = sshll.u32 %s266_s29, 2 }
  0x22   : > { %s268_s19 = scalar_lea.vmem %s4409_s2, %s2729_s30  ;;  %s3371_s24 = scalar_lea.vmem %s4410_s3, %s2731_s8 }
  0x25   : > { %v286_v0 = vld [vmem:[%s3371_s24] sm:$0xff]  ;;  %v283_v2 = vld [vmem:[%s268_s19 + $0x8] sm:$0xff]  ;;  %v295_v3 = vlaneseq  ;;  %v3234_v4 = vmov 1.0   ;;  %v3235_v5 = vmov 0.0  }
  0x26   : > { %v282_v1 = vld [vmem:[%s268_s19] sm:$0xff]  ;;  %288 = vst [vmem:[#allocation1] ss:$2 sm:$0xff] %v286_v0 }
  0x27   : > { %284 = vst [vmem:[#allocation2] sm:$0xff] %v282_v1  ;;  %vm297_vm0 = vcmp.lt.s32.totalorder %v295_v3, 256 }
  0x28   : > { %285 = vst [vmem:[#allocation2 + $0x8] sm:$0xff] %v283_v2 }
  0x29   : > { %300 = vst.msk [vmem:[#allocation3 + $0x24] ss:$8 sm:$0x3] %vm297_vm0, %v3234_v4 }
  0x2a   : > { %302 = vst [vmem:[#allocation3 + $0x20] sm:$0xe0] %v3235_v5 }
  0x2b   : > { %303 = vst [vmem:[#allocation3 + $0x28] sm:$0xe0] %v3235_v5 }
  0x2d   : > { %v289_v6 = vld.sshfl [vmem:[#allocation1] sm:$0xff pattern:$0x75316420]  ;;  %v290_v7 = vld.sshfl [vmem:[#allocation1 + $0x8] sm:$0xff pattern:$0x75316420] }
  0x2e   : > { %293 = vst [vmem:[#allocation3 + $0x20] sm:$0xf] %v289_v6 }
  0x2f   : > { %294 = vst [vmem:[#allocation3 + $0x28] sm:$0xf] %v290_v7 }
  0x30 PF: > { %s3378_s1 = sshll.u32 %s3214_s11, 3  ;;  %v3380_v8 = vld [vmem:[#allocation2] sm:$0xff]  ;;  %v3382_v9 = vld [vmem:[#allocation2 + $0x8] sm:$0xff]  ;;  %v3385_v10 = vld [vmem:[%s3371_s24] sm:$0xff]  ;;  %v439_v15 = vlaneseq  ;;  %v3236_v43 = vmov 0  }
  0x31   : > { %s3388_s28 = sld [smem:[#allocation6 + %s3378_s1]]  ;;  %311 = vst [vmem:[#allocation1 + $0x1] ss:$2 sm:$0xff] %v3385_v10  ;;  %v346_v11 = vmul.f32 -1.0, %v3380_v8  ;;  %v347_v12 = vmul.f32 -1.0, %v3382_v9  ;;  %s599_s29 = sadd.s32 1, %s3378_s1  ;;  %2915 = vset.pattern.permute.xlu0 %v3236_v43  ;;  %2916 = vset.pattern.permute.xlu1 %v3236_v43 }
  0x32   : > { %vm3393_vm1 = vcmp.lt.s32.totalorder %v439_v15, 256  ;;  %s3405_s30 = sld [smem:[#allocation6 + %s599_s29]]  ;;  %v3505_v38 = vld [vmem:[%s4411_s4 + $0x10] sm:$0xff]  ;;  %v3514_v39 = vld [vmem:[%s4411_s4 + $0x18] sm:$0xff]  ;;  %2917 = vset.pattern.permute.xlu2 %v3236_v43  ;;  %s887_s23 = sadd.s32 2, %s3378_s1 }
  0x33   : > { %v358_v13 = vrot.slane %v346_v11, 4  ;;  %v359_v14 = vrot.slane %v347_v12, 4  ;;  %s3544_s29 = sld [smem:[#allocation6 + %s887_s23]]  ;;  %s1463_s23 = sadd.s32 4, %s3378_s1 }
  0x34   : > { %s2039_s22 = sadd.s32 6, %s3378_s1 }
  0x35   : > { %362 = vst [vmem:[#allocation3] sm:$0xf0] %v358_v13 }
  0x36   : > { %363 = vst [vmem:[#allocation3 + $0x8] sm:$0xf0] %v359_v14 }
  0x37   : > { %v3399_v19 = vstv %s3388_s28  ;;  %s586_s8 = smul.f32 %s3388_s28, %s3388_s28  ;;  %s1175_s28 = sadd.s32 3, %s3378_s1 }
  0x38   : > { %v312_v17 = vld.sshfl [vmem:[#allocation1] sm:$0xff pattern:$0x75316420]  ;;  %v313_v18 = vld.sshfl [vmem:[#allocation1 + $0x8] sm:$0xff pattern:$0x75316420]  ;;  %v375_v24 = vmul.f32 %v3399_v19, %v346_v11  ;;  %v3409_v25 = vmul.f32 %v3399_v19, %v347_v12  ;;  %v3419_v36 = vstv %s3405_s30  ;;  %s874_s16 = smul.f32 %s3405_s30, %s3405_s30 }
  0x39   : > { %2918 = vrcp.f32 %v312_v17  ;;  %386 = vst [vmem:[#allocation1 + $0x1] ss:$2 sm:$0xff] %v3385_v10  ;;  %v325_v21 = vand.u32 2147483647, %v312_v17  ;;  %vm321_vm2 = vweird.f32 %v312_v17  ;;  %v327_v28 = vand.u32 2147483648, %v312_v17  ;;  %s3674_s15 = sld [smem:[#allocation6 + %s1175_s28]]  ;;  %s1162_s30 = smul.f32 %s3544_s29, %s3544_s29 }
  0x3a   : > { %2920 = vrcp.f32 %v313_v18  ;;  %444 = vst.msk [vmem:[#allocation3 + $0x25] ss:$8 sm:$0x3] %vm3393_vm1, %v3399_v19  ;;  %vm336_vm3 = vweird.f32 %v313_v18  ;;  %v342_v33 = vand.u32 2147483648, %v313_v18  ;;  %v340_v35 = vand.u32 2147483647, %v313_v18 }
  0x3b   : > { %vm3429_vm7 = vcmp.eq.f32.partialorder %v325_v21, 8.507059e+37  ;;  %v328_v40 = vor.u32 1.1754944e-38, %v327_v28  ;;  %v379_v45 = vrot.slane %v375_v24, 4  ;;  %v380_v46 = vrot.slane %v3409_v25, 4 }
  0x3c   : > { %v343_v44 = vor.u32 1.1754944e-38, %v342_v33  ;;  %vm341_vm9 = vcmp.eq.f32.partialorder %v340_v35, 8.507059e+37  ;;  %v3487_v35 = vld [vmem:[%s4411_s4] sm:$0xff] }
  0x3d   : > { %v3457_v2 = vadd.f32 %v379_v45, %v3380_v8 }
  0x3f   : > { %v2919_v20 = vpop.eup %2918 }
  0x40   : > { %v2921_v22 = vpop.eup %2920  ;;  %v317_v23 = vmul.f32 %v2919_v20, %v312_v17  ;;  %v3411_v26 = vld.sshfl [vmem:[#allocation1] sm:$0xff pattern:$0x75316420]  ;;  %v3413_v27 = vld.sshfl [vmem:[#allocation1 + $0x8] sm:$0xff pattern:$0x75316420]  ;;  %vm322_vm4 = vweird.f32 %v2919_v20  ;;  %v3470_v17 = vadd.f32 %v380_v46, %v3382_v9 }
  0x41   : > { %v332_v29 = vmul.f32 %v2921_v22, %v313_v18  ;;  %2922 = vrcp.f32 %v3411_v26  ;;  %v454_v30 = vld [vmem:[#allocation3 + $0x20] sm:$0xff]  ;;  %v455_v31 = vld [vmem:[#allocation3 + $0x28] sm:$0xff]  ;;  %606 = vst [vmem:[#allocation1 + $0x1] ss:$2 sm:$0xff] %v3385_v10  ;;  %vm337_vm5 = vweird.f32 %v2921_v22  ;;  %vm3425_vm6 = vmor %vm321_vm2, %vm322_vm4  ;;  %vm396_vm10 = vweird.f32 %v3411_v26 }
  0x42   : > { %v318_v32 = vsub.f32 1.0, %v317_v23  ;;  %2924 = vrcp.f32 %v3413_v27  ;;  %482 = vmatpush.msra.mxu0 %v454_v30  ;;  %511 = vmatpush.msra.mxu1 %v455_v31  ;;  %734 = vst.msk [vmem:[#allocation3 + $0x25] ss:$8 sm:$0x3] %vm3393_vm1, %v3419_v36  ;;  %vm3434_vm8 = vmor %vm336_vm3, %vm337_vm5  ;;  %v400_v49 = vand.u32 2147483647, %v3411_v26  ;;  %vm411_vm11 = vweird.f32 %v3413_v27 }
  0x43   : > { %v333_v34 = vsub.f32 1.0, %v332_v29  ;;  %v402_v53 = vand.u32 2147483648, %v3411_v26  ;;  %v417_v57 = vand.u32 2147483648, %v3413_v27  ;;  %v415_v63 = vand.u32 2147483647, %v3413_v27 }
  0x44   : > { %v319_v37 = vmul.f32 %v2919_v20, %v318_v32  ;;  %vm401_vm15 = vcmp.eq.f32.partialorder %v400_v49, 8.507059e+37  ;;  %vm456_vm3 = vcmask 195584   ;;  %vm542_vm4 = vcmask 261120  }
  0x45   : > { %v334_v41 = vmul.f32 %v2921_v22, %v333_v34  ;;  %v403_v7 = vor.u32 1.1754944e-38, %v402_v53  ;;  %v418_v14 = vor.u32 1.1754944e-38, %v417_v57  ;;  %vm416_vm2 = vcmp.eq.f32.partialorder %v415_v63, 8.507059e+37 }
  0x46   : > { %v320_v42 = vadd.f32 %v2919_v20, %v319_v37  ;;  %v3496_v37 = vld [vmem:[%s4411_s4 + $0x8] sm:$0xff] }
  0x47   : > { %v2923_v47 = vpop.eup %2922  ;;  %v335_v48 = vadd.f32 %v2921_v22, %v334_v41 }
  0x48   : > { %v2925_v50 = vpop.eup %2924  ;;  %v324_v51 = vsel %vm3425_vm6, %v2919_v20, %v320_v42  ;;  %v392_v52 = vmul.f32 %v2923_v47, %v3411_v26  ;;  %vm397_vm12 = vweird.f32 %v2923_v47 }
  0x49   : > { %v329_v54 = vsel %vm3429_vm7, %v328_v40, %v324_v51  ;;  %v339_v55 = vsel %vm3434_vm8, %v2921_v22, %v335_v48  ;;  %v407_v56 = vmul.f32 %v2925_v50, %v3413_v27  ;;  %vm412_vm13 = vweird.f32 %v2925_v50  ;;  %vm3462_vm14 = vmor %vm396_vm10, %vm397_vm12 }
  0x4a   : > { %v330_v58 = vmul.f32 %v329_v54, %v3380_v8  ;;  %v344_v59 = vsel %vm341_vm9, %v343_v44, %v339_v55  ;;  %v393_v60 = vsub.f32 1.0, %v392_v52  ;;  %vm413_vm0 = vmor %vm411_vm11, %vm412_vm13  ;;  %v536_v44 = vld [vmem:[%s4413_s6] sm:$0xff]  ;;  %vm587_vm9 = vcmask 1043456  }
  0x4b   : > { %v345_v61 = vmul.f32 %v344_v59, %v3382_v9  ;;  %v408_v62 = vsub.f32 1.0, %v407_v56  ;;  %539 = vperm.xlu0 %2915, %v536_v44   ;;  %1116 = vperm.xlu1 %2916, %v536_v44   ;;  %v3526_v56 = vld [vmem:[%s4412_s5] sm:$0xff] }
  0x4c   : > { %v350_v0 = vrot.slane %v330_v58, 4  ;;  %v365_v1 = vmul.f32 %v3399_v19, %v330_v58  ;;  %v394_v3 = vmul.f32 %v2923_v47, %v393_v60  ;;  %v607_v59 = vld.sshfl [vmem:[#allocation1] sm:$0xff pattern:$0x75316420] }
  0x4d   : > { %v351_v4 = vrot.slane %v345_v61, 4  ;;  %v366_v5 = vmul.f32 %v3399_v19, %v345_v61  ;;  %v409_v11 = vmul.f32 %v2925_v50, %v408_v62  ;;  %v608_v60 = vld.sshfl [vmem:[#allocation1 + $0x8] sm:$0xff pattern:$0x75316420]  ;;  %vm616_vm5 = vweird.f32 %v607_v59 }
  0x4e   : > { %354 = vst [vmem:[#allocation3] sm:$0xf] %v350_v0  ;;  %v369_v12 = vrot.slane %v365_v1, 4  ;;  %v395_v13 = vadd.f32 %v2923_v47, %v394_v3  ;;  %vm631_vm7 = vweird.f32 %v608_v60 }
  0x4f   : > { %355 = vst [vmem:[#allocation3 + $0x8] sm:$0xf] %v351_v4  ;;  %v370_v15 = vrot.slane %v366_v5, 4  ;;  %v410_v18 = vadd.f32 %v2925_v50, %v409_v11 }
  0x50   : > { %v3473_v19 = vadd.f32 %v369_v12, %v3380_v8  ;;  %v399_v20 = vsel %vm3462_vm14, %v2923_v47, %v395_v13  ;;  %681 = vst [vmem:[#allocation1 + $0x1] ss:$2 sm:$0xff] %v3385_v10  ;;  %v744_v12 = vld [vmem:[#allocation3 + $0x20] sm:$0xff]  ;;  %v745_v13 = vld [vmem:[#allocation3 + $0x28] sm:$0xff] }
  0x51   : > { %v3478_v21 = vadd.f32 %v370_v15, %v3382_v9  ;;  %v404_v22 = vsel %vm401_vm15, %v403_v7, %v399_v20  ;;  %v414_v23 = vsel %vm413_vm0, %v2925_v50, %v410_v18 }
  0x52   : > { %v405_v24 = vmul.f32 %v404_v22, %v3457_v2  ;;  %v419_v25 = vsel %vm416_vm2, %v418_v14, %v414_v23  ;;  %v421_v26 = vmul.f32 -1.0, %v3473_v19  ;;  %v3556_v14 = vstv %s3544_s29  ;;  %s3902_s29 = sld [smem:[#allocation6 + %s1463_s23]] }
  0x53   : > { %v420_v27 = vmul.f32 %v419_v25, %v3470_v17  ;;  %v422_v28 = vmul.f32 -1.0, %v3478_v21  ;;  %828 = vperm.xlu0 %2915, %v536_v44   ;;  %1404 = vperm.xlu1 %2916, %v536_v44   ;;  %1022 = vst.msk [vmem:[#allocation3 + $0x25] ss:$8 sm:$0x3] %vm3393_vm1, %v3556_v14  ;;  %v622_v22 = vand.u32 2147483648, %v607_v59  ;;  %s4123_s23 = sld [smem:[#allocation6 + %s2039_s22]] }
  0x54   : > { %v425_v29 = vrot.slane %v405_v24, 4  ;;  %v433_v8 = vrot.slane %v421_v26, 4  ;;  %v620_v25 = vand.u32 2147483647, %v607_v59 }
  0x55   : > { %v426_v30 = vrot.slane %v420_v27, 4  ;;  %v434_v31 = vrot.slane %v422_v28, 4  ;;  %v450_v32 = vld [vmem:[#allocation3] sm:$0xff]  ;;  %v637_v27 = vand.u32 2147483648, %v608_v60 }
  0x56   : > { %429 = vst [vmem:[#allocation3 + $0x10] sm:$0xf] %v425_v29  ;;  %v451_v34 = vld [vmem:[#allocation3 + $0x8] sm:$0xff]  ;;  %vm3586_vm12 = vcmp.eq.f32.partialorder %v620_v25, 8.507059e+37 }
  0x57   : > { %430 = vst [vmem:[#allocation3 + $0x18] sm:$0xf] %v426_v30  ;;  %v3533_v61 = vld.sshfl [vmem:[#allocation1] sm:$0xff pattern:$0x75316420]  ;;  %v590_v30 = vstv %s586_s8  ;;  %v638_v43 = vor.u32 1.1754944e-38, %v637_v27  ;;  %s1450_s8 = smul.f32 %s3674_s15, %s3674_s15 }
  0x58   : > { %437 = vst [vmem:[#allocation3 + $0x10] sm:$0xf0] %v433_v8  ;;  %v3535_v62 = vld.sshfl [vmem:[#allocation1 + $0x8] sm:$0xff pattern:$0x75316420]  ;;  %vm691_vm13 = vweird.f32 %v3533_v61  ;;  %s1738_s19 = smul.f32 %s3902_s29, %s3902_s29 }
  0x59   : > { %438 = vst [vmem:[#allocation3 + $0x18] sm:$0xf0] %v434_v31  ;;  %v635_v8 = vand.u32 2147483647, %v608_v60  ;;  %vm706_vm0 = vweird.f32 %v3535_v62 }
  0x5a   : > { %894 = vst [vmem:[#allocation1 + $0x1] ss:$2 sm:$0xff] %v3385_v10 }
  0x5b   : > { %2268 = vperm.xlu0 %2915, %v536_v44   ;;  %2556 = vperm.xlu1 %2916, %v536_v44   ;;  %vm636_vm15 = vcmp.eq.f32.partialorder %v635_v8, 8.507059e+37 }
  0x5f   : > { %v452_v9 = vld [vmem:[#allocation3 + $0x10] sm:$0xff] }
  0x60   : > { %483 = vmatpush.msra.mxu0 %v452_v9  ;;  %v453_v33 = vld [vmem:[#allocation3 + $0x18] sm:$0xff] }
  0x61   : > { %512 = vmatpush.msra.mxu1 %v453_v33 }
  0x62   : > { %484 = vmatpush.msra.mxu0 %v450_v32  ;;  %v588_v32 = vsel %vm587_vm9, %v3473_v19, %v3457_v2  ;;  %v697_v2 = vand.u32 2147483648, %v3533_v61 }
  0x63   : > { %513 = vmatpush.msra.mxu1 %v451_v34  ;;  %2734 = vmatmul.msk.f32.vlgmr.msra.gmra.mxu0 %vm456_vm3, %v3487_v35 }
  0x64   : > { %2738 = vmatmul.msk.f32.vlgmr.msra.gmra.mxu1 %vm456_vm3, %v3487_v35 }
  0x6b   : > { %2735 = vmatmul.msk.f32.gmra.mxu0 %vm456_vm3, %v3496_v37 }
  0x6c   : > { %2739 = vmatmul.msk.f32.gmra.mxu1 %vm456_vm3, %v3496_v37 }
  0x73   : > { %2736 = vmatmul.msk.f32.gmra.mxu0 %vm456_vm3, %v3505_v38 }
  0x74   : > { %2740 = vmatmul.msk.f32.gmra.mxu1 %vm456_vm3, %v3505_v38 }
  0x7b   : > { %2737 = vmatmul.msk.f32.gmra.mxu0 %vm456_vm3, %v3514_v39 }
  0x7c   : > { %2741 = vmatmul.msk.f32.gmra.mxu1 %vm456_vm3, %v3514_v39 }
  0xe0   : > { %v486_v40 = vpop.f32.mrf.mxu0 }
  0xe1   : > { %v515_v41 = vpop.f32.mrf.mxu1 }
  0xe8   : > { %v489_v42 = vpop.f32.mrf.mxu0 }
  0xe9   : > { %v518_v45 = vpop.f32.mrf.mxu1 }
  0xf0   : > { %v492_v46 = vpop.f32.mrf.mxu0 }
  0xf1   : > { %v521_v47 = vpop.f32.mrf.mxu1 }
  0xf8   : > { %v495_v48 = vpop.f32.mrf.mxu0 }
  0xf9   : > { %2926 = vtanh.f32 %v495_v48  ;;  %v524_v49 = vpop.f32.mrf.mxu1 }
  0xfa   : > { %2928 = vtanh.f32 %v524_v49 }
  0xfb   : > { %2930 = vtanh.f32 %v492_v46 }
  0xfc   : > { %2932 = vtanh.f32 %v521_v47 }
  0xfd   : > { %2934 = vtanh.f32 %v489_v42 }
  0xfe   : > { %2936 = vtanh.f32 %v518_v45 }
  0xff   : > { %v2927_v50 = vpop.eup %2926  ;;  %2938 = vtanh.f32 %v486_v40  ;;  %v623_v40 = vor.u32 1.1754944e-38, %v622_v22 }
 0x100   : > { %v2929_v51 = vpop.eup %2928  ;;  %2940 = vtanh.f32 %v515_v41  ;;  %558 = vmatpush.msra.mxu2 %v2927_v50  ;;  %v540_v41 = vpop.permute.xlu0 %539 }
 0x101   : > { %v2931_v52 = vpop.eup %2930  ;;  %578 = vmatpush.msra.mxu3 %v2929_v51  ;;  %2942 = vrcp.f32 %v607_v59  ;;  %v695_v51 = vand.u32 2147483647, %v3533_v61 }
 0x102   : > { %v2933_v53 = vpop.eup %2932  ;;  %559 = vmatpush.msra.mxu2 %v2931_v52  ;;  %2944 = vrcp.f32 %v608_v60  ;;  %v589_v52 = vsel %vm587_vm9, %v3478_v21, %v3470_v17  ;;  %v698_v21 = vor.u32 1.1754944e-38, %v697_v2 }
 0x103   : > { %v2935_v54 = vpop.eup %2934  ;;  %579 = vmatpush.msra.mxu3 %v2933_v53  ;;  %2946 = vrcp.f32 %v3533_v61  ;;  %v712_v53 = vand.u32 2147483648, %v3535_v62 }
 0x104   : > { %v2937_v55 = vpop.eup %2936  ;;  %560 = vmatpush.msra.mxu2 %v2935_v54  ;;  %2948 = vrcp.f32 %v3535_v62 }
 0x105   : > { %v2939_v57 = vpop.eup %2938  ;;  %580 = vmatpush.msra.mxu3 %v2937_v55 }
 0x106   : > { %v2941_v58 = vpop.eup %2940  ;;  %561 = vmatpush.msra.mxu2 %v2939_v57 }
 0x107   : > { %581 = vmatpush.msra.mxu3 %v2941_v58  ;;  %2742 = vmatmul.msk.f32.vlgmr.msra.gmra.mxu2 %vm542_vm4, %v3526_v56  ;;  %v3539_v63 = vpop.eup %2942  ;;  %v710_v58 = vand.u32 2147483647, %v3535_v62 }
 0x108   : > { %2743 = vmatmul.msk.f32.vlgmr.msra.gmra.mxu3 %vm542_vm4, %v3526_v56  ;;  %v3542_v0 = vpop.eup %2944  ;;  %v612_v1 = vmul.f32 %v3539_v63, %v607_v59  ;;  %771 = vmatpush.msrb.mxu2 %v744_v12  ;;  %vm617_vm6 = vweird.f32 %v3539_v63 }
 0x109   : > { %v627_v3 = vmul.f32 %v3542_v0, %v608_v60  ;;  %v3549_v4 = vpop.eup %2946  ;;  %800 = vmatpush.msrb.mxu3 %v745_v13  ;;  %vm632_vm8 = vweird.f32 %v3542_v0  ;;  %vm3570_vm10 = vmor %vm616_vm5, %vm617_vm6 }
 0x10a   : > { %v613_v5 = vsub.f32 1.0, %v612_v1  ;;  %v3551_v6 = vpop.eup %2948  ;;  %v687_v11 = vmul.f32 %v3549_v4, %v3533_v61  ;;  %vm3576_vm11 = vmor %vm631_vm7, %vm632_vm8  ;;  %vm692_vm14 = vweird.f32 %v3549_v4  ;;  %vm3621_vm7 = vcmp.eq.f32.partialorder %v695_v51, 8.507059e+37 }
 0x10b   : > { %v628_v7 = vsub.f32 1.0, %v627_v3  ;;  %v702_v18 = vmul.f32 %v3551_v6, %v3535_v62  ;;  %vm707_vm2 = vweird.f32 %v3551_v6  ;;  %vm3600_vm5 = vmor %vm691_vm13, %vm692_vm14  ;;  %v713_v62 = vor.u32 1.1754944e-38, %v712_v53 }
 0x10c   : > { %v614_v15 = vmul.f32 %v3539_v63, %v613_v5  ;;  %v688_v23 = vsub.f32 1.0, %v687_v11  ;;  %vm3613_vm6 = vmor %vm706_vm0, %vm707_vm2  ;;  %vm3629_vm8 = vcmp.eq.f32.partialorder %v710_v58, 8.507059e+37 }
 0x10d   : > { %v629_v20 = vmul.f32 %v3542_v0, %v628_v7  ;;  %v703_v28 = vsub.f32 1.0, %v702_v18 }
 0x10e   : > { %v615_v24 = vadd.f32 %v3539_v63, %v614_v15  ;;  %v689_v31 = vmul.f32 %v3549_v4, %v688_v23 }
 0x10f   : > { %v630_v29 = vadd.f32 %v3542_v0, %v629_v20  ;;  %v704_v44 = vmul.f32 %v3551_v6, %v703_v28 }
 0x110   : > { %v619_v33 = vsel %vm3570_vm10, %v3539_v63, %v615_v24  ;;  %v690_v47 = vadd.f32 %v3549_v4, %v689_v31 }
 0x111   : > { %v634_v46 = vsel %vm3576_vm11, %v3542_v0, %v630_v29  ;;  %v624_v54 = vsel %vm3586_vm12, %v623_v40, %v619_v33  ;;  %v705_v57 = vadd.f32 %v3551_v6, %v704_v44 }
 0x112   : > { %v639_v60 = vsel %vm636_vm15, %v638_v43, %v634_v46  ;;  %v694_v17 = vsel %vm3600_vm5, %v3549_v4, %v690_v47 }
 0x113   : > { %v709_v11 = vsel %vm3613_vm6, %v3551_v6, %v705_v57  ;;  %v699_v6 = vsel %vm3621_vm7, %v698_v21, %v694_v17 }
 0x18a   : > { %v563_v42 = vpop.f32.mrf.mxu2 }
 0x18b   : > { %v564_v45 = vadd.f32 %v563_v42, %v540_v41  ;;  %v583_v19 = vpop.f32.mrf.mxu3 }
 0x18c   : > { %v584_v48 = vadd.f32 %v583_v19, %v540_v41 }
 0x18d   : > { %v591_v49 = vmul.f32 %v590_v30, %v564_v45 }
 0x18e   : > { %v592_v55 = vmul.f32 %v590_v30, %v584_v48  ;;  %v714_v30 = vsel %vm3629_vm8, %v713_v62, %v709_v11 }
 0x18f   : > { %v593_v59 = vadd.f32 %v591_v49, %v588_v32 }
 0x190   : > { %v594_v61 = vadd.f32 %v592_v55, %v589_v52 }
 0x191   : > { %597 = vst [vmem:[%s3373_s18] sm:$0xff] %v593_v59  ;;  %v625_v0 = vmul.f32 %v624_v54, %v593_v59  ;;  %v641_v1 = vmul.f32 -1.0, %v593_v59 }
 0x192   : > { %598 = vst [vmem:[%s3373_s18 + $0x8] sm:$0xff] %v594_v61  ;;  %v640_v5 = vmul.f32 %v639_v60, %v594_v61  ;;  %v642_v7 = vmul.f32 -1.0, %v594_v61 }
 0x193   : > { %v645_v4 = vrot.slane %v625_v0, 4  ;;  %v653_v13 = vrot.slane %v641_v1, 4  ;;  %v660_v15 = vmul.f32 %v3419_v36, %v625_v0  ;;  %v670_v18 = vmul.f32 %v3419_v36, %v641_v1  ;;  %v895_v0 = vld.sshfl [vmem:[#allocation1] sm:$0xff pattern:$0x75316420] }
 0x194   : > { %v646_v20 = vrot.slane %v640_v5, 4  ;;  %v654_v22 = vrot.slane %v642_v7, 4  ;;  %v661_v23 = vmul.f32 %v3419_v36, %v640_v5  ;;  %v671_v24 = vmul.f32 %v3419_v36, %v642_v7  ;;  %v896_v1 = vld.sshfl [vmem:[#allocation1 + $0x8] sm:$0xff pattern:$0x75316420] }
 0x195   : > { %649 = vst [vmem:[#allocation3] sm:$0xf] %v645_v4  ;;  %v664_v25 = vrot.slane %v660_v15, 4  ;;  %v674_v26 = vrot.slane %v670_v18, 4  ;;  %vm904_vm10 = vweird.f32 %v895_v0  ;;  %vm919_vm12 = vweird.f32 %v896_v1 }
 0x196   : > { %657 = vst [vmem:[#allocation3] sm:$0xf0] %v653_v13  ;;  %v665_v27 = vrot.slane %v661_v23, 4  ;;  %v675_v28 = vrot.slane %v671_v24, 4  ;;  %v1033_v23 = vld [vmem:[#allocation3 + $0x28] sm:$0xff]  ;;  %v3684_v24 = vstv %s3674_s15 }
 0x197   : > { %v668_v29 = vadd.f32 %v664_v25, %v593_v59  ;;  %v678_v8 = vadd.f32 %v674_v26, %v593_v59  ;;  %650 = vst [vmem:[#allocation3 + $0x8] sm:$0xf] %v646_v20 }
 0x198   : > { %658 = vst [vmem:[#allocation3 + $0x8] sm:$0xf0] %v654_v22  ;;  %v669_v31 = vadd.f32 %v665_v27, %v594_v61  ;;  %v679_v9 = vadd.f32 %v675_v28, %v594_v61  ;;  %v1032_v22 = vld [vmem:[#allocation3 + $0x20] sm:$0xff]  ;;  %v910_v28 = vand.u32 2147483648, %v895_v0 }
 0x199   : > { %v700_v32 = vmul.f32 %v699_v6, %v678_v8  ;;  %v716_v36 = vmul.f32 -1.0, %v668_v29  ;;  %v3642_v33 = vsel %vm587_vm9, %v668_v29, %v678_v8  ;;  %969 = vst [vmem:[#allocation1 + $0x1] ss:$2 sm:$0xff] %v3385_v10  ;;  %v925_v8 = vand.u32 2147483648, %v896_v1 }
 0x19a   : > { %v715_v34 = vmul.f32 %v714_v30, %v679_v9  ;;  %v717_v40 = vmul.f32 -1.0, %v669_v31  ;;  %v3645_v41 = vsel %vm587_vm9, %v669_v31, %v679_v9  ;;  %1310 = vst.msk [vmem:[#allocation3 + $0x25] ss:$8 sm:$0x3] %vm3393_vm1, %v3684_v24  ;;  %v908_v30 = vand.u32 2147483647, %v895_v0 }
 0x19b   : > { %v720_v42 = vrot.slane %v700_v32, 4  ;;  %v728_v43 = vrot.slane %v716_v36, 4  ;;  %v923_v9 = vand.u32 2147483647, %v896_v1 }
 0x19c   : > { %v721_v44 = vrot.slane %v715_v34, 4  ;;  %v729_v45 = vrot.slane %v717_v40, 4  ;;  %v877_v40 = vstv %s874_s16  ;;  %vm909_vm5 = vcmp.eq.f32.partialorder %v908_v30, 8.507059e+37  ;;  %s1751_s16 = sadd.s32 5, %s3378_s1 }
 0x19d   : > { %724 = vst [vmem:[#allocation3 + $0x10] sm:$0xf] %v720_v42  ;;  %v740_v46 = vld [vmem:[#allocation3] sm:$0xff]  ;;  %vm924_vm6 = vcmp.eq.f32.partialorder %v923_v9, 8.507059e+37 }
 0x19e   : > { %732 = vst [vmem:[#allocation3 + $0x10] sm:$0xf0] %v728_v43  ;;  %v911_v43 = vor.u32 1.1754944e-38, %v910_v28 }
 0x19f   : > { %725 = vst [vmem:[#allocation3 + $0x18] sm:$0xf] %v721_v44  ;;  %v741_v47 = vld [vmem:[#allocation3 + $0x8] sm:$0xff]  ;;  %v829_v44 = vpop.permute.xlu0 %828 }
 0x1a0   : > { %733 = vst [vmem:[#allocation3 + $0x18] sm:$0xf0] %v729_v45  ;;  %v3668_v3 = vld.sshfl [vmem:[#allocation1] sm:$0xff pattern:$0x75316420] }
 0x1a1   : > { %v3672_v7 = vld.sshfl [vmem:[#allocation1 + $0x8] sm:$0xff pattern:$0x75316420]  ;;  %vm979_vm0 = vweird.f32 %v3668_v3 }
 0x1a2   : > { %vm994_vm8 = vweird.f32 %v3672_v7 }
 0x1a5   : > { %v742_v2 = vld [vmem:[#allocation3 + $0x10] sm:$0xff] }
 0x1a6   : > { %772 = vmatpush.msrb.mxu2 %v742_v2  ;;  %v985_v2 = vand.u32 2147483648, %v3668_v3 }
 0x1a7   : > { %v743_v19 = vld [vmem:[#allocation3 + $0x18] sm:$0xff] }
 0x1a8   : > { %801 = vmatpush.msrb.mxu3 %v743_v19  ;;  %773 = vmatpush.msrb.mxu2 %v740_v46  ;;  %v926_v19 = vor.u32 1.1754944e-38, %v925_v8 }
 0x1a9   : > { %2744 = vmatmul.msk.f32.vlgmr.msrb.gmra.mxu2 %vm456_vm3, %v3487_v35 }
 0x1aa   : > { %802 = vmatpush.msrb.mxu3 %v741_v47 }
 0x1ab   : > { %2748 = vmatmul.msk.f32.vlgmr.msrb.gmra.mxu3 %vm456_vm3, %v3487_v35 }
 0x1b1   : > { %2745 = vmatmul.msk.f32.gmra.mxu2 %vm456_vm3, %v3496_v37 }
 0x1b3   : > { %2749 = vmatmul.msk.f32.gmra.mxu3 %vm456_vm3, %v3496_v37 }
 0x1b9   : > { %2746 = vmatmul.msk.f32.gmra.mxu2 %vm456_vm3, %v3505_v38 }
 0x1bb   : > { %2750 = vmatmul.msk.f32.gmra.mxu3 %vm456_vm3, %v3505_v38 }
 0x1c1   : > { %2747 = vmatmul.msk.f32.gmra.mxu2 %vm456_vm3, %v3514_v39 }
 0x1c3   : > { %2751 = vmatmul.msk.f32.gmra.mxu3 %vm456_vm3, %v3514_v39 }
 0x22c   : > { %v775_v48 = vpop.f32.mrf.mxu2 }
 0x22e   : > { %v804_v49 = vpop.f32.mrf.mxu3 }
 0x234   : > { %v778_v50 = vpop.f32.mrf.mxu2 }
 0x236   : > { %v807_v51 = vpop.f32.mrf.mxu3 }
 0x23c   : > { %v781_v52 = vpop.f32.mrf.mxu2 }
 0x23e   : > { %v810_v53 = vpop.f32.mrf.mxu3 }
 0x244   : > { %v784_v54 = vpop.f32.mrf.mxu2 }
 0x245   : > { %2950 = vtanh.f32 %v784_v54 }
 0x246   : > { %2952 = vtanh.f32 %v781_v52  ;;  %v813_v55 = vpop.f32.mrf.mxu3 }
 0x247   : > { %2954 = vtanh.f32 %v813_v55 }
 0x248   : > { %2956 = vtanh.f32 %v778_v50 }
 0x249   : > { %2958 = vtanh.f32 %v810_v53 }
 0x24a   : > { %2960 = vtanh.f32 %v775_v48 }
 0x24b   : > { %v2951_v57 = vpop.eup %2950  ;;  %2962 = vtanh.f32 %v807_v51 }
 0x24c   : > { %v2953_v58 = vpop.eup %2952  ;;  %846 = vmatpush.msrb.mxu0 %v2951_v57  ;;  %2964 = vtanh.f32 %v804_v49  ;;  %v983_v49 = vand.u32 2147483647, %v3668_v3  ;;  %v986_v57 = vor.u32 1.1754944e-38, %v985_v2 }
 0x24d   : > { %v2955_v59 = vpop.eup %2954  ;;  %2966 = vrcp.f32 %v895_v0 }
 0x24e   : > { %v2957_v60 = vpop.eup %2956  ;;  %866 = vmatpush.msrb.mxu1 %v2955_v59  ;;  %847 = vmatpush.msrb.mxu0 %v2953_v58  ;;  %2968 = vrcp.f32 %v896_v1 }
 0x24f   : > { %v2959_v63 = vpop.eup %2958  ;;  %2970 = vrcp.f32 %v3668_v3 }
 0x250   : > { %v2961_v17 = vpop.eup %2960  ;;  %867 = vmatpush.msrb.mxu1 %v2959_v63  ;;  %848 = vmatpush.msrb.mxu0 %v2957_v60  ;;  %2972 = vrcp.f32 %v3672_v7 }
 0x251   : > { %v2963_v21 = vpop.eup %2962 }
 0x252   : > { %868 = vmatpush.msrb.mxu1 %v2963_v21  ;;  %849 = vmatpush.msrb.mxu0 %v2961_v17  ;;  %v2965_v61 = vpop.eup %2964  ;;  %v1000_v21 = vand.u32 2147483648, %v3672_v7 }
 0x253   : > { %2752 = vmatmul.msk.f32.vlgmr.msrb.gmra.mxu0 %vm542_vm4, %v3526_v56  ;;  %v2967_v62 = vpop.eup %2966 }
 0x254   : > { %869 = vmatpush.msrb.mxu1 %v2965_v61  ;;  %v2969_v5 = vpop.eup %2968  ;;  %v900_v11 = vmul.f32 %v2967_v62, %v895_v0  ;;  %1059 = vmatpush.msra.mxu0 %v1032_v22  ;;  %vm905_vm11 = vweird.f32 %v2967_v62 }
 0x255   : > { %2753 = vmatmul.msk.f32.vlgmr.msrb.gmra.mxu1 %vm542_vm4, %v3526_v56  ;;  %v915_v12 = vmul.f32 %v2969_v5, %v896_v1  ;;  %v3677_v4 = vpop.eup %2970  ;;  %vm920_vm13 = vweird.f32 %v2969_v5  ;;  %vm3693_vm14 = vmor %vm904_vm10, %vm905_vm11  ;;  %vm984_vm11 = vcmp.eq.f32.partialorder %v983_v49, 8.507059e+37  ;;  %v998_v1 = vand.u32 2147483647, %v3672_v7 }
 0x256   : > { %v901_v10 = vsub.f32 1.0, %v900_v11  ;;  %v975_v15 = vmul.f32 %v3677_v4, %v3668_v3  ;;  %v3681_v18 = vpop.eup %2972  ;;  %1088 = vmatpush.msra.mxu1 %v1033_v23  ;;  %vm3698_vm15 = vmor %vm919_vm12, %vm920_vm13  ;;  %vm980_vm2 = vweird.f32 %v3677_v4 }
 0x257   : > { %v916_v13 = vsub.f32 1.0, %v915_v12  ;;  %v990_v6 = vmul.f32 %v3681_v18, %v3672_v7  ;;  %vm3712_vm7 = vmor %vm979_vm0, %vm980_vm2  ;;  %vm995_vm10 = vweird.f32 %v3681_v18  ;;  %vm999_vm13 = vcmp.eq.f32.partialorder %v998_v1, 8.507059e+37 }
 0x258   : > { %v902_v20 = vmul.f32 %v2967_v62, %v901_v10  ;;  %v976_v26 = vsub.f32 1.0, %v975_v15  ;;  %vm3727_vm12 = vmor %vm994_vm8, %vm995_vm10  ;;  %v1001_v15 = vor.u32 1.1754944e-38, %v1000_v21 }
 0x259   : > { %v917_v25 = vmul.f32 %v2969_v5, %v916_v13  ;;  %v991_v34 = vsub.f32 1.0, %v990_v6 }
 0x25a   : > { %v903_v27 = vadd.f32 %v2967_v62, %v902_v20  ;;  %v977_v32 = vmul.f32 %v3677_v4, %v976_v26 }
 0x25b   : > { %v918_v31 = vadd.f32 %v2969_v5, %v917_v25  ;;  %v992_v51 = vmul.f32 %v3681_v18, %v991_v34 }
 0x25c   : > { %v907_v42 = vsel %vm3693_vm14, %v2967_v62, %v903_v27  ;;  %v978_v48 = vadd.f32 %v3677_v4, %v977_v32 }
 0x25d   : > { %v922_v47 = vsel %vm3698_vm15, %v2969_v5, %v918_v31  ;;  %v912_v55 = vsel %vm909_vm5, %v911_v43, %v907_v42  ;;  %v993_v17 = vadd.f32 %v3681_v18, %v992_v51 }
 0x25e   : > { %v927_v58 = vsel %vm924_vm6, %v926_v19, %v922_v47  ;;  %v982_v63 = vsel %vm3712_vm7, %v3677_v4, %v978_v48 }
 0x25f   : > { %v987_v4 = vsel %vm984_vm11, %v986_v57, %v982_v63  ;;  %v997_v7 = vsel %vm3727_vm12, %v3681_v18, %v993_v17 }
 0x260   : > { %v1002_v31 = vsel %vm999_vm13, %v1001_v15, %v997_v7 }
 0x2d0   : > { %v851_v45 = vpop.f32.mrf.mxu0 }
 0x2d1   : > { %v852_v46 = vadd.f32 %v851_v45, %v829_v44 }
 0x2d2   : > { %v871_v50 = vpop.f32.mrf.mxu1 }
 0x2d3   : > { %v878_v52 = vmul.f32 %v877_v40, %v852_v46  ;;  %v872_v54 = vadd.f32 %v871_v50, %v829_v44 }
 0x2d5   : > { %v880_v59 = vadd.f32 %v878_v52, %v3642_v33  ;;  %v879_v60 = vmul.f32 %v877_v40, %v872_v54 }
 0x2d7   : > { %2754 = vst [vmem:[%s3373_s18 + $0x10] sm:$0xff] %v880_v59  ;;  %v913_v61 = vmul.f32 %v912_v55, %v880_v59  ;;  %v929_v0 = vmul.f32 -1.0, %v880_v59  ;;  %v881_v33 = vadd.f32 %v879_v60, %v3645_v41  ;;  %v3766_v60 = vld [vmem:[%s3371_s24] sm:$0xff] }
 0x2d8   : > { %1182 = vst [vmem:[#allocation1 + $0x1] ss:$2 sm:$0xff] %v3766_v60 }
 0x2d9   : > { %v933_v62 = vrot.slane %v913_v61, 4  ;;  %v941_v5 = vrot.slane %v929_v0, 4  ;;  %v948_v11 = vmul.f32 %v3556_v14, %v913_v61  ;;  %v958_v12 = vmul.f32 %v3556_v14, %v929_v0  ;;  %2755 = vst [vmem:[%s3373_s18 + $0x18] sm:$0xff] %v881_v33 }
 0x2da   : > { %v928_v10 = vmul.f32 %v927_v58, %v881_v33  ;;  %v930_v13 = vmul.f32 -1.0, %v881_v33 }
 0x2db   : > { %937 = vst [vmem:[#allocation3] sm:$0xf] %v933_v62  ;;  %v952_v20 = vrot.slane %v948_v11, 4  ;;  %v962_v41 = vrot.slane %v958_v12, 4 }
 0x2dc   : > { %945 = vst [vmem:[#allocation3] sm:$0xf0] %v941_v5  ;;  %v934_v22 = vrot.slane %v928_v10, 4  ;;  %v942_v23 = vrot.slane %v930_v13, 4  ;;  %v949_v25 = vmul.f32 %v3556_v14, %v928_v10  ;;  %v959_v26 = vmul.f32 %v3556_v14, %v930_v13  ;;  %v1321_v10 = vld [vmem:[#allocation3 + $0x28] sm:$0xff] }
 0x2dd   : > { %v956_v6 = vadd.f32 %v952_v20, %v880_v59  ;;  %v966_v27 = vadd.f32 %v962_v41, %v880_v59 }
 0x2de   : > { %938 = vst [vmem:[#allocation3 + $0x8] sm:$0xf] %v934_v22  ;;  %v953_v28 = vrot.slane %v949_v25, 4  ;;  %v963_v29 = vrot.slane %v959_v26, 4 }
 0x2df   : > { %v988_v8 = vmul.f32 %v987_v4, %v966_v27  ;;  %v1004_v30 = vmul.f32 -1.0, %v956_v6  ;;  %946 = vst [vmem:[#allocation3 + $0x8] sm:$0xf0] %v942_v23  ;;  %v3740_v9 = vsel %vm587_vm9, %v956_v6, %v966_v27  ;;  %v1183_v63 = vld.sshfl [vmem:[#allocation1] sm:$0xff pattern:$0x75316420] }
 0x2e0   : > { %v957_v18 = vadd.f32 %v953_v28, %v881_v33  ;;  %v967_v32 = vadd.f32 %v963_v29, %v881_v33  ;;  %v1184_v17 = vld.sshfl [vmem:[#allocation1 + $0x8] sm:$0xff pattern:$0x75316420]  ;;  %v1320_v4 = vld [vmem:[#allocation3 + $0x20] sm:$0xff]  ;;  %vm1192_vm14 = vweird.f32 %v1183_v63  ;;  %v1198_v41 = vand.u32 2147483648, %v1183_v63 }
 0x2e1   : > { %v1008_v36 = vrot.slane %v988_v8, 4  ;;  %v1016_v34 = vrot.slane %v1004_v30, 4  ;;  %1257 = vst [vmem:[#allocation1 + $0x1] ss:$2 sm:$0xff] %v3766_v60  ;;  %vm1207_vm0 = vweird.f32 %v1184_v17  ;;  %v1196_v25 = vand.u32 2147483647, %v1183_v63 }
 0x2e2   : > { %v1003_v40 = vmul.f32 %v1002_v31, %v967_v32  ;;  %v1005_v42 = vmul.f32 -1.0, %v957_v18  ;;  %v3743_v14 = vsel %vm587_vm9, %v957_v18, %v967_v32  ;;  %v1211_v6 = vand.u32 2147483647, %v1184_v17  ;;  %v1117_v32 = vpop.permute.xlu1 %1116 }
 0x2e3   : > { %1012 = vst [vmem:[#allocation3 + $0x10] sm:$0xf] %v1008_v36  ;;  %v1028_v2 = vld [vmem:[#allocation3] sm:$0xff]  ;;  %v1213_v27 = vand.u32 2147483648, %v1184_v17  ;;  %v1165_v29 = vstv %s1162_s30  ;;  %v1199_v30 = vor.u32 1.1754944e-38, %v1198_v41  ;;  %vm1197_vm7 = vcmp.eq.f32.partialorder %v1196_v25, 8.507059e+37 }
 0x2e4   : > { %1020 = vst [vmem:[#allocation3 + $0x10] sm:$0xf0] %v1016_v34  ;;  %v1009_v43 = vrot.slane %v1003_v40, 4  ;;  %v1017_v44 = vrot.slane %v1005_v42, 4  ;;  %vm1212_vm8 = vcmp.eq.f32.partialorder %v1211_v6, 8.507059e+37  ;;  %s4012_s30 = sld [smem:[#allocation6 + %s1751_s16]] }
 0x2e5   : > { %v1214_v40 = vor.u32 1.1754944e-38, %v1213_v27 }
 0x2e6   : > { %1013 = vst [vmem:[#allocation3 + $0x18] sm:$0xf] %v1009_v43  ;;  %v1029_v46 = vld [vmem:[#allocation3 + $0x8] sm:$0xff] }
 0x2e7   : > { %1021 = vst [vmem:[#allocation3 + $0x18] sm:$0xf0] %v1017_v44 }
 0x2e8   : > { %v3770_v21 = vld.sshfl [vmem:[#allocation1] sm:$0xff pattern:$0x75316420]  ;;  %v3772_v61 = vld.sshfl [vmem:[#allocation1 + $0x8] sm:$0xff pattern:$0x75316420] }
 0x2e9   : > { %1470 = vst [vmem:[#allocation1 + $0x1] ss:$2 sm:$0xff] %v3766_v60  ;;  %vm1267_vm10 = vweird.f32 %v3770_v21  ;;  %v1271_v43 = vand.u32 2147483647, %v3770_v21  ;;  %v1273_v44 = vand.u32 2147483648, %v3770_v21 }
 0x2eb   : > { %v1030_v45 = vld [vmem:[#allocation3 + $0x10] sm:$0xff]  ;;  %vm3811_vm13 = vcmp.eq.f32.partialorder %v1271_v43, 8.507059e+37  ;;  %v3881_v43 = vld [vmem:[%s4411_s4 + $0x18] sm:$0xff] }
 0x2ec   : > { %1060 = vmatpush.msra.mxu0 %v1030_v45 }
 0x2ee   : > { %v1031_v19 = vld [vmem:[#allocation3 + $0x18] sm:$0xff]  ;;  %1061 = vmatpush.msra.mxu0 %v1028_v2 }
 0x2ef   : > { %1089 = vmatpush.msra.mxu1 %v1031_v19  ;;  %2756 = vmatmul.msk.f32.vlgmr.msra.gmra.mxu0 %vm456_vm3, %v3487_v35 }
 0x2f1   : > { %1090 = vmatpush.msra.mxu1 %v1029_v46 }
 0x2f2   : > { %2760 = vmatmul.msk.f32.vlgmr.msra.gmra.mxu1 %vm456_vm3, %v3487_v35 }
 0x2f7   : > { %2757 = vmatmul.msk.f32.gmra.mxu0 %vm456_vm3, %v3496_v37 }
 0x2fa   : > { %2761 = vmatmul.msk.f32.gmra.mxu1 %vm456_vm3, %v3496_v37 }
 0x2ff   : > { %2758 = vmatmul.msk.f32.gmra.mxu0 %vm456_vm3, %v3505_v38 }
 0x302   : > { %2762 = vmatmul.msk.f32.gmra.mxu1 %vm456_vm3, %v3505_v38 }
 0x307   : > { %2759 = vmatmul.msk.f32.gmra.mxu0 %vm456_vm3, %v3514_v39 }
 0x30a   : > { %2763 = vmatmul.msk.f32.gmra.mxu1 %vm456_vm3, %v3514_v39 }
 0x36c   : > { %v1063_v47 = vpop.f32.mrf.mxu0 }
 0x36f   : > { %v1092_v35 = vpop.f32.mrf.mxu1 }
 0x374   : > { %v1066_v48 = vpop.f32.mrf.mxu0 }
 0x377   : > { %v1095_v49 = vpop.f32.mrf.mxu1 }
 0x37c   : > { %v1069_v50 = vpop.f32.mrf.mxu0 }
 0x37f   : > { %v1098_v51 = vpop.f32.mrf.mxu1 }
 0x384   : > { %v1072_v52 = vpop.f32.mrf.mxu0 }
 0x385   : > { %2974 = vtanh.f32 %v1072_v52  ;;  %v1274_v52 = vor.u32 1.1754944e-38, %v1273_v44 }
 0x386   : > { %2976 = vtanh.f32 %v1069_v50 }
 0x387   : > { %v1101_v37 = vpop.f32.mrf.mxu1 }
 0x388   : > { %2978 = vtanh.f32 %v1101_v37 }
 0x389   : > { %2980 = vtanh.f32 %v1066_v48 }
 0x38a   : > { %2982 = vtanh.f32 %v1098_v51 }
 0x38b   : > { %v2975_v38 = vpop.eup %2974  ;;  %2984 = vtanh.f32 %v1063_v47 }
 0x38c   : > { %2986 = vtanh.f32 %v1095_v49  ;;  %1134 = vmatpush.msra.mxu2 %v2975_v38  ;;  %v2977_v53 = vpop.eup %2976  ;;  %v1286_v38 = vand.u32 2147483647, %v3772_v61 }
 0x38d   : > { %2988 = vtanh.f32 %v1092_v35 }
 0x38e   : > { %v2979_v54 = vpop.eup %2978  ;;  %1135 = vmatpush.msra.mxu2 %v2977_v53  ;;  %2990 = vrcp.f32 %v1183_v63  ;;  %v1288_v53 = vand.u32 2147483648, %v3772_v61 }
 0x38f   : > { %v2981_v39 = vpop.eup %2980  ;;  %1154 = vmatpush.msra.mxu3 %v2979_v54  ;;  %2992 = vrcp.f32 %v1184_v17 }
 0x390   : > { %v2983_v55 = vpop.eup %2982  ;;  %1136 = vmatpush.msra.mxu2 %v2981_v39  ;;  %2994 = vrcp.f32 %v3770_v21 }
 0x391   : > { %v2985_v57 = vpop.eup %2984  ;;  %1155 = vmatpush.msra.mxu3 %v2983_v55  ;;  %2996 = vrcp.f32 %v3772_v61 }
 0x392   : > { %v2987_v58 = vpop.eup %2986  ;;  %1137 = vmatpush.msra.mxu2 %v2985_v57 }
 0x393   : > { %1156 = vmatpush.msra.mxu3 %v2987_v58  ;;  %2764 = vmatmul.msk.f32.vlgmr.msra.gmra.mxu2 %vm542_vm4, %v3526_v56  ;;  %v2989_v59 = vpop.eup %2988 }
 0x394   : > { %v2991_v0 = vpop.eup %2990  ;;  %1347 = vmatpush.msrb.mxu2 %v1320_v4 }
 0x395   : > { %1157 = vmatpush.msra.mxu3 %v2989_v59  ;;  %v2993_v33 = vpop.eup %2992  ;;  %vm1193_vm15 = vweird.f32 %v2991_v0 }
 0x396   : > { %2765 = vmatmul.msk.f32.vlgmr.msra.gmra.mxu3 %vm542_vm4, %v3526_v56  ;;  %v1188_v56 = vmul.f32 %v2991_v0, %v1183_v63  ;;  %v1203_v1 = vmul.f32 %v2993_v33, %v1184_v17  ;;  %v3777_v62 = vpop.eup %2994  ;;  %vm1208_vm2 = vweird.f32 %v2993_v33  ;;  %vm3787_vm5 = vmor %vm1192_vm14, %vm1193_vm15  ;;  %vm1282_vm14 = vweird.f32 %v3772_v61 }
 0x397   : > { %v1263_v12 = vmul.f32 %v3777_v62, %v3770_v21  ;;  %v3781_v13 = vpop.eup %2996  ;;  %1376 = vmatpush.msrb.mxu3 %v1321_v10  ;;  %vm3791_vm6 = vmor %vm1207_vm0, %vm1208_vm2  ;;  %vm1268_vm11 = vweird.f32 %v3777_v62  ;;  %vm3834_vm2 = vcmp.eq.f32.partialorder %v1286_v38, 8.507059e+37  ;;  %v3890_v38 = vld [vmem:[%s4412_s5] sm:$0xff] }
 0x398   : > { %v1189_v3 = vsub.f32 1.0, %v1188_v56  ;;  %v1204_v5 = vsub.f32 1.0, %v1203_v1  ;;  %v1278_v22 = vmul.f32 %v3781_v13, %v3772_v61  ;;  %vm3806_vm12 = vmor %vm1267_vm10, %vm1268_vm11  ;;  %vm1283_vm15 = vweird.f32 %v3781_v13 }
 0x399   : > { %v1264_v7 = vsub.f32 1.0, %v1263_v12  ;;  %vm3825_vm0 = vmor %vm1282_vm14, %vm1283_vm15 }
 0x39a   : > { %v1190_v11 = vmul.f32 %v2991_v0, %v1189_v3  ;;  %v1205_v15 = vmul.f32 %v2993_v33, %v1204_v5  ;;  %v1279_v18 = vsub.f32 1.0, %v1278_v22 }
 0x39b   : > { %v1265_v31 = vmul.f32 %v3777_v62, %v1264_v7 }
 0x39c   : > { %v1191_v20 = vadd.f32 %v2991_v0, %v1190_v11  ;;  %v1206_v26 = vadd.f32 %v2993_v33, %v1205_v15  ;;  %v1280_v46 = vmul.f32 %v3781_v13, %v1279_v18  ;;  %v3854_v18 = vld [vmem:[%s4411_s4] sm:$0xff] }
 0x39d   : > { %v1266_v2 = vadd.f32 %v3777_v62, %v1265_v31 }
 0x39e   : > { %v1195_v8 = vsel %vm3787_vm5, %v2991_v0, %v1191_v20  ;;  %v1210_v34 = vsel %vm3791_vm6, %v2993_v33, %v1206_v26  ;;  %v1281_v55 = vadd.f32 %v3781_v13, %v1280_v46 }
 0x39f   : > { %v1200_v47 = vsel %vm1197_vm7, %v1199_v30, %v1195_v8  ;;  %v1215_v49 = vsel %vm1212_vm8, %v1214_v40, %v1210_v34  ;;  %v3863_v40 = vld [vmem:[%s4411_s4 + $0x8] sm:$0xff] }
 0x3a0   : > { %v1285_v3 = vsel %vm3825_vm0, %v3781_v13, %v1281_v55  ;;  %v1472_v55 = vld.sshfl [vmem:[#allocation1 + $0x8] sm:$0xff pattern:$0x75316420] }
 0x3a1   : > { %vm1495_vm7 = vweird.f32 %v1472_v55 }
 0x416   : > { %v1139_v36 = vpop.f32.mrf.mxu2 }
 0x417   : > { %v1140_v42 = vadd.f32 %v1139_v36, %v1117_v32 }
 0x419   : > { %v1166_v45 = vmul.f32 %v1165_v29, %v1140_v42  ;;  %v1159_v19 = vpop.f32.mrf.mxu3  ;;  %v3872_v42 = vld [vmem:[%s4411_s4 + $0x10] sm:$0xff] }
 0x41a   : > { %v1160_v48 = vadd.f32 %v1159_v19, %v1117_v32 }
 0x41b   : > { %v1168_v50 = vadd.f32 %v1166_v45, %v3740_v9  ;;  %v1270_v9 = vsel %vm3806_vm12, %v3777_v62, %v1266_v2  ;;  %v1289_v62 = vor.u32 1.1754944e-38, %v1288_v53 }
 0x41c   : > { %v1167_v37 = vmul.f32 %v1165_v29, %v1160_v48  ;;  %v1275_v61 = vsel %vm3811_vm13, %v1274_v52, %v1270_v9  ;;  %v1471_v9 = vld.sshfl [vmem:[#allocation1] sm:$0xff pattern:$0x75316420] }
 0x41d   : > { %2766 = vst [vmem:[%s3373_s18 + $0x20] sm:$0xff] %v1168_v50  ;;  %v1201_v54 = vmul.f32 %v1200_v47, %v1168_v50  ;;  %v1217_v39 = vmul.f32 -1.0, %v1168_v50  ;;  %v1290_v23 = vsel %vm3834_vm2, %v1289_v62, %v1285_v3  ;;  %vm1480_vm5 = vweird.f32 %v1471_v9 }
 0x41e   : > { %v1169_v57 = vadd.f32 %v1167_v37, %v3743_v14  ;;  %1545 = vst [vmem:[#allocation1 + $0x1] ss:$2 sm:$0xff] %v3766_v60 }
 0x41f   : > { %v1221_v59 = vrot.slane %v1201_v54, 4  ;;  %v1229_v63 = vrot.slane %v1217_v39, 4  ;;  %v1236_v17 = vmul.f32 %v3684_v24, %v1201_v54  ;;  %v1246_v21 = vmul.f32 %v3684_v24, %v1217_v39 }
 0x420   : > { %2767 = vst [vmem:[%s3373_s18 + $0x28] sm:$0xff] %v1169_v57  ;;  %v1216_v0 = vmul.f32 %v1215_v49, %v1169_v57  ;;  %v1218_v33 = vmul.f32 -1.0, %v1169_v57 }
 0x421   : > { %v1240_v14 = vrot.slane %v1236_v17, 4  ;;  %v1250_v1 = vrot.slane %v1246_v21, 4  ;;  %1225 = vst [vmem:[#allocation3] sm:$0xf] %v1221_v59  ;;  %v3906_v59 = vstv %s3902_s29  ;;  %s2631_s29 = sshll.u32 %s3373_s18, 4  ;;  %s2632_s29 = int_to_ptr.vmem [resolvable:$true] %s2631_s29 }
 0x422   : > { %1233 = vst [vmem:[#allocation3] sm:$0xf0] %v1229_v63  ;;  %v1222_v5 = vrot.slane %v1216_v0, 4  ;;  %v1230_v11 = vrot.slane %v1218_v33, 4  ;;  %v1237_v12 = vmul.f32 %v3684_v24, %v1216_v0  ;;  %v1247_v4 = vmul.f32 %v3684_v24, %v1218_v33 }
 0x423   : > { %v1244_v10 = vadd.f32 %v1240_v14, %v1168_v50  ;;  %v1254_v15 = vadd.f32 %v1250_v1, %v1168_v50  ;;  %1598 = vst.msk [vmem:[#allocation3 + $0x25] ss:$8 sm:$0x3] %vm3393_vm1, %v3906_v59 }
 0x424   : > { %v1241_v20 = vrot.slane %v1237_v12, 4  ;;  %v1251_v41 = vrot.slane %v1247_v4, 4  ;;  %1226 = vst [vmem:[#allocation3 + $0x8] sm:$0xf] %v1222_v5  ;;  %v1486_v4 = vand.u32 2147483648, %v1471_v9 }
 0x425   : > { %v1276_v7 = vmul.f32 %v1275_v61, %v1254_v15  ;;  %v1292_v22 = vmul.f32 -1.0, %v1244_v10  ;;  %1234 = vst [vmem:[#allocation3 + $0x8] sm:$0xf0] %v1230_v11  ;;  %v3846_v13 = vsel %vm587_vm9, %v1244_v10, %v1254_v15  ;;  %v3900_v58 = vld.sshfl [vmem:[#allocation1 + $0x8] sm:$0xff pattern:$0x75316420] }
 0x426   : > { %v1245_v25 = vadd.f32 %v1241_v20, %v1169_v57  ;;  %v1255_v26 = vadd.f32 %v1251_v41, %v1169_v57  ;;  %v3898_v57 = vld.sshfl [vmem:[#allocation1] sm:$0xff pattern:$0x75316420]  ;;  %v1484_v41 = vand.u32 2147483647, %v1471_v9 }
 0x427   : > { %v1296_v6 = vrot.slane %v1276_v7, 4  ;;  %v1304_v27 = vrot.slane %v1292_v22, 4  ;;  %1758 = vst [vmem:[#allocation1 + $0x1] ss:$2 sm:$0xff] %v3766_v60  ;;  %v1499_v22 = vand.u32 2147483647, %v1472_v55  ;;  %vm1555_vm14 = vweird.f32 %v3898_v57 }
 0x428   : > { %v1291_v28 = vmul.f32 %v1290_v23, %v1255_v26  ;;  %v1293_v24 = vmul.f32 -1.0, %v1245_v25  ;;  %v3849_v29 = vsel %vm587_vm9, %v1245_v25, %v1255_v26  ;;  %v1501_v23 = vand.u32 2147483648, %v1472_v55 }
 0x429   : > { %1300 = vst [vmem:[#allocation3 + $0x10] sm:$0xf] %v1296_v6  ;;  %v1316_v32 = vld [vmem:[#allocation3] sm:$0xff]  ;;  %v1453_v26 = vstv %s1450_s8  ;;  %vm1485_vm12 = vcmp.eq.f32.partialorder %v1484_v41, 8.507059e+37  ;;  %vm1500_vm13 = vcmp.eq.f32.partialorder %v1499_v22, 8.507059e+37  ;;  %s2327_s8 = sadd.s32 7, %s3378_s1  ;;  %s2314_s1 = smul.f32 %s4123_s23, %s4123_s23 }
 0x42a   : > { %1308 = vst [vmem:[#allocation3 + $0x10] sm:$0xf0] %v1304_v27  ;;  %v1297_v8 = vrot.slane %v1291_v28, 4  ;;  %v1305_v30 = vrot.slane %v1293_v24, 4  ;;  %v1608_v3 = vld [vmem:[#allocation3 + $0x20] sm:$0xff]  ;;  %v1609_v62 = vld [vmem:[#allocation3 + $0x28] sm:$0xff] }
 0x42b   : > { %v1487_v27 = vor.u32 1.1754944e-38, %v1486_v4  ;;  %s4255_s15 = sld [smem:[#allocation6 + %s2327_s8]] }
 0x42c   : > { %1301 = vst [vmem:[#allocation3 + $0x18] sm:$0xf] %v1297_v8  ;;  %v1317_v34 = vld [vmem:[#allocation3 + $0x8] sm:$0xff]  ;;  %v1405_v8 = vpop.permute.xlu1 %1404 }
 0x42d   : > { %1309 = vst [vmem:[#allocation3 + $0x18] sm:$0xf0] %v1305_v30 }
 0x431   : > { %v1318_v31 = vld [vmem:[#allocation3 + $0x10] sm:$0xff]  ;;  %s2602_s28 = smul.f32 %s4255_s15, %s4255_s15 }
 0x432   : > { %1348 = vmatpush.msrb.mxu2 %v1318_v31 }
 0x434   : > { %v1319_v36 = vld [vmem:[#allocation3 + $0x18] sm:$0xff]  ;;  %1349 = vmatpush.msrb.mxu2 %v1316_v32  ;;  %v1502_v32 = vor.u32 1.1754944e-38, %v1501_v23 }
 0x435   : > { %1377 = vmatpush.msrb.mxu3 %v1319_v36  ;;  %2768 = vmatmul.msk.f32.vlgmr.msrb.gmra.mxu2 %vm456_vm3, %v3854_v18 }
 0x437   : > { %1378 = vmatpush.msrb.mxu3 %v1317_v34  ;;  %v1559_v34 = vand.u32 2147483647, %v3898_v57 }
 0x438   : > { %2772 = vmatmul.msk.f32.vlgmr.msrb.gmra.mxu3 %vm456_vm3, %v3854_v18 }
 0x439   : > { %vm3947_vm2 = vcmp.eq.f32.partialorder %v1559_v34, 8.507059e+37 }
 0x43d   : > { %2769 = vmatmul.msk.f32.gmra.mxu2 %vm456_vm3, %v3863_v40 }
 0x440   : > { %2773 = vmatmul.msk.f32.gmra.mxu3 %vm456_vm3, %v3863_v40 }
 0x445   : > { %2770 = vmatmul.msk.f32.gmra.mxu2 %vm456_vm3, %v3872_v42 }
 0x448   : > { %2774 = vmatmul.msk.f32.gmra.mxu3 %vm456_vm3, %v3872_v42 }
 0x44d   : > { %2771 = vmatmul.msk.f32.gmra.mxu2 %vm456_vm3, %v3881_v43 }
 0x450   : > { %2775 = vmatmul.msk.f32.gmra.mxu3 %vm456_vm3, %v3881_v43 }
 0x4b8   : > { %v1351_v44 = vpop.f32.mrf.mxu2 }
 0x4bb   : > { %v1380_v45 = vpop.f32.mrf.mxu3 }
 0x4c0   : > { %v1354_v2 = vpop.f32.mrf.mxu2 }
 0x4c3   : > { %v1383_v19 = vpop.f32.mrf.mxu3 }
 0x4c8   : > { %v1357_v46 = vpop.f32.mrf.mxu2 }
 0x4cb   : > { %v1386_v47 = vpop.f32.mrf.mxu3 }
 0x4d0   : > { %v1360_v35 = vpop.f32.mrf.mxu2 }
 0x4d1   : > { %2998 = vtanh.f32 %v1360_v35 }
 0x4d2   : > { %3000 = vtanh.f32 %v1357_v46 }
 0x4d3   : > { %v1389_v48 = vpop.f32.mrf.mxu3 }
 0x4d4   : > { %3002 = vtanh.f32 %v1389_v48 }
 0x4d5   : > { %3004 = vtanh.f32 %v1354_v2 }
 0x4d6   : > { %3006 = vtanh.f32 %v1386_v47 }
 0x4d7   : > { %v2999_v49 = vpop.eup %2998  ;;  %3008 = vtanh.f32 %v1351_v44  ;;  %v1561_v44 = vand.u32 2147483648, %v3898_v57 }
 0x4d8   : > { %3010 = vtanh.f32 %v1383_v19  ;;  %1422 = vmatpush.msrb.mxu0 %v2999_v49  ;;  %v3001_v50 = vpop.eup %3000 }
 0x4d9   : > { %3012 = vtanh.f32 %v1380_v45 }
 0x4da   : > { %v3003_v51 = vpop.eup %3002  ;;  %1423 = vmatpush.msrb.mxu0 %v3001_v50  ;;  %3014 = vrcp.f32 %v1471_v9 }
 0x4db   : > { %v3005_v52 = vpop.eup %3004  ;;  %1442 = vmatpush.msrb.mxu1 %v3003_v51  ;;  %3016 = vrcp.f32 %v1472_v55 }
 0x4dc   : > { %v3007_v37 = vpop.eup %3006  ;;  %1424 = vmatpush.msrb.mxu0 %v3005_v52  ;;  %3018 = vrcp.f32 %v3898_v57  ;;  %v1562_v52 = vor.u32 1.1754944e-38, %v1561_v44 }
 0x4dd   : > { %v3009_v53 = vpop.eup %3008  ;;  %1443 = vmatpush.msrb.mxu1 %v3007_v37  ;;  %3020 = vrcp.f32 %v3900_v58 }
 0x4de   : > { %v3011_v54 = vpop.eup %3010  ;;  %1425 = vmatpush.msrb.mxu0 %v3009_v53  ;;  %v1574_v53 = vand.u32 2147483647, %v3900_v58 }
 0x4df   : > { %1444 = vmatpush.msrb.mxu1 %v3011_v54  ;;  %2776 = vmatmul.msk.f32.vlgmr.msrb.gmra.mxu0 %vm542_vm4, %v3890_v38  ;;  %v3013_v39 = vpop.eup %3012  ;;  %v1576_v54 = vand.u32 2147483648, %v3900_v58 }
 0x4e0   : > { %v3015_v63 = vpop.eup %3014  ;;  %1635 = vmatpush.msra.mxu0 %v1608_v3 }
 0x4e1   : > { %1445 = vmatpush.msrb.mxu1 %v3013_v39  ;;  %v3017_v17 = vpop.eup %3016  ;;  %v1476_v21 = vmul.f32 %v3015_v63, %v1471_v9  ;;  %vm1481_vm6 = vweird.f32 %v3015_v63 }
 0x4e2   : > { %2777 = vmatmul.msk.f32.vlgmr.msrb.gmra.mxu1 %vm542_vm4, %v3890_v38  ;;  %v1491_v61 = vmul.f32 %v3017_v17, %v1472_v55  ;;  %v3913_v33 = vpop.eup %3018  ;;  %vm1496_vm8 = vweird.f32 %v3017_v17  ;;  %vm3923_vm10 = vmor %vm1480_vm5, %vm1481_vm6  ;;  %vm1570_vm5 = vweird.f32 %v3900_v58 }
 0x4e3   : > { %v1477_v0 = vsub.f32 1.0, %v1476_v21  ;;  %v1551_v1 = vmul.f32 %v3913_v33, %v3898_v57  ;;  %v3917_v5 = vpop.eup %3020  ;;  %1664 = vmatpush.msra.mxu1 %v1609_v62  ;;  %vm3927_vm11 = vmor %vm1495_vm7, %vm1496_vm8  ;;  %vm1556_vm15 = vweird.f32 %v3913_v33  ;;  %vm3970_vm8 = vcmp.eq.f32.partialorder %v1574_v53, 8.507059e+37 }
 0x4e4   : > { %v1492_v56 = vsub.f32 1.0, %v1491_v61  ;;  %v1566_v15 = vmul.f32 %v3917_v5, %v3900_v58  ;;  %vm3942_vm0 = vmor %vm1555_vm14, %vm1556_vm15  ;;  %vm1571_vm6 = vweird.f32 %v3917_v5  ;;  %v1577_v62 = vor.u32 1.1754944e-38, %v1576_v54 }
 0x4e5   : > { %v1478_v14 = vmul.f32 %v3015_v63, %v1477_v0  ;;  %v1552_v10 = vsub.f32 1.0, %v1551_v1  ;;  %vm3961_vm7 = vmor %vm1570_vm5, %vm1571_vm6 }
 0x4e6   : > { %v1493_v11 = vmul.f32 %v3017_v17, %v1492_v56  ;;  %v1567_v24 = vsub.f32 1.0, %v1566_v15 }
 0x4e7   : > { %v1479_v12 = vadd.f32 %v3015_v63, %v1478_v14  ;;  %v1553_v28 = vmul.f32 %v3913_v33, %v1552_v10 }
 0x4e8   : > { %v1494_v7 = vadd.f32 %v3017_v17, %v1493_v11  ;;  %v1568_v46 = vmul.f32 %v3917_v5, %v1567_v24 }
 0x4e9   : > { %v1483_v6 = vsel %vm3923_vm10, %v3015_v63, %v1479_v12  ;;  %v1554_v2 = vadd.f32 %v3913_v33, %v1553_v28  ;;  %v4015_v63 = vstv %s4012_s30 }
 0x4ea   : > { %v1498_v31 = vsel %vm3927_vm11, %v3017_v17, %v1494_v7  ;;  %v1488_v47 = vsel %vm1485_vm12, %v1487_v27, %v1483_v6  ;;  %v1569_v55 = vadd.f32 %v3917_v5, %v1568_v46  ;;  %v1689_v46 = vld [vmem:[%s4413_s6] sm:$0xff]  ;;  %1886 = vst.msk [vmem:[#allocation3 + $0x25] ss:$8 sm:$0x3] %vm3393_vm1, %v4015_v63 }
 0x4eb   : > { %v1503_v49 = vsel %vm1500_vm13, %v1502_v32, %v1498_v31  ;;  %1692 = vperm.xlu2 %2917, %v1689_v46  }
 0x4ec   : > { %v1573_v3 = vsel %vm3961_vm7, %v3917_v5, %v1569_v55  ;;  %v1759_v55 = vld.sshfl [vmem:[#allocation1] sm:$0xff pattern:$0x75316420] }
 0x4ed   : > { %v1578_v25 = vsel %vm3970_vm8, %v1577_v62, %v1573_v3  ;;  %vm1768_vm10 = vweird.f32 %v1759_v55 }
 0x4f1   : > { %v1896_v3 = vld [vmem:[#allocation3 + $0x20] sm:$0xff]  ;;  %v1897_v62 = vld [vmem:[#allocation3 + $0x28] sm:$0xff] }
 0x4f3   : > { %1980 = vperm.xlu2 %2917, %v1689_v46  }
 0x55c   : > { %v1427_v30 = vpop.f32.mrf.mxu0 }
 0x55d   : > { %v1428_v36 = vadd.f32 %v1427_v30, %v1405_v8 }
 0x55f   : > { %v1454_v45 = vmul.f32 %v1453_v26, %v1428_v36  ;;  %v1447_v19 = vpop.f32.mrf.mxu1 }
 0x560   : > { %v1448_v48 = vadd.f32 %v1447_v19, %v1405_v8 }
 0x561   : > { %v1456_v50 = vadd.f32 %v1454_v45, %v3846_v13  ;;  %v1558_v13 = vsel %vm3942_vm0, %v3913_v33, %v1554_v2 }
 0x562   : > { %v1455_v37 = vmul.f32 %v1453_v26, %v1448_v48  ;;  %v1563_v0 = vsel %vm3947_vm2, %v1562_v52, %v1558_v13 }
 0x563   : > { %2778 = vst [vmem:[%s3373_s18 + $0x30] sm:$0xff] %v1456_v50  ;;  %v1489_v39 = vmul.f32 %v1488_v47, %v1456_v50  ;;  %v1505_v9 = vmul.f32 -1.0, %v1456_v50 }
 0x564   : > { %v1457_v57 = vadd.f32 %v1455_v37, %v3849_v29 }
 0x565   : > { %v1509_v17 = vrot.slane %v1489_v39, 4  ;;  %v1517_v21 = vrot.slane %v1505_v9, 4  ;;  %v1524_v61 = vmul.f32 %v3906_v59, %v1489_v39  ;;  %v1534_v58 = vmul.f32 %v3906_v59, %v1505_v9 }
 0x566   : > { %2779 = vst [vmem:[%s3373_s18 + $0x38] sm:$0xff] %v1457_v57  ;;  %v1504_v56 = vmul.f32 %v1503_v49, %v1457_v57  ;;  %v1506_v33 = vmul.f32 -1.0, %v1457_v57 }
 0x567   : > { %v1528_v29 = vrot.slane %v1524_v61, 4  ;;  %v1538_v1 = vrot.slane %v1534_v58, 4  ;;  %1513 = vst [vmem:[#allocation3] sm:$0xf] %v1509_v17 }
 0x568   : > { %1521 = vst [vmem:[#allocation3] sm:$0xf0] %v1517_v21  ;;  %v1510_v11 = vrot.slane %v1504_v56, 4  ;;  %v1518_v12 = vrot.slane %v1506_v33, 4  ;;  %v1525_v4 = vmul.f32 %v3906_v59, %v1504_v56  ;;  %v1535_v10 = vmul.f32 %v3906_v59, %v1506_v33 }
 0x569   : > { %v1532_v15 = vadd.f32 %v1528_v29, %v1456_v50  ;;  %v1542_v20 = vadd.f32 %v1538_v1, %v1456_v50 }
 0x56a   : > { %v1529_v41 = vrot.slane %v1525_v4, 4  ;;  %v1539_v7 = vrot.slane %v1535_v10, 4  ;;  %1514 = vst [vmem:[#allocation3 + $0x8] sm:$0xf] %v1510_v11  ;;  %v1774_v10 = vand.u32 2147483648, %v1759_v55 }
 0x56b   : > { %v1564_v22 = vmul.f32 %v1563_v0, %v1542_v20  ;;  %v1580_v23 = vmul.f32 -1.0, %v1532_v15  ;;  %1522 = vst [vmem:[#allocation3 + $0x8] sm:$0xf0] %v1518_v12  ;;  %v3982_v5 = vsel %vm587_vm9, %v1532_v15, %v1542_v20 }
 0x56c   : > { %v1533_v26 = vadd.f32 %v1529_v41, %v1457_v57  ;;  %v1543_v6 = vadd.f32 %v1539_v7, %v1457_v57  ;;  %v1760_v57 = vld.sshfl [vmem:[#allocation1 + $0x8] sm:$0xff pattern:$0x75316420]  ;;  %v1772_v7 = vand.u32 2147483647, %v1759_v55 }
 0x56d   : > { %v1584_v27 = vrot.slane %v1564_v22, 4  ;;  %v1592_v28 = vrot.slane %v1580_v23, 4  ;;  %1833 = vst [vmem:[#allocation1 + $0x1] ss:$2 sm:$0xff] %v3766_v60  ;;  %vm1783_vm12 = vweird.f32 %v1760_v57  ;;  %v1787_v23 = vand.u32 2147483647, %v1760_v57 }
 0x56e   : > { %v1579_v24 = vmul.f32 %v1578_v25, %v1543_v6  ;;  %v1581_v59 = vmul.f32 -1.0, %v1533_v26  ;;  %v3985_v8 = vsel %vm587_vm9, %v1533_v26, %v1543_v6  ;;  %v1789_v25 = vand.u32 2147483648, %v1760_v57 }
 0x56f   : > { %1588 = vst [vmem:[#allocation3 + $0x10] sm:$0xf] %v1584_v27  ;;  %v1604_v36 = vld [vmem:[#allocation3] sm:$0xff]  ;;  %v1741_v6 = vstv %s1738_s19  ;;  %vm1773_vm0 = vcmp.eq.f32.partialorder %v1772_v7, 8.507059e+37  ;;  %vm1788_vm2 = vcmp.eq.f32.partialorder %v1787_v23, 8.507059e+37 }
 0x570   : > { %1596 = vst [vmem:[#allocation3 + $0x10] sm:$0xf0] %v1592_v28  ;;  %v1585_v30 = vrot.slane %v1579_v24, 4  ;;  %v1593_v31 = vrot.slane %v1581_v59, 4  ;;  %v1775_v28 = vor.u32 1.1754944e-38, %v1774_v10 }
 0x572   : > { %1589 = vst [vmem:[#allocation3 + $0x18] sm:$0xf] %v1585_v30  ;;  %v1605_v44 = vld [vmem:[#allocation3 + $0x8] sm:$0xff]  ;;  %v1693_v30 = vpop.permute.xlu2 %1692 }
 0x573   : > { %1597 = vst [vmem:[#allocation3 + $0x18] sm:$0xf0] %v1593_v31 }
 0x574   : > { %v1834_v17 = vld.sshfl [vmem:[#allocation1] sm:$0xff pattern:$0x75316420]  ;;  %v4020_v0 = vld.sshfl [vmem:[#allocation1 + $0x8] sm:$0xff pattern:$0x75316420] }
 0x575   : > { %vm1843_vm5 = vweird.f32 %v1834_v17 }
 0x577   : > { %v1606_v32 = vld [vmem:[#allocation3 + $0x10] sm:$0xff] }
 0x578   : > { %1636 = vmatpush.msra.mxu0 %v1606_v32 }
 0x57a   : > { %v1607_v34 = vld [vmem:[#allocation3 + $0x18] sm:$0xff]  ;;  %1637 = vmatpush.msra.mxu0 %v1604_v36  ;;  %v1790_v36 = vor.u32 1.1754944e-38, %v1789_v25 }
 0x57b   : > { %1665 = vmatpush.msra.mxu1 %v1607_v34  ;;  %2780 = vmatmul.msk.f32.vlgmr.msra.gmra.mxu0 %vm456_vm3, %v3854_v18 }
 0x57d   : > { %1666 = vmatpush.msra.mxu1 %v1605_v44  ;;  %v1847_v44 = vand.u32 2147483647, %v1834_v17 }
 0x57e   : > { %2784 = vmatmul.msk.f32.vlgmr.msra.gmra.mxu1 %vm456_vm3, %v3854_v18 }
 0x57f   : > { %vm4053_vm8 = vcmp.eq.f32.partialorder %v1847_v44, 8.507059e+37 }
 0x583   : > { %2781 = vmatmul.msk.f32.gmra.mxu0 %vm456_vm3, %v3863_v40 }
 0x586   : > { %2785 = vmatmul.msk.f32.gmra.mxu1 %vm456_vm3, %v3863_v40 }
 0x58b   : > { %2782 = vmatmul.msk.f32.gmra.mxu0 %vm456_vm3, %v3872_v42 }
 0x58e   : > { %2786 = vmatmul.msk.f32.gmra.mxu1 %vm456_vm3, %v3872_v42 }
 0x593   : > { %2783 = vmatmul.msk.f32.gmra.mxu0 %vm456_vm3, %v3881_v43 }
 0x596   : > { %2787 = vmatmul.msk.f32.gmra.mxu1 %vm456_vm3, %v3881_v43 }
 0x5f8   : > { %v1639_v45 = vpop.f32.mrf.mxu0 }
 0x5fb   : > { %v1668_v2 = vpop.f32.mrf.mxu1 }
 0x600   : > { %v1642_v19 = vpop.f32.mrf.mxu0 }
 0x603   : > { %v1671_v47 = vpop.f32.mrf.mxu1 }
 0x608   : > { %v1645_v35 = vpop.f32.mrf.mxu0 }
 0x60b   : > { %v1674_v48 = vpop.f32.mrf.mxu1 }
 0x610   : > { %v1648_v49 = vpop.f32.mrf.mxu0 }
 0x611   : > { %3022 = vtanh.f32 %v1648_v49 }
 0x612   : > { %3024 = vtanh.f32 %v1645_v35 }
 0x613   : > { %v1677_v50 = vpop.f32.mrf.mxu1 }
 0x614   : > { %3026 = vtanh.f32 %v1677_v50 }
 0x615   : > { %3028 = vtanh.f32 %v1642_v19 }
 0x616   : > { %3030 = vtanh.f32 %v1674_v48 }
 0x617   : > { %v3023_v51 = vpop.eup %3022  ;;  %3032 = vtanh.f32 %v1639_v45  ;;  %v1849_v45 = vand.u32 2147483648, %v1834_v17 }
 0x618   : > { %3034 = vtanh.f32 %v1671_v47  ;;  %1710 = vmatpush.msra.mxu2 %v3023_v51  ;;  %v3025_v52 = vpop.eup %3024 }
 0x619   : > { %3036 = vtanh.f32 %v1668_v2 }
 0x61a   : > { %v3027_v37 = vpop.eup %3026  ;;  %1711 = vmatpush.msra.mxu2 %v3025_v52  ;;  %3038 = vrcp.f32 %v1759_v55 }
 0x61b   : > { %v3029_v53 = vpop.eup %3028  ;;  %1730 = vmatpush.msra.mxu3 %v3027_v37  ;;  %3040 = vrcp.f32 %v1760_v57  ;;  %v1850_v37 = vor.u32 1.1754944e-38, %v1849_v45 }
 0x61c   : > { %v3031_v54 = vpop.eup %3030  ;;  %1712 = vmatpush.msra.mxu2 %v3029_v53  ;;  %3042 = vrcp.f32 %v1834_v17 }
 0x61d   : > { %v3033_v39 = vpop.eup %3032  ;;  %1731 = vmatpush.msra.mxu3 %v3031_v54  ;;  %3044 = vrcp.f32 %v4020_v0  ;;  %v1862_v54 = vand.u32 2147483647, %v4020_v0 }
 0x61e   : > { %v3035_v9 = vpop.eup %3034  ;;  %1713 = vmatpush.msra.mxu2 %v3033_v39  ;;  %v1864_v39 = vand.u32 2147483648, %v4020_v0 }
 0x61f   : > { %1732 = vmatpush.msra.mxu3 %v3035_v9  ;;  %2788 = vmatmul.msk.f32.vlgmr.msra.gmra.mxu2 %vm542_vm4, %v3890_v38  ;;  %v3037_v13 = vpop.eup %3036 }
 0x620   : > { %v3039_v21 = vpop.eup %3038  ;;  %1923 = vmatpush.msrb.mxu2 %v1896_v3  ;;  %v1865_v3 = vor.u32 1.1754944e-38, %v1864_v39 }
 0x621   : > { %1733 = vmatpush.msra.mxu3 %v3037_v13  ;;  %v3041_v61 = vpop.eup %3040  ;;  %v1764_v58 = vmul.f32 %v3039_v21, %v1759_v55  ;;  %vm1769_vm11 = vweird.f32 %v3039_v21 }
 0x622   : > { %2789 = vmatmul.msk.f32.vlgmr.msra.gmra.mxu3 %vm542_vm4, %v3890_v38  ;;  %v1779_v60 = vmul.f32 %v3041_v61, %v1760_v57  ;;  %v4023_v33 = vpop.eup %3042  ;;  %vm1784_vm13 = vweird.f32 %v3041_v61  ;;  %vm4032_vm14 = vmor %vm1768_vm10, %vm1769_vm11  ;;  %vm1858_vm10 = vweird.f32 %v4020_v0 }
 0x623   : > { %v1765_v56 = vsub.f32 1.0, %v1764_v58  ;;  %v1839_v1 = vmul.f32 %v4023_v33, %v1834_v17  ;;  %v4026_v11 = vpop.eup %3044  ;;  %1952 = vmatpush.msrb.mxu3 %v1897_v62  ;;  %vm4036_vm15 = vmor %vm1783_vm12, %vm1784_vm13  ;;  %vm1844_vm6 = vweird.f32 %v4023_v33  ;;  %vm4076_vm13 = vcmp.eq.f32.partialorder %v1862_v54, 8.507059e+37 }
 0x624   : > { %v1780_v14 = vsub.f32 1.0, %v1779_v60  ;;  %v1854_v20 = vmul.f32 %v4026_v11, %v4020_v0  ;;  %vm4048_vm7 = vmor %vm1843_vm5, %vm1844_vm6  ;;  %vm1859_vm11 = vweird.f32 %v4026_v11 }
 0x625   : > { %v1766_v29 = vmul.f32 %v3039_v21, %v1765_v56  ;;  %v1840_v15 = vsub.f32 1.0, %v1839_v1  ;;  %vm4067_vm12 = vmor %vm1858_vm10, %vm1859_vm11 }
 0x626   : > { %v1781_v12 = vmul.f32 %v3041_v61, %v1780_v14  ;;  %v1855_v59 = vsub.f32 1.0, %v1854_v20 }
 0x627   : > { %v1767_v4 = vadd.f32 %v3039_v21, %v1766_v29  ;;  %v1841_v24 = vmul.f32 %v4023_v33, %v1840_v15 }
 0x628   : > { %v1782_v22 = vadd.f32 %v3041_v61, %v1781_v12  ;;  %v1856_v47 = vmul.f32 %v4026_v11, %v1855_v59 }
 0x629   : > { %v1771_v27 = vsel %vm4032_vm14, %v3039_v21, %v1767_v4  ;;  %v1842_v19 = vadd.f32 %v4023_v33, %v1841_v24 }
 0x62a   : > { %v1786_v32 = vsel %vm4036_vm15, %v3041_v61, %v1782_v22  ;;  %v1776_v35 = vsel %vm1773_vm0, %v1775_v28, %v1771_v27  ;;  %v1857_v55 = vadd.f32 %v4026_v11, %v1856_v47 }
 0x62b   : > { %v1791_v50 = vsel %vm1788_vm2, %v1790_v36, %v1786_v32 }
 0x62c   : > { %v1861_v1 = vsel %vm4067_vm12, %v4026_v11, %v1857_v55 }
 0x62d   : > { %v1866_v25 = vsel %vm4076_vm13, %v1865_v3, %v1861_v1 }
 0x6a2   : > { %v1715_v31 = vpop.f32.mrf.mxu2 }
 0x6a3   : > { %v1716_v34 = vadd.f32 %v1715_v31, %v1693_v30 }
 0x6a5   : > { %v1742_v2 = vmul.f32 %v1741_v6, %v1716_v34  ;;  %v1735_v46 = vpop.f32.mrf.mxu3 }
 0x6a6   : > { %v1736_v49 = vadd.f32 %v1735_v46, %v1693_v30 }
 0x6a7   : > { %v1744_v51 = vadd.f32 %v1742_v2, %v3982_v5  ;;  %v1846_v5 = vsel %vm4048_vm7, %v4023_v33, %v1842_v19 }
 0x6a8   : > { %v1743_v53 = vmul.f32 %v1741_v6, %v1736_v49  ;;  %v1851_v60 = vsel %vm4053_vm8, %v1850_v37, %v1846_v5 }
 0x6a9   : > { %2790 = vst [vmem:[%s3373_s18 + $0x40] sm:$0xff] %v1744_v51  ;;  %v1777_v9 = vmul.f32 %v1776_v35, %v1744_v51  ;;  %v1793_v13 = vmul.f32 -1.0, %v1744_v51 }
 0x6aa   : > { %v1745_v57 = vadd.f32 %v1743_v53, %v3985_v8  ;;  %v4114_v53 = vld [vmem:[%s3371_s24] sm:$0xff]  ;;  %s2026_s24 = smul.f32 %s4012_s30, %s4012_s30 }
 0x6ab   : > { %v1797_v21 = vrot.slane %v1777_v9, 4  ;;  %v1805_v61 = vrot.slane %v1793_v13, 4  ;;  %v1812_v58 = vmul.f32 %v4015_v63, %v1777_v9  ;;  %v1822_v0 = vmul.f32 %v4015_v63, %v1793_v13  ;;  %2046 = vst [vmem:[#allocation1 + $0x1] ss:$2 sm:$0xff] %v4114_v53 }
 0x6ac   : > { %2791 = vst [vmem:[%s3373_s18 + $0x48] sm:$0xff] %v1745_v57  ;;  %v1792_v56 = vmul.f32 %v1791_v50, %v1745_v57  ;;  %v1794_v33 = vmul.f32 -1.0, %v1745_v57 }
 0x6ad   : > { %v1816_v8 = vrot.slane %v1812_v58, 4  ;;  %v1826_v29 = vrot.slane %v1822_v0, 4  ;;  %1801 = vst [vmem:[#allocation3] sm:$0xf] %v1797_v21 }
 0x6ae   : > { %1809 = vst [vmem:[#allocation3] sm:$0xf0] %v1805_v61  ;;  %v1798_v62 = vrot.slane %v1792_v56, 4  ;;  %v1806_v12 = vrot.slane %v1794_v33, 4  ;;  %v1813_v4 = vmul.f32 %v4015_v63, %v1792_v56  ;;  %v1823_v10 = vmul.f32 %v4015_v63, %v1794_v33 }
 0x6af   : > { %v1820_v15 = vadd.f32 %v1816_v8, %v1744_v51  ;;  %v1830_v20 = vadd.f32 %v1826_v29, %v1744_v51 }
 0x6b0   : > { %v1817_v41 = vrot.slane %v1813_v4, 4  ;;  %v1827_v7 = vrot.slane %v1823_v10, 4  ;;  %1802 = vst [vmem:[#allocation3 + $0x8] sm:$0xf] %v1798_v62 }
 0x6b1   : > { %v1852_v22 = vmul.f32 %v1851_v60, %v1830_v20  ;;  %v1868_v23 = vmul.f32 -1.0, %v1820_v15  ;;  %1810 = vst [vmem:[#allocation3 + $0x8] sm:$0xf0] %v1806_v12  ;;  %v4088_v11 = vsel %vm587_vm9, %v1820_v15, %v1830_v20 }
 0x6b2   : > { %v1821_v26 = vadd.f32 %v1817_v41, %v1745_v57  ;;  %v1831_v6 = vadd.f32 %v1827_v7, %v1745_v57  ;;  %v2047_v54 = vld.sshfl [vmem:[#allocation1] sm:$0xff pattern:$0x75316420]  ;;  %v2048_v39 = vld.sshfl [vmem:[#allocation1 + $0x8] sm:$0xff pattern:$0x75316420]  ;;  %v2029_v7 = vstv %s2026_s24 }
 0x6b3   : > { %v1872_v27 = vrot.slane %v1852_v22, 4  ;;  %v1880_v28 = vrot.slane %v1868_v23, 4  ;;  %2121 = vst [vmem:[#allocation1 + $0x1] ss:$2 sm:$0xff] %v4114_v53  ;;  %vm2056_vm14 = vweird.f32 %v2047_v54  ;;  %vm2071_vm0 = vweird.f32 %v2048_v39 }
 0x6b4   : > { %v1867_v24 = vmul.f32 %v1866_v25, %v1831_v6  ;;  %v1869_v63 = vmul.f32 -1.0, %v1821_v26  ;;  %v4091_v59 = vsel %vm587_vm9, %v1821_v26, %v1831_v6  ;;  %v2062_v1 = vand.u32 2147483648, %v2047_v54  ;;  %v1981_v6 = vpop.permute.xlu2 %1980 }
 0x6b5   : > { %1876 = vst [vmem:[#allocation3 + $0x10] sm:$0xf] %v1872_v27  ;;  %v1892_v36 = vld [vmem:[#allocation3] sm:$0xff]  ;;  %v2060_v4 = vand.u32 2147483647, %v2047_v54  ;;  %v2077_v20 = vand.u32 2147483648, %v2048_v39 }
 0x6b6   : > { %1884 = vst [vmem:[#allocation3 + $0x10] sm:$0xf0] %v1880_v28  ;;  %v1873_v30 = vrot.slane %v1867_v24, 4  ;;  %v1881_v31 = vrot.slane %v1869_v63, 4  ;;  %v2075_v15 = vand.u32 2147483647, %v2048_v39 }
 0x6b7   : > { %v2063_v23 = vor.u32 1.1754944e-38, %v2062_v1  ;;  %vm2061_vm7 = vcmp.eq.f32.partialorder %v2060_v4, 8.507059e+37  ;;  %v2078_v24 = vor.u32 1.1754944e-38, %v2077_v20 }
 0x6b8   : > { %1877 = vst [vmem:[#allocation3 + $0x18] sm:$0xf] %v1873_v30  ;;  %v1893_v44 = vld [vmem:[#allocation3 + $0x8] sm:$0xff]  ;;  %vm2076_vm8 = vcmp.eq.f32.partialorder %v2075_v15, 8.507059e+37 }
 0x6b9   : > { %1885 = vst [vmem:[#allocation3 + $0x18] sm:$0xf0] %v1881_v31 }
 0x6ba   : > { %v4119_v9 = vld.sshfl [vmem:[#allocation1] sm:$0xff pattern:$0x75316420]  ;;  %v4121_v13 = vld.sshfl [vmem:[#allocation1 + $0x8] sm:$0xff pattern:$0x75316420] }
 0x6bb   : > { %2334 = vst [vmem:[#allocation1 + $0x1] ss:$2 sm:$0xff] %v4114_v53  ;;  %vm2131_vm10 = vweird.f32 %v4119_v9  ;;  %v2135_v30 = vand.u32 2147483647, %v4119_v9  ;;  %v2137_v31 = vand.u32 2147483648, %v4119_v9 }
 0x6bd   : > { %v1894_v32 = vld [vmem:[#allocation3 + $0x10] sm:$0xff]  ;;  %vm4168_vm13 = vcmp.eq.f32.partialorder %v2135_v30, 8.507059e+37  ;;  %v4238_v30 = vld [vmem:[%s4411_s4 + $0x18] sm:$0xff] }
 0x6be   : > { %1924 = vmatpush.msrb.mxu2 %v1894_v32 }
 0x6c0   : > { %v1895_v34 = vld [vmem:[#allocation3 + $0x18] sm:$0xff]  ;;  %1925 = vmatpush.msrb.mxu2 %v1892_v36 }
 0x6c1   : > { %1953 = vmatpush.msrb.mxu3 %v1895_v34  ;;  %2792 = vmatmul.msk.f32.vlgmr.msrb.gmra.mxu2 %vm456_vm3, %v3854_v18 }
 0x6c3   : > { %1954 = vmatpush.msrb.mxu3 %v1893_v44 }
 0x6c4   : > { %2796 = vmatmul.msk.f32.vlgmr.msrb.gmra.mxu3 %vm456_vm3, %v3854_v18 }
 0x6c9   : > { %2793 = vmatmul.msk.f32.gmra.mxu2 %vm456_vm3, %v3863_v40 }
 0x6cc   : > { %2797 = vmatmul.msk.f32.gmra.mxu3 %vm456_vm3, %v3863_v40 }
 0x6d1   : > { %2794 = vmatmul.msk.f32.gmra.mxu2 %vm456_vm3, %v3872_v42 }
 0x6d4   : > { %2798 = vmatmul.msk.f32.gmra.mxu3 %vm456_vm3, %v3872_v42 }
 0x6d9   : > { %2795 = vmatmul.msk.f32.gmra.mxu2 %vm456_vm3, %v3881_v43 }
 0x6dc   : > { %2799 = vmatmul.msk.f32.gmra.mxu3 %vm456_vm3, %v3881_v43 }
 0x744   : > { %v1927_v45 = vpop.f32.mrf.mxu2 }
 0x747   : > { %v1956_v18 = vpop.f32.mrf.mxu3 }
 0x74c   : > { %v1930_v2 = vpop.f32.mrf.mxu2 }
 0x74f   : > { %v1959_v19 = vpop.f32.mrf.mxu3 }
 0x754   : > { %v1933_v46 = vpop.f32.mrf.mxu2 }
 0x757   : > { %v1962_v47 = vpop.f32.mrf.mxu3 }
 0x75c   : > { %v1936_v35 = vpop.f32.mrf.mxu2 }
 0x75d   : > { %3046 = vtanh.f32 %v1936_v35  ;;  %v2138_v35 = vor.u32 1.1754944e-38, %v2137_v31 }
 0x75e   : > { %3048 = vtanh.f32 %v1933_v46 }
 0x75f   : > { %v1965_v40 = vpop.f32.mrf.mxu3 }
 0x760   : > { %3050 = vtanh.f32 %v1965_v40 }
 0x761   : > { %3052 = vtanh.f32 %v1930_v2 }
 0x762   : > { %3054 = vtanh.f32 %v1962_v47 }
 0x763   : > { %v3047_v42 = vpop.eup %3046  ;;  %3056 = vtanh.f32 %v1927_v45 }
 0x764   : > { %3058 = vtanh.f32 %v1959_v19  ;;  %1998 = vmatpush.msrb.mxu0 %v3047_v42  ;;  %v3049_v48 = vpop.eup %3048  ;;  %v2150_v42 = vand.u32 2147483647, %v4121_v13 }
 0x765   : > { %3060 = vtanh.f32 %v1956_v18 }
 0x766   : > { %v3051_v49 = vpop.eup %3050  ;;  %1999 = vmatpush.msrb.mxu0 %v3049_v48  ;;  %3062 = vrcp.f32 %v2047_v54  ;;  %v2152_v48 = vand.u32 2147483648, %v4121_v13 }
 0x767   : > { %v3053_v43 = vpop.eup %3052  ;;  %2018 = vmatpush.msrb.mxu1 %v3051_v49  ;;  %3064 = vrcp.f32 %v2048_v39 }
 0x768   : > { %v3055_v50 = vpop.eup %3054  ;;  %2000 = vmatpush.msrb.mxu0 %v3053_v43  ;;  %3066 = vrcp.f32 %v4119_v9 }
 0x769   : > { %v3057_v51 = vpop.eup %3056  ;;  %2019 = vmatpush.msrb.mxu1 %v3055_v50  ;;  %3068 = vrcp.f32 %v4121_v13 }
 0x76a   : > { %v3059_v52 = vpop.eup %3058  ;;  %2001 = vmatpush.msrb.mxu0 %v3057_v51 }
 0x76b   : > { %2020 = vmatpush.msrb.mxu1 %v3059_v52  ;;  %2800 = vmatmul.msk.f32.vlgmr.msrb.gmra.mxu0 %vm542_vm4, %v3890_v38  ;;  %v3061_v37 = vpop.eup %3060 }
 0x76c   : > { %v3063_v5 = vpop.eup %3062 }
 0x76d   : > { %2021 = vmatpush.msrb.mxu1 %v3061_v37  ;;  %v3065_v55 = vpop.eup %3064  ;;  %v2052_v57 = vmul.f32 %v3063_v5, %v2047_v54  ;;  %vm2057_vm15 = vweird.f32 %v3063_v5 }
 0x76e   : > { %2801 = vmatmul.msk.f32.vlgmr.msrb.gmra.mxu1 %vm542_vm4, %v3890_v38  ;;  %v4127_v38 = vstv %s4123_s23  ;;  %v2067_v17 = vmul.f32 %v3065_v55, %v2048_v39  ;;  %v4134_v61 = vpop.eup %3066  ;;  %vm2072_vm2 = vweird.f32 %v3065_v55  ;;  %vm4144_vm5 = vmor %vm2056_vm14, %vm2057_vm15  ;;  %vm2146_vm14 = vweird.f32 %v4121_v13  ;;  %s2835_s23 = sshll.u32 %s3214_s11, 5 }
 0x76f   : > { %2174 = vst.msk [vmem:[#allocation3 + $0x25] ss:$8 sm:$0x3] %vm3393_vm1, %v4127_v38  ;;  %v2053_v21 = vsub.f32 1.0, %v2052_v57  ;;  %v2127_v60 = vmul.f32 %v4134_v61, %v4119_v9  ;;  %v4138_v14 = vpop.eup %3068  ;;  %vm4148_vm6 = vmor %vm2071_vm0, %vm2072_vm2  ;;  %vm2132_vm11 = vweird.f32 %v4134_v61  ;;  %vm4191_vm2 = vcmp.eq.f32.partialorder %v2150_v42, 8.507059e+37  ;;  %v4247_v42 = vld [vmem:[%s4412_s5] sm:$0xff]  ;;  %s2628_s16 = sadd.s32 %s2835_s23, %s3359_s27 }
 0x770   : > { %v2068_v58 = vsub.f32 1.0, %v2067_v17  ;;  %v2142_v62 = vmul.f32 %v4138_v14, %v4121_v13  ;;  %vm4163_vm12 = vmor %vm2131_vm10, %vm2132_vm11  ;;  %vm2147_vm15 = vweird.f32 %v4138_v14  ;;  %s2832_s30 = sshll.u32 %s2628_s16, 3  ;;  %s2616_s27 = scalar_lea.sflag [#allocation8], %s261_s26 }
 0x771   : > { %v2054_v0 = vmul.f32 %v3063_v5, %v2053_v21  ;;  %v2128_v3 = vsub.f32 1.0, %v2127_v60  ;;  %vm4182_vm0 = vmor %vm2146_vm14, %vm2147_vm15  ;;  %s2630_s24 = scalar_lea.hbm %s4414_s7, %s2832_s30 }
 0x772   : > { %v2069_v8 = vmul.f32 %v3065_v55, %v2068_v58  ;;  %v2143_v26 = vsub.f32 1.0, %v2142_v62  ;;  %s2633_s11 = sshll.u32 %s2630_s24, 4  ;;  %s2634_s11 = int_to_ptr.hbm [resolvable:$true] %s2633_s11 }
 0x773   : > { %v2055_v29 = vadd.f32 %v3063_v5, %v2054_v0  ;;  %v2129_v25 = vmul.f32 %v4134_v61, %v2128_v3  ;;  %s3148_s8 = sshra.s32 %s2634_s11, 4  ;;  %s3149_s8 = int_to_ptr.hbm [resolvable:$true] %s3148_s8 }
 0x774   : > { %v2070_v10 = vadd.f32 %v3065_v55, %v2069_v8  ;;  %v2144_v44 = vmul.f32 %v4138_v14, %v2143_v26  ;;  %v4211_v26 = vld [vmem:[%s4411_s4] sm:$0xff]  ;;  %p3155_p4 = scmp.lt.s32.totalorder %s3149_s8, %s4414_s7 }
 0x775   : > { %v2059_v22 = vsel %vm4144_vm5, %v3063_v5, %v2055_v29  ;;  %v2130_v36 = vadd.f32 %v4134_v61, %v2129_v25 }
 0x776   : > { %v2184_v56 = vld [vmem:[#allocation3 + $0x20] sm:$0xff]  ;;  %v2185_v33 = vld [vmem:[#allocation3 + $0x28] sm:$0xff]  ;;  %v2074_v28 = vsel %vm4148_vm6, %v3065_v55, %v2070_v10  ;;  %v2064_v45 = vsel %vm2061_vm7, %v2063_v23, %v2059_v22  ;;  %v2145_v50 = vadd.f32 %v4138_v14, %v2144_v44 }
 0x777   : > { %2211 = vmatpush.msra.mxu0 %v2184_v56  ;;  %2240 = vmatpush.msra.mxu1 %v2185_v33  ;;  %v2079_v19 = vsel %vm2076_vm8, %v2078_v24, %v2074_v28  ;;  %v4220_v24 = vld [vmem:[%s4411_s4 + $0x8] sm:$0xff] }
 0x778   : > { %v2149_v21 = vsel %vm4182_vm0, %v4138_v14, %v2145_v50  ;;  %v2336_v50 = vld.sshfl [vmem:[#allocation1 + $0x8] sm:$0xff pattern:$0x75316420] }
 0x779   : > { %vm2359_vm6 = vweird.f32 %v2336_v50 }
 0x7e8   : > { %v2003_v27 = vpop.f32.mrf.mxu0 }
 0x7e9   : > { %v2004_v63 = vadd.f32 %v2003_v27, %v1981_v6 }
 0x7eb   : > { %v2030_v32 = vmul.f32 %v2029_v7, %v2004_v63  ;;  %v2023_v34 = vpop.f32.mrf.mxu1  ;;  %v4229_v63 = vld [vmem:[%s4411_s4 + $0x10] sm:$0xff] }
 0x7ec   : > { %v2024_v2 = vadd.f32 %v2023_v34, %v1981_v6 }
 0x7ed   : > { %v2032_v46 = vadd.f32 %v2030_v32, %v4088_v11  ;;  %v2134_v11 = vsel %vm4163_vm12, %v4134_v61, %v2130_v36  ;;  %v2153_v61 = vor.u32 1.1754944e-38, %v2152_v48 }
 0x7ee   : > { %v2031_v40 = vmul.f32 %v2029_v7, %v2024_v2  ;;  %v2139_v13 = vsel %vm4168_vm13, %v2138_v35, %v2134_v11  ;;  %v2335_v11 = vld.sshfl [vmem:[#allocation1] sm:$0xff pattern:$0x75316420] }
 0x7ef   : > { %2802 = vst [vmem:[%s3373_s18 + $0x50] sm:$0xff] %v2032_v46  ;;  %v2065_v49 = vmul.f32 %v2064_v45, %v2032_v46  ;;  %v2081_v43 = vmul.f32 -1.0, %v2032_v46  ;;  %v2154_v12 = vsel %vm4191_vm2, %v2153_v61, %v2149_v21 }
 0x7f0   : > { %v2033_v51 = vadd.f32 %v2031_v40, %v4091_v59  ;;  %2409 = vst [vmem:[#allocation1 + $0x1] ss:$2 sm:$0xff] %v4114_v53 }
 0x7f1   : > { %v2085_v37 = vrot.slane %v2065_v49, 4  ;;  %v2093_v54 = vrot.slane %v2081_v43, 4  ;;  %v2100_v39 = vmul.f32 %v4127_v38, %v2065_v49  ;;  %v2110_v9 = vmul.f32 %v4127_v38, %v2081_v43 }
 0x7f2   : > { %2803 = vst [vmem:[%s3373_s18 + $0x58] sm:$0xff] %v2033_v51  ;;  %v2080_v5 = vmul.f32 %v2079_v19, %v2033_v51  ;;  %v2082_v55 = vmul.f32 -1.0, %v2033_v51 }
 0x7f3   : > { %v2104_v59 = vrot.slane %v2100_v39, 4  ;;  %v2114_v17 = vrot.slane %v2110_v9, 4  ;;  %2089 = vst [vmem:[#allocation3] sm:$0xf] %v2085_v37 }
 0x7f4   : > { %2097 = vst [vmem:[#allocation3] sm:$0xf0] %v2093_v54  ;;  %v2086_v58 = vrot.slane %v2080_v5, 4  ;;  %v2094_v0 = vrot.slane %v2082_v55, 4  ;;  %v2101_v60 = vmul.f32 %v4127_v38, %v2080_v5  ;;  %v2111_v56 = vmul.f32 %v4127_v38, %v2082_v55 }
 0x7f5   : > { %v2108_v33 = vadd.f32 %v2104_v59, %v2032_v46  ;;  %v2118_v8 = vadd.f32 %v2114_v17, %v2032_v46 }
 0x7f6   : > { %v2105_v29 = vrot.slane %v2101_v60, 4  ;;  %v2115_v1 = vrot.slane %v2111_v56, 4  ;;  %2090 = vst [vmem:[#allocation3 + $0x8] sm:$0xf] %v2086_v58 }
 0x7f7   : > { %v2140_v3 = vmul.f32 %v2139_v13, %v2118_v8  ;;  %v2156_v62 = vmul.f32 -1.0, %v2108_v33  ;;  %2098 = vst [vmem:[#allocation3 + $0x8] sm:$0xf0] %v2094_v0  ;;  %v4203_v14 = vsel %vm587_vm9, %v2108_v33, %v2118_v8  ;;  %v2410_v52 = vld.sshfl [vmem:[#allocation1] sm:$0xff pattern:$0x75316420] }
 0x7f8   : > { %v2109_v4 = vadd.f32 %v2105_v29, %v2033_v51  ;;  %v2119_v10 = vadd.f32 %v2115_v1, %v2033_v51  ;;  %v4258_v51 = vstv %s4255_s15  ;;  %v4263_v9 = vld.sshfl [vmem:[#allocation1 + $0x8] sm:$0xff pattern:$0x75316420]  ;;  %v2350_v0 = vand.u32 2147483648, %v2335_v11  ;;  %s3150_s15 = scalar_lea.hbm %s3149_s8, 128 }
 0x7f9   : > { %v2160_v15 = vrot.slane %v2140_v3, 4  ;;  %v2168_v20 = vrot.slane %v2156_v62, 4  ;;  %2462 = vst.msk [vmem:[#allocation3 + $0x25] ss:$8 sm:$0x3] %vm3393_vm1, %v4258_v51  ;;  %vm2344_vm1 = vweird.f32 %v2335_v11  ;;  %v2365_v3 = vand.u32 2147483648, %v2336_v50  ;;  %p3151_p0 = scmp.ne.s32.totalorder %s3149_s8, %s3150_s15 }
 0x7fa   : > { %v2155_v41 = vmul.f32 %v2154_v12, %v2119_v10  ;;  %v2157_v38 = vmul.f32 -1.0, %v2109_v4  ;;  %v4206_v7 = vsel %vm587_vm9, %v2109_v4, %v2119_v10  ;;  %v2348_v8 = vand.u32 2147483647, %v2335_v11 }
 0x7fb   : > { %2164 = vst [vmem:[#allocation3 + $0x10] sm:$0xf] %v2160_v15  ;;  %v2180_v6 = vld [vmem:[#allocation3] sm:$0xff]  ;;  %v2363_v1 = vand.u32 2147483647, %v2336_v50  ;;  %v2317_v12 = vstv %s2314_s1  ;;  %v2351_v10 = vor.u32 1.1754944e-38, %v2350_v0  ;;  %vm2419_vm13 = vweird.f32 %v2410_v52  ;;  %p3152_p1 = pnand %p3151_p0, %p3337_p3 }
 0x7fc   : > { %2172 = vst [vmem:[#allocation3 + $0x10] sm:$0xf0] %v2168_v20  ;;  %v2161_v22 = vrot.slane %v2155_v41, 4  ;;  %v2169_v23 = vrot.slane %v2157_v38, 4  ;;  %v2269_v41 = vpop.permute.xlu0 %2268  ;;  %vm2349_vm11 = vcmp.eq.f32.partialorder %v2348_v8, 8.507059e+37  ;;  %vm2434_vm2 = vweird.f32 %v4263_v9 }
 0x7fd   : > { %vm2364_vm12 = vcmp.eq.f32.partialorder %v2363_v1, 8.507059e+37  ;;  %p3153_p2 = pneg %p3152_p1 }
 0x7fe   : > { %2165 = vst [vmem:[#allocation3 + $0x18] sm:$0xf] %v2161_v22  ;;  %v2181_v28 = vld [vmem:[#allocation3 + $0x8] sm:$0xff] }
 0x7ff   : > { %2173 = vst [vmem:[#allocation3 + $0x18] sm:$0xf0] %v2169_v23  ;;  %v2366_v23 = vor.u32 1.1754944e-38, %v2365_v3 }
 0x800   : > { %v2472_v16 = vld [vmem:[#allocation3 + $0x20] sm:$0xff]  ;;  %v2473_v17 = vld [vmem:[#allocation3 + $0x28] sm:$0xff] }
 0x803   : > { %v2182_v25 = vld [vmem:[#allocation3 + $0x10] sm:$0xff] }
 0x804   : > { %2212 = vmatpush.msra.mxu0 %v2182_v25 }
 0x806   : > { %v2183_v27 = vld [vmem:[#allocation3 + $0x18] sm:$0xff]  ;;  %2213 = vmatpush.msra.mxu0 %v2180_v6  ;;  %v2423_v6 = vand.u32 2147483647, %v2410_v52 }
 0x807   : > { %2241 = vmatpush.msra.mxu1 %v2183_v27  ;;  %2804 = vmatmul.msk.f32.vlgmr.msra.gmra.mxu0 %vm456_vm3, %v4211_v26  ;;  %v2425_v27 = vand.u32 2147483648, %v2410_v52 }
 0x808   : > { %vm4296_vm0 = vcmp.eq.f32.partialorder %v2423_v6, 8.507059e+37 }
 0x809   : > { %2242 = vmatpush.msra.mxu1 %v2181_v28 }
 0x80a   : > { %2808 = vmatmul.msk.f32.vlgmr.msra.gmra.mxu1 %vm456_vm3, %v4211_v26 }
 0x80f   : > { %2805 = vmatmul.msk.f32.gmra.mxu0 %vm456_vm3, %v4220_v24 }
 0x812   : > { %2809 = vmatmul.msk.f32.gmra.mxu1 %vm456_vm3, %v4220_v24 }
 0x817   : > { %2806 = vmatmul.msk.f32.gmra.mxu0 %vm456_vm3, %v4229_v63 }
 0x81a   : > { %2810 = vmatmul.msk.f32.gmra.mxu1 %vm456_vm3, %v4229_v63 }
 0x81f   : > { %2807 = vmatmul.msk.f32.gmra.mxu0 %vm456_vm3, %v4238_v30 }
 0x822   : > { %2811 = vmatmul.msk.f32.gmra.mxu1 %vm456_vm3, %v4238_v30 }
 0x884   : > { %v2215_v31 = vpop.f32.mrf.mxu0 }
 0x887   : > { %v2244_v32 = vpop.f32.mrf.mxu1 }
 0x88c   : > { %v2218_v36 = vpop.f32.mrf.mxu0 }
 0x88f   : > { %v2247_v34 = vpop.f32.mrf.mxu1 }
 0x894   : > { %v2221_v44 = vpop.f32.mrf.mxu0 }
 0x897   : > { %v2250_v45 = vpop.f32.mrf.mxu1 }
 0x89c   : > { %v2224_v18 = vpop.f32.mrf.mxu0 }
 0x89d   : > { %3070 = vtanh.f32 %v2224_v18 }
 0x89e   : > { %3072 = vtanh.f32 %v2221_v44 }
 0x89f   : > { %v2253_v2 = vpop.f32.mrf.mxu1 }
 0x8a0   : > { %3074 = vtanh.f32 %v2253_v2 }
 0x8a1   : > { %3076 = vtanh.f32 %v2218_v36 }
 0x8a2   : > { %3078 = vtanh.f32 %v2250_v45 }
 0x8a3   : > { %v3071_v19 = vpop.eup %3070  ;;  %3080 = vtanh.f32 %v2215_v31 }
 0x8a4   : > { %3082 = vtanh.f32 %v2247_v34  ;;  %2286 = vmatpush.msra.mxu2 %v3071_v19  ;;  %v3073_v46 = vpop.eup %3072 }
 0x8a5   : > { %3084 = vtanh.f32 %v2244_v32 }
 0x8a6   : > { %v3075_v47 = vpop.eup %3074  ;;  %2287 = vmatpush.msra.mxu2 %v3073_v46  ;;  %3086 = vrcp.f32 %v2335_v11  ;;  %v2426_v46 = vor.u32 1.1754944e-38, %v2425_v27 }
 0x8a7   : > { %v3077_v35 = vpop.eup %3076  ;;  %2306 = vmatpush.msra.mxu3 %v3075_v47  ;;  %3088 = vrcp.f32 %v2336_v50 }
 0x8a8   : > { %v3079_v40 = vpop.eup %3078  ;;  %2288 = vmatpush.msra.mxu2 %v3077_v35  ;;  %3090 = vrcp.f32 %v2410_v52  ;;  %v2438_v35 = vand.u32 2147483647, %v4263_v9 }
 0x8a9   : > { %v3081_v48 = vpop.eup %3080  ;;  %2307 = vmatpush.msra.mxu3 %v3079_v40  ;;  %3092 = vrcp.f32 %v4263_v9  ;;  %v2440_v40 = vand.u32 2147483648, %v4263_v9 }
 0x8aa   : > { %v3083_v49 = vpop.eup %3082  ;;  %2289 = vmatpush.msra.mxu2 %v3081_v48 }
 0x8ab   : > { %2308 = vmatpush.msra.mxu3 %v3083_v49  ;;  %2812 = vmatmul.msk.f32.vlgmr.msra.gmra.mxu2 %vm542_vm4, %v4247_v42  ;;  %v3085_v43 = vpop.eup %3084 }
 0x8ac   : > { %v3087_v37 = vpop.eup %3086  ;;  %2499 = vmatpush.msrb.mxu2 %v2472_v16 }
 0x8ad   : > { %2309 = vmatpush.msra.mxu3 %v3085_v43  ;;  %v3089_v54 = vpop.eup %3088  ;;  %v2340_v39 = vmul.f32 %v3087_v37, %v2335_v11  ;;  %vm2345_vm5 = vweird.f32 %v3087_v37 }
 0x8ae   : > { %2813 = vmatmul.msk.f32.vlgmr.msra.gmra.mxu3 %vm542_vm4, %v4247_v42  ;;  %v2355_v53 = vmul.f32 %v3089_v54, %v2336_v50  ;;  %v4266_v5 = vpop.eup %3090  ;;  %vm2360_vm7 = vweird.f32 %v3089_v54  ;;  %vm4275_vm8 = vmor %vm2344_vm1, %vm2345_vm5 }
 0x8af   : > { %v2341_v13 = vsub.f32 1.0, %v2340_v39  ;;  %v2415_v59 = vmul.f32 %v4266_v5, %v2410_v52  ;;  %v4269_v21 = vpop.eup %3092  ;;  %2528 = vmatpush.msrb.mxu3 %v2473_v17  ;;  %vm4279_vm10 = vmor %vm2359_vm6, %vm2360_vm7  ;;  %vm2420_vm14 = vweird.f32 %v4266_v5  ;;  %vm4319_vm6 = vcmp.eq.f32.partialorder %v2438_v35, 8.507059e+37 }
 0x8b0   : > { %v2356_v55 = vsub.f32 1.0, %v2355_v53  ;;  %v2430_v56 = vmul.f32 %v4269_v21, %v4263_v9  ;;  %vm4291_vm15 = vmor %vm2419_vm13, %vm2420_vm14  ;;  %vm2435_vm1 = vweird.f32 %v4269_v21  ;;  %v2605_v35 = vstv %s2602_s28  ;;  %s3154_s28 = scalar_lea.hbm %s4414_s7, 1024 }
 0x8b1   : > { %v2342_v57 = vmul.f32 %v3087_v37, %v2341_v13  ;;  %v2416_v60 = vsub.f32 1.0, %v2415_v59  ;;  %vm4310_vm5 = vmor %vm2434_vm2, %vm2435_vm1  ;;  %v2441_v59 = vor.u32 1.1754944e-38, %v2440_v40  ;;  %p3156_p5 = scmp.lt.s32.totalorder %s3154_s28, %s3150_s15 }
 0x8b2   : > { %v2357_v61 = vmul.f32 %v3089_v54, %v2356_v55  ;;  %v2431_v20 = vsub.f32 1.0, %v2430_v56 }
 0x8b3   : > { %v2343_v58 = vadd.f32 %v3087_v37, %v2342_v57  ;;  %v2417_v15 = vmul.f32 %v4266_v5, %v2416_v60  ;;  %p3157_p6 = por %p3156_p5, %p3155_p4 }
 0x8b4   : > { %v2358_v29 = vadd.f32 %v3089_v54, %v2357_v61  ;;  %v2432_v36 = vmul.f32 %v4269_v21, %v2431_v20 }
 0x8b5   : > { %v2347_v4 = vsel %vm4275_vm8, %v3087_v37, %v2343_v58  ;;  %v2418_v31 = vadd.f32 %v4266_v5, %v2417_v15  ;;  %p3158_p7 = pnand %p3157_p6, %p3153_p2 }
 0x8b6   : > { %v2362_v22 = vsel %vm4279_vm10, %v3089_v54, %v2358_v29  ;;  %v2352_v34 = vsel %vm2349_vm11, %v2351_v10, %v2347_v4  ;;  %v2433_v43 = vadd.f32 %v4269_v21, %v2432_v36 }
 0x8b7   : > { %v2367_v18 = vsel %vm2364_vm12, %v2366_v23, %v2362_v22 }
 0x8b8   : > { %v2437_v57 = vsel %vm4310_vm5, %v4269_v21, %v2433_v43 }
 0x8b9   : > { %v2442_v1 = vsel %vm4319_vm6, %v2441_v59, %v2437_v57 }
 0x92e   : > { %v2291_v38 = vpop.f32.mrf.mxu2 }
 0x92f   : > { %v2292_v25 = vadd.f32 %v2291_v38, %v2269_v41 }
 0x931   : > { %v2318_v28 = vmul.f32 %v2317_v12, %v2292_v25  ;;  %v2311_v32 = vpop.f32.mrf.mxu3 }
 0x932   : > { %v2312_v45 = vadd.f32 %v2311_v32, %v2269_v41 }
 0x933   : > { %v2320_v2 = vadd.f32 %v2318_v28, %v4203_v14  ;;  %v2422_v14 = vsel %vm4291_vm15, %v4266_v5, %v2418_v31 }
 0x934   : > { %v2319_v47 = vmul.f32 %v2317_v12, %v2312_v45  ;;  %v2427_v9 = vsel %vm4296_vm0, %v2426_v46, %v2422_v14  ;;  %v2557_v46 = vpop.permute.xlu1 %2556 }
 0x935   : > { %2814 = vst [vmem:[%s3373_s18 + $0x60] sm:$0xff] %v2320_v2  ;;  %v2353_v48 = vmul.f32 %v2352_v34, %v2320_v2  ;;  %v2369_v49 = vmul.f32 -1.0, %v2320_v2 }
 0x936   : > { %v2321_v11 = vadd.f32 %v2319_v47, %v4206_v7 }
 0x937   : > { %v2373_v52 = vrot.slane %v2353_v48, 4  ;;  %v2381_v37 = vrot.slane %v2369_v49, 4  ;;  %v2388_v54 = vmul.f32 %v4258_v51, %v2353_v48  ;;  %v2398_v39 = vmul.f32 %v4258_v51, %v2369_v49 }
 0x938   : > { %2815 = vst [vmem:[%s3373_s18 + $0x68] sm:$0xff] %v2321_v11  ;;  %v2368_v53 = vmul.f32 %v2367_v18, %v2321_v11  ;;  %v2370_v13 = vmul.f32 -1.0, %v2321_v11 }
 0x939   : > { %v2392_v7 = vrot.slane %v2388_v54, 4  ;;  %v2402_v55 = vrot.slane %v2398_v39, 4  ;;  %2377 = vst [vmem:[#allocation3] sm:$0xf] %v2373_v52 }
 0x93a   : > { %2385 = vst [vmem:[#allocation3] sm:$0xf0] %v2381_v37  ;;  %v2374_v16 = vrot.slane %v2368_v53, 4  ;;  %v2382_v17 = vrot.slane %v2370_v13, 4  ;;  %v2389_v61 = vmul.f32 %v4258_v51, %v2368_v53  ;;  %v2399_v58 = vmul.f32 %v4258_v51, %v2370_v13 }
 0x93b   : > { %v2396_v0 = vadd.f32 %v2392_v7, %v2320_v2  ;;  %v2406_v60 = vadd.f32 %v2402_v55, %v2320_v2 }
 0x93c   : > { %v2393_v56 = vrot.slane %v2389_v61, 4  ;;  %v2403_v33 = vrot.slane %v2399_v58, 4  ;;  %2378 = vst [vmem:[#allocation3 + $0x8] sm:$0xf] %v2374_v16 }
 0x93d   : > { %v2428_v8 = vmul.f32 %v2427_v9, %v2406_v60  ;;  %v2444_v29 = vmul.f32 -1.0, %v2396_v0  ;;  %2386 = vst [vmem:[#allocation3 + $0x8] sm:$0xf0] %v2382_v17  ;;  %v4331_v21 = vsel %vm587_vm9, %v2396_v0, %v2406_v60 }
 0x93e   : > { %v2397_v3 = vadd.f32 %v2393_v56, %v2321_v11  ;;  %v2407_v62 = vadd.f32 %v2403_v33, %v2321_v11 }
 0x93f   : > { %v2448_v12 = vrot.slane %v2428_v8, 4  ;;  %v2456_v4 = vrot.slane %v2444_v29, 4 }
 0x940   : > { %v2443_v10 = vmul.f32 %v2442_v1, %v2407_v62  ;;  %v2445_v51 = vmul.f32 -1.0, %v2397_v3  ;;  %v4334_v15 = vsel %vm587_vm9, %v2397_v3, %v2407_v62 }
 0x941   : > { %2452 = vst [vmem:[#allocation3 + $0x10] sm:$0xf] %v2448_v12  ;;  %v2468_v22 = vld [vmem:[#allocation3] sm:$0xff] }
 0x942   : > { %2460 = vst [vmem:[#allocation3 + $0x10] sm:$0xf0] %v2456_v4  ;;  %v2449_v20 = vrot.slane %v2443_v10, 4  ;;  %v2457_v41 = vrot.slane %v2445_v51, 4 }
 0x944   : > { %2453 = vst [vmem:[#allocation3 + $0x18] sm:$0xf] %v2449_v20  ;;  %v2469_v25 = vld [vmem:[#allocation3 + $0x8] sm:$0xff] }
 0x945   : > { %2461 = vst [vmem:[#allocation3 + $0x18] sm:$0xf0] %v2457_v41 }
 0x949   : > { %v2470_v38 = vld [vmem:[#allocation3 + $0x10] sm:$0xff] }
 0x94a   : > { %2500 = vmatpush.msrb.mxu2 %v2470_v38 }
 0x94c   : > { %v2471_v23 = vld [vmem:[#allocation3 + $0x18] sm:$0xff]  ;;  %2501 = vmatpush.msrb.mxu2 %v2468_v22 }
 0x94d   : > { %2529 = vmatpush.msrb.mxu3 %v2471_v23  ;;  %2816 = vmatmul.msk.f32.vlgmr.msrb.gmra.mxu2 %vm456_vm3, %v4211_v26 }
 0x94f   : > { %2530 = vmatpush.msrb.mxu3 %v2469_v25 }
 0x950   : > { %2820 = vmatmul.msk.f32.vlgmr.msrb.gmra.mxu3 %vm456_vm3, %v4211_v26 }
 0x955   : > { %2817 = vmatmul.msk.f32.gmra.mxu2 %vm456_vm3, %v4220_v24 }
 0x958   : > { %2821 = vmatmul.msk.f32.gmra.mxu3 %vm456_vm3, %v4220_v24 }
 0x95d   : > { %2818 = vmatmul.msk.f32.gmra.mxu2 %vm456_vm3, %v4229_v63 }
 0x960   : > { %2822 = vmatmul.msk.f32.gmra.mxu3 %vm456_vm3, %v4229_v63 }
 0x965   : > { %2819 = vmatmul.msk.f32.gmra.mxu2 %vm456_vm3, %v4238_v30 }
 0x968   : > { %2823 = vmatmul.msk.f32.gmra.mxu3 %vm456_vm3, %v4238_v30 }
 0x9d0   : > { %v2503_v6 = vpop.f32.mrf.mxu2 }
 0x9d3   : > { %v2532_v26 = vpop.f32.mrf.mxu3 }
 0x9d8   : > { %v2506_v27 = vpop.f32.mrf.mxu2 }
 0x9db   : > { %v2535_v28 = vpop.f32.mrf.mxu3 }
 0x9e0   : > { %v2509_v31 = vpop.f32.mrf.mxu2 }
 0x9e3   : > { %v2538_v32 = vpop.f32.mrf.mxu3 }
 0x9e8   : > { %v2512_v36 = vpop.f32.mrf.mxu2 }
 0x9e9   : > { %3094 = vtanh.f32 %v2512_v36 }
 0x9ea   : > { %3096 = vtanh.f32 %v2509_v31 }
 0x9eb   : > { %v2541_v24 = vpop.f32.mrf.mxu3 }
 0x9ec   : > { %3098 = vtanh.f32 %v2541_v24 }
 0x9ed   : > { %3100 = vtanh.f32 %v2506_v27 }
 0x9ee   : > { %3102 = vtanh.f32 %v2538_v32 }
 0x9ef   : > { %v3095_v63 = vpop.eup %3094  ;;  %3104 = vtanh.f32 %v2503_v6 }
 0x9f0   : > { %3106 = vtanh.f32 %v2535_v28  ;;  %2574 = vmatpush.msrb.mxu0 %v3095_v63  ;;  %v3097_v34 = vpop.eup %3096 }
 0x9f1   : > { %3108 = vtanh.f32 %v2532_v26 }
 0x9f2   : > { %v3099_v44 = vpop.eup %3098  ;;  %2575 = vmatpush.msrb.mxu0 %v3097_v34 }
 0x9f3   : > { %v3101_v30 = vpop.eup %3100  ;;  %2594 = vmatpush.msrb.mxu1 %v3099_v44 }
 0x9f4   : > { %v3103_v45 = vpop.eup %3102  ;;  %2576 = vmatpush.msrb.mxu0 %v3101_v30 }
 0x9f5   : > { %v3105_v18 = vpop.eup %3104  ;;  %2595 = vmatpush.msrb.mxu1 %v3103_v45 }
 0x9f6   : > { %v3107_v2 = vpop.eup %3106  ;;  %2577 = vmatpush.msrb.mxu0 %v3105_v18 }
 0x9f7   : > { %2596 = vmatpush.msrb.mxu1 %v3107_v2  ;;  %2824 = vmatmul.msk.f32.vlgmr.msrb.gmra.mxu0 %vm542_vm4, %v4247_v42  ;;  %v3109_v19 = vpop.eup %3108 }
 0x9f9   : > { %2597 = vmatpush.msrb.mxu1 %v3109_v19 }
 0x9fa   : > { %2825 = vmatmul.msk.f32.vlgmr.msrb.gmra.mxu1 %vm542_vm4, %v4247_v42 }
 0xa74   : > { %v2579_v47 = vpop.f32.mrf.mxu0 }
 0xa75   : > { %v2580_v40 = vadd.f32 %v2579_v47, %v2557_v46 }
 0xa77   : > { %v2606_v48 = vmul.f32 %v2605_v35, %v2580_v40  ;;  %v2599_v49 = vpop.f32.mrf.mxu1 }
 0xa78   : > { %v2600_v14 = vadd.f32 %v2599_v49, %v2557_v46 }
 0xa79   : > { %v2608_v42 = vadd.f32 %v2606_v48, %v4331_v21 }
 0xa7a   : > { %v2607_v43 = vmul.f32 %v2605_v35, %v2600_v14 }
 0xa7b   : > { %2610 = vst [vmem:[#allocation2] sm:$0xff] %v2608_v42 }
 0xa7c   : > { %2826 = vst [vmem:[%s3373_s18 + $0x70] sm:$0xff] %v2608_v42  ;;  %v2609_v11 = vadd.f32 %v2607_v43, %v4334_v15 }
 0xa7e   : > { %2611 = vst [vmem:[#allocation2 + $0x8] sm:$0xff] %v2609_v11 }
 0xa7f   : > { %2827 = vst [vmem:[%s3373_s18 + $0x78] sm:$0xff] %v2609_v11 }
 0xa80   : > { %3161 = shalt.err (!%p3158_p7)
}
 0xa81   : > { %s3237_s18 = smov 256   ;;  %s3238_s26 = smov 512  }
 0xa82   : > { %s3239_s19 = smov 16  }
 0xa83   : > { %2836 = dma.vmem_to_hbm [thread:$0]  (%p3337_p3), %s2632_s29, 2048, %s2634_s11, %s2616_s27, %s3237_s18, %s3238_s26, %s3239_s19  }
 0xa84 PF: > { %p2842_p9 = scmp.ge.s32.totalorder %s3230_s14, 2  ;;  %s2648_s22 = sand.u32 1, %s3202_s9  }
 0xa85   : > { %s2649_s24 = scalar_lea.sflag [#allocation8], %s2648_s22 }
 0xa86   : > { %p2839_p10 = pnand %p2842_p9, %p3346_p8 }
 0xa88   : > { %p2840_p11 = pneg %p2839_p10 }
 0xa8a   : > { %3197 = dma.done.wait (%p2840_p11), %s2649_s24, 2048  }
 0xa8b   : > { %3199 = vsyncadd (%p2840_p11), %s2649_s24, 4294965248  ;;  %s33_s14 = sadd.s32 1, %s3230_s14   ;;  %s4512_s20 = sld [smem:[#allocation11_spill]] }
 0xa8c   : > { %p30_p12 = scmp.ge.s32.totalorder %s33_s14, 10   ;;  %s4513_s9 = smov %s3206_s10 }
 0xa8d   : > { %s4514_s10 = smov %s3210_s0  ;;  %s4515_s0 = smov %s3355_s25 }
 0xa8e   : > { %s4516_s11 = smov %s3222_s12  ;;  %s4517_s1 = smov %s3226_s13 }
 0xa8f   : > { %s4518_s12 = smov %s4521_s17  ;;  %32 = sbr.rel (!%p30_p12) target bundleno = 12 (0xc), region = 107 }
 0xa91   : > { %s4519_s13 = smov %s4512_s20 }
 0xa94   :  { %2655 = vsyncpa [#allocation8], 1 }
 0xa95   :  { %2657 = vsyncpa [#allocation8 + $0x1], 1 }

</bundles_post_ra>
